<compile_context>
chip_gen: v7x
topology: tpu7x:2x2x1
jax: 0.10.0
libtpu: 0.0.40
codegen_flags: <defaults>
</compile_context>

<pallas_src>
import math

import jax
import jax.numpy as jnp
from jax.experimental import pallas as pl
from jax.experimental.pallas import tpu as pltpu  # noqa: F401  (TPU backend)

# ---- small, module-consistent hyperparameters -------------------------------
D_MODEL    = 8                       # d_model (feature dim)
NHEAD      = 2                       # nhead
DH         = D_MODEL // NHEAD        # per-head dim
D_HID      = 32                      # dim_feedforward
NLAYERS_E  = 2                       # encoder layers (small stand-in for 64)
NLAYERS_D  = 2                       # decoder layers (small stand-in for 16)
NTOKEN     = 8                       # tgt window length (power of two)
SRC_LEN    = 16                      # src sequence length
BATCH      = 2                       # tgt batch
TGT_TOT    = BATCH * NTOKEN          # stacked decoder rows
EPS        = 1e-5                    # LayerNorm eps (PyTorch default)
ATTN_SCALE = 1.0 / math.sqrt(DH)
NEG_INF    = -1e30                   # additive mask value (safe: row diag kept)

PARAM_ORDER = (
    'e_qkv_w', 'e_qkv_b', 'e_o_w', 'e_o_b', 'e_ln1',
    'e_w1', 'e_b1', 'e_w2', 'e_b2', 'e_ln2',
    'd_qkv_w', 'd_qkv_b', 'd_o_w', 'd_o_b', 'd_ln1',
    'd_cq_w', 'd_cq_b', 'd_ckv_w', 'd_ckv_b', 'd_co_w', 'd_co_b', 'd_ln2',
    'd_w1', 'd_b1', 'd_w2', 'd_b2', 'd_ln3',
)


# ------------------------------ shared math ----------------------------------
# These helpers run both inside the Pallas kernel (on Refs) and on the host
# (on plain arrays) for the pure-JAX reference check; Refs and arrays both
# support `[...]` / `[l]` / `[l, 0]` indexing.

def _causal_mask(n):
    r = jax.lax.broadcasted_iota(jnp.int32, (n, n), 0)
    c = jax.lax.broadcasted_iota(jnp.int32, (n, n), 1)
    return jnp.where(c <= r, 0.0, NEG_INF).astype(jnp.float32)


def _block_causal_mask(nb, n):
    # Block-diagonal causal mask over nb stacked length-n sequences.
    # n is a power of two, so "same block" == ((i ^ j) < n)  (no int division).
    t = nb * n
    r = jax.lax.broadcasted_iota(jnp.int32, (t, t), 0)
    c = jax.lax.broadcasted_iota(jnp.int32, (t, t), 1)
    ok = ((r ^ c) < n) & (c <= r)
    return jnp.where(ok, 0.0, NEG_INF).astype(jnp.float32)


def _layernorm(z, gamma, beta):
    mean = jnp.mean(z, axis=-1, keepdims=True)
    var = jnp.mean(jnp.square(z - mean), axis=-1, keepdims=True)
    return (z - mean) * jax.lax.rsqrt(var + EPS) * gamma + beta


def _split_heads(x, base=0):
    # (S, >= base + E) -> (NHEAD, S, DH) via static lane slices + leading stack.
    return jnp.stack(
        [x[:, base + h * DH: base + (h + 1) * DH] for h in range(NHEAD)], axis=0)


def _merge_heads(x):
    # (NHEAD, S, DH) -> (S, NHEAD*DH) lane concatenation.
    return jnp.concatenate([x[h] for h in range(NHEAD)], axis=-1)


def _attend(q, k, v, mask, approx):
    # q: (H, Sq, DH), k/v: (H, Sk, DH); one batched matmul for scores and one
    # for P@V (no per-head Python loop).
    s = jnp.einsum('hqd,hkd->hqk', q, k, preferred_element_type=jnp.float32)
    s = s * ATTN_SCALE
    if mask is not None:
        s = s + mask
    m = jnp.max(s, axis=-1, keepdims=True)
    p = jnp.exp(s - m)
    denom = jnp.sum(p, axis=-1, keepdims=True)
    if approx:
        p = p * pl.reciprocal(denom, approx=True)   # EUP slot (in-kernel only)
    else:
        p = p / denom
    return jnp.einsum('hqk,hkd->hqd', p, v, preferred_element_type=jnp.float32)


def _self_attn(x, w_qkv, b_qkv, w_o, b_o, mask, approx):
    # Fused Q/K/V projection: single (S,E)@(E,3E) matmul + one bias add.
    qkv = jnp.dot(x, w_qkv, preferred_element_type=jnp.float32) + b_qkv
    q = _split_heads(qkv, 0)
    k = _split_heads(qkv, D_MODEL)
    v = _split_heads(qkv, 2 * D_MODEL)
    o = _merge_heads(_attend(q, k, v, mask, approx))
    # Fused head-concat + out-projection: single (S,E)@(E,E) matmul.
    return jnp.dot(o, w_o, preferred_element_type=jnp.float32) + b_o


def _cross_attn(x_q, kv, w_q, b_q, w_o, b_o, approx):
    q = _split_heads(jnp.dot(x_q, w_q, preferred_element_type=jnp.float32) + b_q)
    k, v = kv
    o = _merge_heads(_attend(q, k, v, None, approx))
    return jnp.dot(o, w_o, preferred_element_type=jnp.float32) + b_o


def _ffn(x, w1, b1, w2, b2):
    h = jnp.maximum(jnp.dot(x, w1, preferred_element_type=jnp.float32) + b1, 0.0)
    return jnp.dot(h, w2, preferred_element_type=jnp.float32) + b2


def _forward_compute(src, tgt,
                     e_qkv_w, e_qkv_b, e_o_w, e_o_b, e_ln1,
                     e_w1, e_b1, e_w2, e_b2, e_ln2,
                     d_qkv_w, d_qkv_b, d_o_w, d_o_b, d_ln1,
                     d_cq_w, d_cq_b, d_ckv_w, d_ckv_b, d_co_w, d_co_b, d_ln2,
                     d_w1, d_b1, d_w2, d_b2, d_ln3,
                     *, approx):
    src_mask = _causal_mask(SRC_LEN)                  # built in-kernel (no DMA)
    tgt_mask = _block_causal_mask(BATCH, NTOKEN)

    # ------------------------------ encoder -------------------------------
    x = src[...]                                      # (SRC_LEN, E)
    for l in range(NLAYERS_E):
        sa = _self_attn(x, e_qkv_w[l], e_qkv_b[l], e_o_w[l], e_o_b[l],
                        src_mask, approx)
        x = _layernorm(x + sa, e_ln1[l, 0], e_ln1[l, 1])
        ff = _ffn(x, e_w1[l], e_b1[l], e_w2[l], e_b2[l])
        x = _layernorm(x + ff, e_ln2[l, 0], e_ln2[l, 1])
    memory = x

    # ------------------------------ decoder -------------------------------
    # All BATCH target rows are stacked into one (BATCH*NTOKEN, E) slab, so
    # every projection / FFN / LayerNorm runs once per layer; self-attention
    # uses the block-diagonal causal mask.  memory[0] is shared by all rows
    # (PyTorch .repeat) so cross-attn K/V are projected once per layer.
    y = tgt[...]                                      # (BATCH*NTOKEN, E)
    for l in range(NLAYERS_D):
        sa = _self_attn(y, d_qkv_w[l], d_qkv_b[l], d_o_w[l], d_o_b[l],
                        tgt_mask, approx)
        y = _layernorm(y + sa, d_ln1[l, 0], d_ln1[l, 1])
        kv_slab = jnp.dot(memory, d_ckv_w[l],
                          preferred_element_type=jnp.float32) + d_ckv_b[l]
        kv = (_split_heads(kv_slab, 0), _split_heads(kv_slab, D_MODEL))
        ca = _cross_attn(y, kv, d_cq_w[l], d_cq_b[l], d_co_w[l], d_co_b[l],
                         approx)
        y = _layernorm(y + ca, d_ln2[l, 0], d_ln2[l, 1])
        ff = _ffn(y, d_w1[l], d_b1[l], d_w2[l], d_b2[l])
        y = _layernorm(y + ff, d_ln3[l, 0], d_ln3[l, 1])

    return memory, y


# --------------------------- fused transformer kernel ------------------------

def _transformer_kernel(*refs):
    mem_ref, out_ref = refs[-2], refs[-1]
    memory, output = _forward_compute(*refs[:-2], approx=True)
    mem_ref[...] = memory          # single stacked store (SRC_LEN, E)
    out_ref[...] = output          # single stacked store (BATCH*NTOKEN, E)


# =============================== host wrapper =================================

def transformer_forward(params, tgt, src):
    """src: (1, SRC_LEN, E); tgt: (BATCH, NTOKEN, E)  ->  (memory, output)."""
    src2d = src.reshape(SRC_LEN, D_MODEL)
    tgt2d = tgt.reshape(TGT_TOT, D_MODEL)
    mem2d, out2d = pl.pallas_call(
        _transformer_kernel,
        out_shape=(jax.ShapeDtypeStruct((SRC_LEN, D_MODEL), jnp.float32),
                   jax.ShapeDtypeStruct((TGT_TOT, D_MODEL), jnp.float32)),
    )(src2d, tgt2d, *[params[k] for k in PARAM_ORDER])
    return (mem2d.reshape(1, SRC_LEN, D_MODEL),
            out2d.reshape(BATCH, NTOKEN, D_MODEL))


def reference_forward(params, tgt, src):
    """Pure-JAX reference: identical math, exact softmax division."""
    mem, out = _forward_compute(
        src.reshape(SRC_LEN, D_MODEL), tgt.reshape(TGT_TOT, D_MODEL),
        *[params[k] for k in PARAM_ORDER], approx=False)
    return (mem.reshape(1, SRC_LEN, D_MODEL),
            out.reshape(BATCH, NTOKEN, D_MODEL))


# ============================ deterministic params ============================
# Weights are initialized directly in the packed layouts the kernel consumes:
#   qkv_w = in_proj_weight.T  (E, 3E)  columns ordered [Q | K | V], head h of
#           each block occupying columns h*DH:(h+1)*DH   (PyTorch layout).
#   o_w   = out_proj.weight.T (E, E);  biases packed lane-dense as (1, width).

def init_params(key):
    ks = iter(jax.random.split(key, 24))

    def rnd(shape):
        return jax.random.normal(next(ks), shape, jnp.float32) * 0.05

    def ln(nl):
        return jnp.stack([jnp.ones((nl, 1, D_MODEL), jnp.float32),
                          jnp.zeros((nl, 1, D_MODEL), jnp.float32)], axis=1)

    e3 = 3 * D_MODEL
    p = {}
    # encoder layers (stacked over NLAYERS_E)
    p['e_qkv_w'] = rnd((NLAYERS_E, D_MODEL, e3))
    p['e_qkv_b'] = rnd((NLAYERS_E, 1, e3))
    p['e_o_w']   = rnd((NLAYERS_E, D_MODEL, D_MODEL))
    p['e_o_b']   = rnd((NLAYERS_E, 1, D_MODEL))
    p['e_ln1']   = ln(NLAYERS_E)
    p['e_w1']    = rnd((NLAYERS_E, D_MODEL, D_HID))
    p['e_b1']    = rnd((NLAYERS_E, 1, D_HID))
    p['e_w2']    = rnd((NLAYERS_E, D_HID, D_MODEL))
    p['e_b2']    = rnd((NLAYERS_E, 1, D_MODEL))
    p['e_ln2']   = ln(NLAYERS_E)
    # decoder self-attention
    p['d_qkv_w'] = rnd((NLAYERS_D, D_MODEL, e3))
    p['d_qkv_b'] = rnd((NLAYERS_D, 1, e3))
    p['d_o_w']   = rnd((NLAYERS_D, D_MODEL, D_MODEL))
    p['d_o_b']   = rnd((NLAYERS_D, 1, D_MODEL))
    p['d_ln1']   = ln(NLAYERS_D)
    # decoder cross-attention (Q from tgt; K/V from shared encoder memory)
    p['d_cq_w']  = rnd((NLAYERS_D, D_MODEL, D_MODEL))
    p['d_cq_b']  = rnd((NLAYERS_D, 1, D_MODEL))
    p['d_ckv_w'] = rnd((NLAYERS_D, D_MODEL, 2 * D_MODEL))
    p['d_ckv_b'] = rnd((NLAYERS_D, 1, 2 * D_MODEL))
    p['d_co_w']  = rnd((NLAYERS_D, D_MODEL, D_MODEL))
    p['d_co_b']  = rnd((NLAYERS_D, 1, D_MODEL))
    p['d_ln2']   = ln(NLAYERS_D)
    # decoder FFN
    p['d_w1']    = rnd((NLAYERS_D, D_MODEL, D_HID))
    p['d_b1']    = rnd((NLAYERS_D, 1, D_HID))
    p['d_w2']    = rnd((NLAYERS_D, D_HID, D_MODEL))
    p['d_b2']    = rnd((NLAYERS_D, 1, D_MODEL))
    p['d_ln3']   = ln(NLAYERS_D)
    return p


# ==================================== main ====================================

if __name__ == "__main__":
    assert NTOKEN & (NTOKEN - 1) == 0, "block-diag mask uses the power-of-two xor trick"

    key = jax.random.PRNGKey(0)
    k_params, k_src, k_tgt = jax.random.split(key, 3)
    params = init_params(k_params)

    src = jax.random.normal(k_src, (1, SRC_LEN, D_MODEL), jnp.float32)
    tgt = jax.random.normal(k_tgt, (BATCH, NTOKEN, D_MODEL), jnp.float32)

    fwd = jax.jit(transformer_forward)
    memory, output = fwd(params, tgt, src)
    jax.block_until_ready((memory, output))

    assert memory.shape == (1, SRC_LEN, D_MODEL)
    assert output.shape == (BATCH, NTOKEN, D_MODEL)
    assert bool(jnp.all(jnp.isfinite(memory))) and bool(jnp.all(jnp.isfinite(output)))

    # Pure-JAX reference with the same math (exact softmax divide).  Loose
    # tolerance only absorbs pl.reciprocal(approx=True) in the kernel softmax.
    ref_mem, ref_out = reference_forward(params, tgt, src)
    assert float(jnp.max(jnp.abs(memory - ref_mem))) < 2e-2
    assert float(jnp.max(jnp.abs(output - ref_out))) < 2e-2

    print("KERNEL_OK")
</pallas_src>

<mosaic_0001>
module attributes {stable_mosaic.version = 11 : i64} {
  func.func @_transformer_kernel(%arg0: memref<16x8xf32, #tpu.memory_space<vmem>>, %arg1: memref<16x8xf32, #tpu.memory_space<vmem>>, %arg2: memref<2x8x24xf32, #tpu.memory_space<vmem>>, %arg3: memref<2x1x24xf32, #tpu.memory_space<vmem>>, %arg4: memref<2x8x8xf32, #tpu.memory_space<vmem>>, %arg5: memref<2x1x8xf32, #tpu.memory_space<vmem>>, %arg6: memref<2x2x1x8xf32, #tpu.memory_space<vmem>>, %arg7: memref<2x8x32xf32, #tpu.memory_space<vmem>>, %arg8: memref<2x1x32xf32, #tpu.memory_space<vmem>>, %arg9: memref<2x32x8xf32, #tpu.memory_space<vmem>>, %arg10: memref<2x1x8xf32, #tpu.memory_space<vmem>>, %arg11: memref<2x2x1x8xf32, #tpu.memory_space<vmem>>, %arg12: memref<2x8x24xf32, #tpu.memory_space<vmem>>, %arg13: memref<2x1x24xf32, #tpu.memory_space<vmem>>, %arg14: memref<2x8x8xf32, #tpu.memory_space<vmem>>, %arg15: memref<2x1x8xf32, #tpu.memory_space<vmem>>, %arg16: memref<2x2x1x8xf32, #tpu.memory_space<vmem>>, %arg17: memref<2x8x8xf32, #tpu.memory_space<vmem>>, %arg18: memref<2x1x8xf32, #tpu.memory_space<vmem>>, %arg19: memref<2x8x16xf32, #tpu.memory_space<vmem>>, %arg20: memref<2x1x16xf32, #tpu.memory_space<vmem>>, %arg21: memref<2x8x8xf32, #tpu.memory_space<vmem>>, %arg22: memref<2x1x8xf32, #tpu.memory_space<vmem>>, %arg23: memref<2x2x1x8xf32, #tpu.memory_space<vmem>>, %arg24: memref<2x8x32xf32, #tpu.memory_space<vmem>>, %arg25: memref<2x1x32xf32, #tpu.memory_space<vmem>>, %arg26: memref<2x32x8xf32, #tpu.memory_space<vmem>>, %arg27: memref<2x1x8xf32, #tpu.memory_space<vmem>>, %arg28: memref<2x2x1x8xf32, #tpu.memory_space<vmem>>, %arg29: memref<16x8xf32, #tpu.memory_space<vmem>>, %arg30: memref<16x8xf32, #tpu.memory_space<vmem>>) attributes {dimension_semantics = [], scalar_prefetch = 0 : i64, scratch_operands = 0 : i64, tpu.core_type = #tpu.core_type<tc>} {
    %0 = tpu.iota {dimensions = array<i32: 0>} : vector<16x16xi32>
    %1 = tpu.iota {dimensions = array<i32: 1>} : vector<16x16xi32>
    %2 = arith.cmpi sle, %1, %0 : vector<16x16xi32>
    %cst = arith.constant 0.000000e+00 : f32
    %cst_0 = arith.constant -1.000000e+30 : f32
    %3 = vector.broadcast %cst : f32 to vector<16x16xf32>
    %4 = vector.broadcast %cst_0 : f32 to vector<16x16xf32>
    %5 = arith.select %2, %3, %4 : vector<16x16xi1>, vector<16x16xf32>
    %6 = tpu.iota {dimensions = array<i32: 0>} : vector<16x16xi32>
    %7 = tpu.iota {dimensions = array<i32: 1>} : vector<16x16xi32>
    %8 = arith.xori %6, %7 : vector<16x16xi32>
    %c8_i32 = arith.constant 8 : i32
    %9 = vector.broadcast %c8_i32 : i32 to vector<16x16xi32>
    %10 = arith.cmpi slt, %8, %9 : vector<16x16xi32>
    %11 = arith.cmpi sle, %7, %6 : vector<16x16xi32>
    %12 = arith.andi %10, %11 : vector<16x16xi1>
    %cst_1 = arith.constant 0.000000e+00 : f32
    %cst_2 = arith.constant -1.000000e+30 : f32
    %13 = vector.broadcast %cst_1 : f32 to vector<16x16xf32>
    %14 = vector.broadcast %cst_2 : f32 to vector<16x16xf32>
    %15 = arith.select %12, %13, %14 : vector<16x16xi1>, vector<16x16xf32>
    %c0 = arith.constant 0 : index
    %c0_3 = arith.constant 0 : index
    %16 = vector.load %arg0[%c0, %c0_3] : memref<16x8xf32, #tpu.memory_space<vmem>>, vector<16x8xf32>
    %c0_4 = arith.constant 0 : index
    %c0_5 = arith.constant 0 : index
    %c0_6 = arith.constant 0 : index
    %17 = vector.load %arg2[%c0_4, %c0_5, %c0_6] : memref<2x8x24xf32, #tpu.memory_space<vmem>>, vector<1x8x24xf32>
    %18 = vector.shape_cast %17 : vector<1x8x24xf32> to vector<8x24xf32>
    %c0_7 = arith.constant 0 : index
    %c0_8 = arith.constant 0 : index
    %c0_9 = arith.constant 0 : index
    %19 = vector.load %arg3[%c0_7, %c0_8, %c0_9] : memref<2x1x24xf32, #tpu.memory_space<vmem>>, vector<1x1x24xf32>
    %20 = vector.shape_cast %19 : vector<1x1x24xf32> to vector<1x24xf32>
    %c0_10 = arith.constant 0 : index
    %c0_11 = arith.constant 0 : index
    %c0_12 = arith.constant 0 : index
    %21 = vector.load %arg4[%c0_10, %c0_11, %c0_12] : memref<2x8x8xf32, #tpu.memory_space<vmem>>, vector<1x8x8xf32>
    %22 = vector.shape_cast %21 : vector<1x8x8xf32> to vector<8x8xf32>
    %c0_13 = arith.constant 0 : index
    %c0_14 = arith.constant 0 : index
    %c0_15 = arith.constant 0 : index
    %23 = vector.load %arg5[%c0_13, %c0_14, %c0_15] : memref<2x1x8xf32, #tpu.memory_space<vmem>>, vector<1x1x8xf32>
    %24 = vector.shape_cast %23 : vector<1x1x8xf32> to vector<1x8xf32>
    %cst_16 = arith.constant dense<0.000000e+00> : vector<16x24xf32>
    %25 = tpu.matmul %16, %18, %cst_16 {dimension_numbers = #tpu.dot_dimension_numbers<[1], [0], [0], [1], [0, 0, 1, 1], [], []>} : vector<16x8xf32>, vector<8x24xf32>, vector<16x24xf32> -> vector<16x24xf32>
    %26 = vector.broadcast %20 : vector<1x24xf32> to vector<16x24xf32>
    %27 = arith.addf %25, %26 : vector<16x24xf32>
    %28 = vector.extract_strided_slice %27 {offsets = [0, 0], sizes = [16, 4], strides = [1, 1]} : vector<16x24xf32> to vector<16x4xf32>
    %29 = vector.extract_strided_slice %27 {offsets = [0, 4], sizes = [16, 4], strides = [1, 1]} : vector<16x24xf32> to vector<16x4xf32>
    %30 = vector.shape_cast %28 : vector<16x4xf32> to vector<1x16x4xf32>
    %31 = vector.shape_cast %29 : vector<16x4xf32> to vector<1x16x4xf32>
    %32 = tpu.concatenate %30, %31 in 0 : vector<1x16x4xf32>, vector<1x16x4xf32> -> vector<2x16x4xf32>
    %33 = vector.extract_strided_slice %27 {offsets = [0, 8], sizes = [16, 4], strides = [1, 1]} : vector<16x24xf32> to vector<16x4xf32>
    %34 = vector.extract_strided_slice %27 {offsets = [0, 12], sizes = [16, 4], strides = [1, 1]} : vector<16x24xf32> to vector<16x4xf32>
    %35 = vector.shape_cast %33 : vector<16x4xf32> to vector<1x16x4xf32>
    %36 = vector.shape_cast %34 : vector<16x4xf32> to vector<1x16x4xf32>
    %37 = tpu.concatenate %35, %36 in 0 : vector<1x16x4xf32>, vector<1x16x4xf32> -> vector<2x16x4xf32>
    %38 = vector.extract_strided_slice %27 {offsets = [0, 16], sizes = [16, 4], strides = [1, 1]} : vector<16x24xf32> to vector<16x4xf32>
    %39 = vector.extract_strided_slice %27 {offsets = [0, 20], sizes = [16, 4], strides = [1, 1]} : vector<16x24xf32> to vector<16x4xf32>
    %40 = vector.shape_cast %38 : vector<16x4xf32> to vector<1x16x4xf32>
    %41 = vector.shape_cast %39 : vector<16x4xf32> to vector<1x16x4xf32>
    %42 = tpu.concatenate %40, %41 in 0 : vector<1x16x4xf32>, vector<1x16x4xf32> -> vector<2x16x4xf32>
    "tpu.trace_start"() <{level = 10 : i32, message = "hqd,hkd->hqk"}> : () -> ()
    %cst_17 = arith.constant dense<0.000000e+00> : vector<2x16x16xf32>
    %43 = tpu.matmul %32, %37, %cst_17 {dimension_numbers = #tpu.dot_dimension_numbers<[2], [2], [1], [1], [0, 0, 0, 1, 1, 1], [0], [0]>} : vector<2x16x4xf32>, vector<2x16x4xf32>, vector<2x16x16xf32> -> vector<2x16x16xf32>
    "tpu.trace_stop"() : () -> ()
    %cst_18 = arith.constant 5.000000e-01 : f32
    %44 = vector.broadcast %cst_18 : f32 to vector<2x16x16xf32>
    %45 = arith.mulf %43, %44 : vector<2x16x16xf32>
    %46 = vector.shape_cast %5 : vector<16x16xf32> to vector<1x16x16xf32>
    %47 = vector.broadcast %46 : vector<1x16x16xf32> to vector<2x16x16xf32>
    %48 = arith.addf %45, %47 : vector<2x16x16xf32>
    %cst_19 = arith.constant dense<0xFF800000> : vector<2x16xf32>
    %49 = vector.multi_reduction <maximumf>, %48, %cst_19 [2] : vector<2x16x16xf32> to vector<2x16xf32>
    %50 = vector.shape_cast %49 : vector<2x16xf32> to vector<2x16x1xf32>
    %51 = vector.broadcast %50 : vector<2x16x1xf32> to vector<2x16x16xf32>
    %52 = arith.subf %48, %51 : vector<2x16x16xf32>
    %53 = math.exp %52 : vector<2x16x16xf32>
    %cst_20 = arith.constant dense<0.000000e+00> : vector<2x16xf32>
    %54 = vector.multi_reduction <add>, %53, %cst_20 [2] : vector<2x16x16xf32> to vector<2x16xf32>
    %55 = vector.shape_cast %54 : vector<2x16xf32> to vector<2x16x1xf32>
    %56 = tpu.reciprocal %55 {approx = true} : vector<2x16x1xf32> -> vector<2x16x1xf32>
    %57 = vector.broadcast %56 : vector<2x16x1xf32> to vector<2x16x16xf32>
    %58 = arith.mulf %53, %57 : vector<2x16x16xf32>
    "tpu.trace_start"() <{level = 10 : i32, message = "hqk,hkd->hqd"}> : () -> ()
    %cst_21 = arith.constant dense<0.000000e+00> : vector<2x16x4xf32>
    %59 = tpu.matmul %58, %42, %cst_21 {dimension_numbers = #tpu.dot_dimension_numbers<[2], [1], [1], [2], [0, 0, 0, 1, 1, 2], [0], [0]>} : vector<2x16x16xf32>, vector<2x16x4xf32>, vector<2x16x4xf32> -> vector<2x16x4xf32>
    "tpu.trace_stop"() : () -> ()
    %60 = vector.extract_strided_slice %59 {offsets = [0, 0, 0], sizes = [1, 16, 4], strides = [1, 1, 1]} : vector<2x16x4xf32> to vector<1x16x4xf32>
    %61 = vector.shape_cast %60 : vector<1x16x4xf32> to vector<16x4xf32>
    %62 = vector.extract_strided_slice %59 {offsets = [1, 0, 0], sizes = [1, 16, 4], strides = [1, 1, 1]} : vector<2x16x4xf32> to vector<1x16x4xf32>
    %63 = vector.shape_cast %62 : vector<1x16x4xf32> to vector<16x4xf32>
    %64 = tpu.concatenate %61, %63 in 1 : vector<16x4xf32>, vector<16x4xf32> -> vector<16x8xf32>
    %cst_22 = arith.constant dense<0.000000e+00> : vector<16x8xf32>
    %65 = tpu.matmul %64, %22, %cst_22 {dimension_numbers = #tpu.dot_dimension_numbers<[1], [0], [0], [1], [0, 0, 1, 1], [], []>} : vector<16x8xf32>, vector<8x8xf32>, vector<16x8xf32> -> vector<16x8xf32>
    %66 = vector.broadcast %24 : vector<1x8xf32> to vector<16x8xf32>
    %67 = arith.addf %65, %66 : vector<16x8xf32>
    %68 = arith.addf %16, %67 : vector<16x8xf32>
    %c0_23 = arith.constant 0 : index
    %c0_24 = arith.constant 0 : index
    %c0_25 = arith.constant 0 : index
    %c0_26 = arith.constant 0 : index
    %69 = vector.load %arg6[%c0_23, %c0_24, %c0_25, %c0_26] : memref<2x2x1x8xf32, #tpu.memory_space<vmem>>, vector<1x1x1x8xf32>
    %70 = vector.shape_cast %69 : vector<1x1x1x8xf32> to vector<1x8xf32>
    %c0_27 = arith.constant 0 : index
    %c1 = arith.constant 1 : index
    %c0_28 = arith.constant 0 : index
    %c0_29 = arith.constant 0 : index
    %71 = vector.load %arg6[%c0_27, %c1, %c0_28, %c0_29] : memref<2x2x1x8xf32, #tpu.memory_space<vmem>>, vector<1x1x1x8xf32>
    %72 = vector.shape_cast %71 : vector<1x1x1x8xf32> to vector<1x8xf32>
    %cst_30 = arith.constant dense<0.000000e+00> : vector<16xf32>
    %73 = vector.multi_reduction <add>, %68, %cst_30 [1] : vector<16x8xf32> to vector<16xf32>
    %74 = vector.shape_cast %73 : vector<16xf32> to vector<16x1xf32>
    %cst_31 = arith.constant 8.000000e+00 : f32
    %75 = vector.broadcast %cst_31 : f32 to vector<16x1xf32>
    %76 = arith.divf %74, %75 : vector<16x1xf32>
    %77 = vector.broadcast %76 : vector<16x1xf32> to vector<16x8xf32>
    %78 = arith.subf %68, %77 : vector<16x8xf32>
    %79 = arith.mulf %78, %78 : vector<16x8xf32>
    %cst_32 = arith.constant dense<0.000000e+00> : vector<16xf32>
    %80 = vector.multi_reduction <add>, %79, %cst_32 [1] : vector<16x8xf32> to vector<16xf32>
    %81 = vector.shape_cast %80 : vector<16xf32> to vector<16x1xf32>
    %cst_33 = arith.constant 8.000000e+00 : f32
    %82 = vector.broadcast %cst_33 : f32 to vector<16x1xf32>
    %83 = arith.divf %81, %82 : vector<16x1xf32>
    %84 = vector.broadcast %76 : vector<16x1xf32> to vector<16x8xf32>
    %85 = arith.subf %68, %84 : vector<16x8xf32>
    %cst_34 = arith.constant 9.99999974E-6 : f32
    %86 = vector.broadcast %cst_34 : f32 to vector<16x1xf32>
    %87 = arith.addf %83, %86 : vector<16x1xf32>
    %88 = math.rsqrt %87 : vector<16x1xf32>
    %89 = vector.broadcast %88 : vector<16x1xf32> to vector<16x8xf32>
    %90 = arith.mulf %85, %89 : vector<16x8xf32>
    %91 = vector.broadcast %70 : vector<1x8xf32> to vector<16x8xf32>
    %92 = arith.mulf %90, %91 : vector<16x8xf32>
    %93 = vector.broadcast %72 : vector<1x8xf32> to vector<16x8xf32>
    %94 = arith.addf %92, %93 : vector<16x8xf32>
    %c0_35 = arith.constant 0 : index
    %c0_36 = arith.constant 0 : index
    %c0_37 = arith.constant 0 : index
    %95 = vector.load %arg7[%c0_35, %c0_36, %c0_37] : memref<2x8x32xf32, #tpu.memory_space<vmem>>, vector<1x8x32xf32>
    %96 = vector.shape_cast %95 : vector<1x8x32xf32> to vector<8x32xf32>
    %c0_38 = arith.constant 0 : index
    %c0_39 = arith.constant 0 : index
    %c0_40 = arith.constant 0 : index
    %97 = vector.load %arg8[%c0_38, %c0_39, %c0_40] : memref<2x1x32xf32, #tpu.memory_space<vmem>>, vector<1x1x32xf32>
    %98 = vector.shape_cast %97 : vector<1x1x32xf32> to vector<1x32xf32>
    %c0_41 = arith.constant 0 : index
    %c0_42 = arith.constant 0 : index
    %c0_43 = arith.constant 0 : index
    %99 = vector.load %arg9[%c0_41, %c0_42, %c0_43] : memref<2x32x8xf32, #tpu.memory_space<vmem>>, vector<1x32x8xf32>
    %100 = vector.shape_cast %99 : vector<1x32x8xf32> to vector<32x8xf32>
    %c0_44 = arith.constant 0 : index
    %c0_45 = arith.constant 0 : index
    %c0_46 = arith.constant 0 : index
    %101 = vector.load %arg10[%c0_44, %c0_45, %c0_46] : memref<2x1x8xf32, #tpu.memory_space<vmem>>, vector<1x1x8xf32>
    %102 = vector.shape_cast %101 : vector<1x1x8xf32> to vector<1x8xf32>
    %cst_47 = arith.constant dense<0.000000e+00> : vector<16x32xf32>
    %103 = tpu.matmul %94, %96, %cst_47 {dimension_numbers = #tpu.dot_dimension_numbers<[1], [0], [0], [1], [0, 0, 1, 1], [], []>} : vector<16x8xf32>, vector<8x32xf32>, vector<16x32xf32> -> vector<16x32xf32>
    %104 = vector.broadcast %98 : vector<1x32xf32> to vector<16x32xf32>
    %105 = arith.addf %103, %104 : vector<16x32xf32>
    %cst_48 = arith.constant 0.000000e+00 : f32
    %106 = vector.broadcast %cst_48 : f32 to vector<16x32xf32>
    %107 = arith.maximumf %105, %106 : vector<16x32xf32>
    %cst_49 = arith.constant dense<0.000000e+00> : vector<16x8xf32>
    %108 = tpu.matmul %107, %100, %cst_49 {dimension_numbers = #tpu.dot_dimension_numbers<[1], [0], [0], [1], [0, 0, 1, 1], [], []>} : vector<16x32xf32>, vector<32x8xf32>, vector<16x8xf32> -> vector<16x8xf32>
    %109 = vector.broadcast %102 : vector<1x8xf32> to vector<16x8xf32>
    %110 = arith.addf %108, %109 : vector<16x8xf32>
    %111 = arith.addf %94, %110 : vector<16x8xf32>
    %c0_50 = arith.constant 0 : index
    %c0_51 = arith.constant 0 : index
    %c0_52 = arith.constant 0 : index
    %c0_53 = arith.constant 0 : index
    %112 = vector.load %arg11[%c0_50, %c0_51, %c0_52, %c0_53] : memref<2x2x1x8xf32, #tpu.memory_space<vmem>>, vector<1x1x1x8xf32>
    %113 = vector.shape_cast %112 : vector<1x1x1x8xf32> to vector<1x8xf32>
    %c0_54 = arith.constant 0 : index
    %c1_55 = arith.constant 1 : index
    %c0_56 = arith.constant 0 : index
    %c0_57 = arith.constant 0 : index
    %114 = vector.load %arg11[%c0_54, %c1_55, %c0_56, %c0_57] : memref<2x2x1x8xf32, #tpu.memory_space<vmem>>, vector<1x1x1x8xf32>
    %115 = vector.shape_cast %114 : vector<1x1x1x8xf32> to vector<1x8xf32>
    %cst_58 = arith.constant dense<0.000000e+00> : vector<16xf32>
    %116 = vector.multi_reduction <add>, %111, %cst_58 [1] : vector<16x8xf32> to vector<16xf32>
    %117 = vector.shape_cast %116 : vector<16xf32> to vector<16x1xf32>
    %cst_59 = arith.constant 8.000000e+00 : f32
    %118 = vector.broadcast %cst_59 : f32 to vector<16x1xf32>
    %119 = arith.divf %117, %118 : vector<16x1xf32>
    %120 = vector.broadcast %119 : vector<16x1xf32> to vector<16x8xf32>
    %121 = arith.subf %111, %120 : vector<16x8xf32>
    %122 = arith.mulf %121, %121 : vector<16x8xf32>
    %cst_60 = arith.constant dense<0.000000e+00> : vector<16xf32>
    %123 = vector.multi_reduction <add>, %122, %cst_60 [1] : vector<16x8xf32> to vector<16xf32>
    %124 = vector.shape_cast %123 : vector<16xf32> to vector<16x1xf32>
    %cst_61 = arith.constant 8.000000e+00 : f32
    %125 = vector.broadcast %cst_61 : f32 to vector<16x1xf32>
    %126 = arith.divf %124, %125 : vector<16x1xf32>
    %127 = vector.broadcast %119 : vector<16x1xf32> to vector<16x8xf32>
    %128 = arith.subf %111, %127 : vector<16x8xf32>
    %cst_62 = arith.constant 9.99999974E-6 : f32
    %129 = vector.broadcast %cst_62 : f32 to vector<16x1xf32>
    %130 = arith.addf %126, %129 : vector<16x1xf32>
    %131 = math.rsqrt %130 : vector<16x1xf32>
    %132 = vector.broadcast %131 : vector<16x1xf32> to vector<16x8xf32>
    %133 = arith.mulf %128, %132 : vector<16x8xf32>
    %134 = vector.broadcast %113 : vector<1x8xf32> to vector<16x8xf32>
    %135 = arith.mulf %133, %134 : vector<16x8xf32>
    %136 = vector.broadcast %115 : vector<1x8xf32> to vector<16x8xf32>
    %137 = arith.addf %135, %136 : vector<16x8xf32>
    %c1_63 = arith.constant 1 : index
    %c0_64 = arith.constant 0 : index
    %c0_65 = arith.constant 0 : index
    %138 = vector.load %arg2[%c1_63, %c0_64, %c0_65] : memref<2x8x24xf32, #tpu.memory_space<vmem>>, vector<1x8x24xf32>
    %139 = vector.shape_cast %138 : vector<1x8x24xf32> to vector<8x24xf32>
    %c1_66 = arith.constant 1 : index
    %c0_67 = arith.constant 0 : index
    %c0_68 = arith.constant 0 : index
    %140 = vector.load %arg3[%c1_66, %c0_67, %c0_68] : memref<2x1x24xf32, #tpu.memory_space<vmem>>, vector<1x1x24xf32>
    %141 = vector.shape_cast %140 : vector<1x1x24xf32> to vector<1x24xf32>
    %c1_69 = arith.constant 1 : index
    %c0_70 = arith.constant 0 : index
    %c0_71 = arith.constant 0 : index
    %142 = vector.load %arg4[%c1_69, %c0_70, %c0_71] : memref<2x8x8xf32, #tpu.memory_space<vmem>>, vector<1x8x8xf32>
    %143 = vector.shape_cast %142 : vector<1x8x8xf32> to vector<8x8xf32>
    %c1_72 = arith.constant 1 : index
    %c0_73 = arith.constant 0 : index
    %c0_74 = arith.constant 0 : index
    %144 = vector.load %arg5[%c1_72, %c0_73, %c0_74] : memref<2x1x8xf32, #tpu.memory_space<vmem>>, vector<1x1x8xf32>
    %145 = vector.shape_cast %144 : vector<1x1x8xf32> to vector<1x8xf32>
    %cst_75 = arith.constant dense<0.000000e+00> : vector<16x24xf32>
    %146 = tpu.matmul %137, %139, %cst_75 {dimension_numbers = #tpu.dot_dimension_numbers<[1], [0], [0], [1], [0, 0, 1, 1], [], []>} : vector<16x8xf32>, vector<8x24xf32>, vector<16x24xf32> -> vector<16x24xf32>
    %147 = vector.broadcast %141 : vector<1x24xf32> to vector<16x24xf32>
    %148 = arith.addf %146, %147 : vector<16x24xf32>
    %149 = vector.extract_strided_slice %148 {offsets = [0, 0], sizes = [16, 4], strides = [1, 1]} : vector<16x24xf32> to vector<16x4xf32>
    %150 = vector.extract_strided_slice %148 {offsets = [0, 4], sizes = [16, 4], strides = [1, 1]} : vector<16x24xf32> to vector<16x4xf32>
    %151 = vector.shape_cast %149 : vector<16x4xf32> to vector<1x16x4xf32>
    %152 = vector.shape_cast %150 : vector<16x4xf32> to vector<1x16x4xf32>
    %153 = tpu.concatenate %151, %152 in 0 : vector<1x16x4xf32>, vector<1x16x4xf32> -> vector<2x16x4xf32>
    %154 = vector.extract_strided_slice %148 {offsets = [0, 8], sizes = [16, 4], strides = [1, 1]} : vector<16x24xf32> to vector<16x4xf32>
    %155 = vector.extract_strided_slice %148 {offsets = [0, 12], sizes = [16, 4], strides = [1, 1]} : vector<16x24xf32> to vector<16x4xf32>
    %156 = vector.shape_cast %154 : vector<16x4xf32> to vector<1x16x4xf32>
    %157 = vector.shape_cast %155 : vector<16x4xf32> to vector<1x16x4xf32>
    %158 = tpu.concatenate %156, %157 in 0 : vector<1x16x4xf32>, vector<1x16x4xf32> -> vector<2x16x4xf32>
    %159 = vector.extract_strided_slice %148 {offsets = [0, 16], sizes = [16, 4], strides = [1, 1]} : vector<16x24xf32> to vector<16x4xf32>
    %160 = vector.extract_strided_slice %148 {offsets = [0, 20], sizes = [16, 4], strides = [1, 1]} : vector<16x24xf32> to vector<16x4xf32>
    %161 = vector.shape_cast %159 : vector<16x4xf32> to vector<1x16x4xf32>
    %162 = vector.shape_cast %160 : vector<16x4xf32> to vector<1x16x4xf32>
    %163 = tpu.concatenate %161, %162 in 0 : vector<1x16x4xf32>, vector<1x16x4xf32> -> vector<2x16x4xf32>
    "tpu.trace_start"() <{level = 10 : i32, message = "hqd,hkd->hqk"}> : () -> ()
    %cst_76 = arith.constant dense<0.000000e+00> : vector<2x16x16xf32>
    %164 = tpu.matmul %153, %158, %cst_76 {dimension_numbers = #tpu.dot_dimension_numbers<[2], [2], [1], [1], [0, 0, 0, 1, 1, 1], [0], [0]>} : vector<2x16x4xf32>, vector<2x16x4xf32>, vector<2x16x16xf32> -> vector<2x16x16xf32>
    "tpu.trace_stop"() : () -> ()
    %cst_77 = arith.constant 5.000000e-01 : f32
    %165 = vector.broadcast %cst_77 : f32 to vector<2x16x16xf32>
    %166 = arith.mulf %164, %165 : vector<2x16x16xf32>
    %167 = vector.shape_cast %5 : vector<16x16xf32> to vector<1x16x16xf32>
    %168 = vector.broadcast %167 : vector<1x16x16xf32> to vector<2x16x16xf32>
    %169 = arith.addf %166, %168 : vector<2x16x16xf32>
    %cst_78 = arith.constant dense<0xFF800000> : vector<2x16xf32>
    %170 = vector.multi_reduction <maximumf>, %169, %cst_78 [2] : vector<2x16x16xf32> to vector<2x16xf32>
    %171 = vector.shape_cast %170 : vector<2x16xf32> to vector<2x16x1xf32>
    %172 = vector.broadcast %171 : vector<2x16x1xf32> to vector<2x16x16xf32>
    %173 = arith.subf %169, %172 : vector<2x16x16xf32>
    %174 = math.exp %173 : vector<2x16x16xf32>
    %cst_79 = arith.constant dense<0.000000e+00> : vector<2x16xf32>
    %175 = vector.multi_reduction <add>, %174, %cst_79 [2] : vector<2x16x16xf32> to vector<2x16xf32>
    %176 = vector.shape_cast %175 : vector<2x16xf32> to vector<2x16x1xf32>
    %177 = tpu.reciprocal %176 {approx = true} : vector<2x16x1xf32> -> vector<2x16x1xf32>
    %178 = vector.broadcast %177 : vector<2x16x1xf32> to vector<2x16x16xf32>
    %179 = arith.mulf %174, %178 : vector<2x16x16xf32>
    "tpu.trace_start"() <{level = 10 : i32, message = "hqk,hkd->hqd"}> : () -> ()
    %cst_80 = arith.constant dense<0.000000e+00> : vector<2x16x4xf32>
    %180 = tpu.matmul %179, %163, %cst_80 {dimension_numbers = #tpu.dot_dimension_numbers<[2], [1], [1], [2], [0, 0, 0, 1, 1, 2], [0], [0]>} : vector<2x16x16xf32>, vector<2x16x4xf32>, vector<2x16x4xf32> -> vector<2x16x4xf32>
    "tpu.trace_stop"() : () -> ()
    %181 = vector.extract_strided_slice %180 {offsets = [0, 0, 0], sizes = [1, 16, 4], strides = [1, 1, 1]} : vector<2x16x4xf32> to vector<1x16x4xf32>
    %182 = vector.shape_cast %181 : vector<1x16x4xf32> to vector<16x4xf32>
    %183 = vector.extract_strided_slice %180 {offsets = [1, 0, 0], sizes = [1, 16, 4], strides = [1, 1, 1]} : vector<2x16x4xf32> to vector<1x16x4xf32>
    %184 = vector.shape_cast %183 : vector<1x16x4xf32> to vector<16x4xf32>
    %185 = tpu.concatenate %182, %184 in 1 : vector<16x4xf32>, vector<16x4xf32> -> vector<16x8xf32>
    %cst_81 = arith.constant dense<0.000000e+00> : vector<16x8xf32>
    %186 = tpu.matmul %185, %143, %cst_81 {dimension_numbers = #tpu.dot_dimension_numbers<[1], [0], [0], [1], [0, 0, 1, 1], [], []>} : vector<16x8xf32>, vector<8x8xf32>, vector<16x8xf32> -> vector<16x8xf32>
    %187 = vector.broadcast %145 : vector<1x8xf32> to vector<16x8xf32>
    %188 = arith.addf %186, %187 : vector<16x8xf32>
    %189 = arith.addf %137, %188 : vector<16x8xf32>
    %c1_82 = arith.constant 1 : index
    %c0_83 = arith.constant 0 : index
    %c0_84 = arith.constant 0 : index
    %c0_85 = arith.constant 0 : index
    %190 = vector.load %arg6[%c1_82, %c0_83, %c0_84, %c0_85] : memref<2x2x1x8xf32, #tpu.memory_space<vmem>>, vector<1x1x1x8xf32>
    %191 = vector.shape_cast %190 : vector<1x1x1x8xf32> to vector<1x8xf32>
    %c1_86 = arith.constant 1 : index
    %c1_87 = arith.constant 1 : index
    %c0_88 = arith.constant 0 : index
    %c0_89 = arith.constant 0 : index
    %192 = vector.load %arg6[%c1_86, %c1_87, %c0_88, %c0_89] : memref<2x2x1x8xf32, #tpu.memory_space<vmem>>, vector<1x1x1x8xf32>
    %193 = vector.shape_cast %192 : vector<1x1x1x8xf32> to vector<1x8xf32>
    %cst_90 = arith.constant dense<0.000000e+00> : vector<16xf32>
    %194 = vector.multi_reduction <add>, %189, %cst_90 [1] : vector<16x8xf32> to vector<16xf32>
    %195 = vector.shape_cast %194 : vector<16xf32> to vector<16x1xf32>
    %cst_91 = arith.constant 8.000000e+00 : f32
    %196 = vector.broadcast %cst_91 : f32 to vector<16x1xf32>
    %197 = arith.divf %195, %196 : vector<16x1xf32>
    %198 = vector.broadcast %197 : vector<16x1xf32> to vector<16x8xf32>
    %199 = arith.subf %189, %198 : vector<16x8xf32>
    %200 = arith.mulf %199, %199 : vector<16x8xf32>
    %cst_92 = arith.constant dense<0.000000e+00> : vector<16xf32>
    %201 = vector.multi_reduction <add>, %200, %cst_92 [1] : vector<16x8xf32> to vector<16xf32>
    %202 = vector.shape_cast %201 : vector<16xf32> to vector<16x1xf32>
    %cst_93 = arith.constant 8.000000e+00 : f32
    %203 = vector.broadcast %cst_93 : f32 to vector<16x1xf32>
    %204 = arith.divf %202, %203 : vector<16x1xf32>
    %205 = vector.broadcast %197 : vector<16x1xf32> to vector<16x8xf32>
    %206 = arith.subf %189, %205 : vector<16x8xf32>
    %cst_94 = arith.constant 9.99999974E-6 : f32
    %207 = vector.broadcast %cst_94 : f32 to vector<16x1xf32>
    %208 = arith.addf %204, %207 : vector<16x1xf32>
    %209 = math.rsqrt %208 : vector<16x1xf32>
    %210 = vector.broadcast %209 : vector<16x1xf32> to vector<16x8xf32>
    %211 = arith.mulf %206, %210 : vector<16x8xf32>
    %212 = vector.broadcast %191 : vector<1x8xf32> to vector<16x8xf32>
    %213 = arith.mulf %211, %212 : vector<16x8xf32>
    %214 = vector.broadcast %193 : vector<1x8xf32> to vector<16x8xf32>
    %215 = arith.addf %213, %214 : vector<16x8xf32>
    %c1_95 = arith.constant 1 : index
    %c0_96 = arith.constant 0 : index
    %c0_97 = arith.constant 0 : index
    %216 = vector.load %arg7[%c1_95, %c0_96, %c0_97] : memref<2x8x32xf32, #tpu.memory_space<vmem>>, vector<1x8x32xf32>
    %217 = vector.shape_cast %216 : vector<1x8x32xf32> to vector<8x32xf32>
    %c1_98 = arith.constant 1 : index
    %c0_99 = arith.constant 0 : index
    %c0_100 = arith.constant 0 : index
    %218 = vector.load %arg8[%c1_98, %c0_99, %c0_100] : memref<2x1x32xf32, #tpu.memory_space<vmem>>, vector<1x1x32xf32>
    %219 = vector.shape_cast %218 : vector<1x1x32xf32> to vector<1x32xf32>
    %c1_101 = arith.constant 1 : index
    %c0_102 = arith.constant 0 : index
    %c0_103 = arith.constant 0 : index
    %220 = vector.load %arg9[%c1_101, %c0_102, %c0_103] : memref<2x32x8xf32, #tpu.memory_space<vmem>>, vector<1x32x8xf32>
    %221 = vector.shape_cast %220 : vector<1x32x8xf32> to vector<32x8xf32>
    %c1_104 = arith.constant 1 : index
    %c0_105 = arith.constant 0 : index
    %c0_106 = arith.constant 0 : index
    %222 = vector.load %arg10[%c1_104, %c0_105, %c0_106] : memref<2x1x8xf32, #tpu.memory_space<vmem>>, vector<1x1x8xf32>
    %223 = vector.shape_cast %222 : vector<1x1x8xf32> to vector<1x8xf32>
    %cst_107 = arith.constant dense<0.000000e+00> : vector<16x32xf32>
    %224 = tpu.matmul %215, %217, %cst_107 {dimension_numbers = #tpu.dot_dimension_numbers<[1], [0], [0], [1], [0, 0, 1, 1], [], []>} : vector<16x8xf32>, vector<8x32xf32>, vector<16x32xf32> -> vector<16x32xf32>
    %225 = vector.broadcast %219 : vector<1x32xf32> to vector<16x32xf32>
    %226 = arith.addf %224, %225 : vector<16x32xf32>
    %cst_108 = arith.constant 0.000000e+00 : f32
    %227 = vector.broadcast %cst_108 : f32 to vector<16x32xf32>
    %228 = arith.maximumf %226, %227 : vector<16x32xf32>
    %cst_109 = arith.constant dense<0.000000e+00> : vector<16x8xf32>
    %229 = tpu.matmul %228, %221, %cst_109 {dimension_numbers = #tpu.dot_dimension_numbers<[1], [0], [0], [1], [0, 0, 1, 1], [], []>} : vector<16x32xf32>, vector<32x8xf32>, vector<16x8xf32> -> vector<16x8xf32>
    %230 = vector.broadcast %223 : vector<1x8xf32> to vector<16x8xf32>
    %231 = arith.addf %229, %230 : vector<16x8xf32>
    %232 = arith.addf %215, %231 : vector<16x8xf32>
    %c1_110 = arith.constant 1 : index
    %c0_111 = arith.constant 0 : index
    %c0_112 = arith.constant 0 : index
    %c0_113 = arith.constant 0 : index
    %233 = vector.load %arg11[%c1_110, %c0_111, %c0_112, %c0_113] : memref<2x2x1x8xf32, #tpu.memory_space<vmem>>, vector<1x1x1x8xf32>
    %234 = vector.shape_cast %233 : vector<1x1x1x8xf32> to vector<1x8xf32>
    %c1_114 = arith.constant 1 : index
    %c1_115 = arith.constant 1 : index
    %c0_116 = arith.constant 0 : index
    %c0_117 = arith.constant 0 : index
    %235 = vector.load %arg11[%c1_114, %c1_115, %c0_116, %c0_117] : memref<2x2x1x8xf32, #tpu.memory_space<vmem>>, vector<1x1x1x8xf32>
    %236 = vector.shape_cast %235 : vector<1x1x1x8xf32> to vector<1x8xf32>
    %cst_118 = arith.constant dense<0.000000e+00> : vector<16xf32>
    %237 = vector.multi_reduction <add>, %232, %cst_118 [1] : vector<16x8xf32> to vector<16xf32>
    %238 = vector.shape_cast %237 : vector<16xf32> to vector<16x1xf32>
    %cst_119 = arith.constant 8.000000e+00 : f32
    %239 = vector.broadcast %cst_119 : f32 to vector<16x1xf32>
    %240 = arith.divf %238, %239 : vector<16x1xf32>
    %241 = vector.broadcast %240 : vector<16x1xf32> to vector<16x8xf32>
    %242 = arith.subf %232, %241 : vector<16x8xf32>
    %243 = arith.mulf %242, %242 : vector<16x8xf32>
    %cst_120 = arith.constant dense<0.000000e+00> : vector<16xf32>
    %244 = vector.multi_reduction <add>, %243, %cst_120 [1] : vector<16x8xf32> to vector<16xf32>
    %245 = vector.shape_cast %244 : vector<16xf32> to vector<16x1xf32>
    %cst_121 = arith.constant 8.000000e+00 : f32
    %246 = vector.broadcast %cst_121 : f32 to vector<16x1xf32>
    %247 = arith.divf %245, %246 : vector<16x1xf32>
    %248 = vector.broadcast %240 : vector<16x1xf32> to vector<16x8xf32>
    %249 = arith.subf %232, %248 : vector<16x8xf32>
    %cst_122 = arith.constant 9.99999974E-6 : f32
    %250 = vector.broadcast %cst_122 : f32 to vector<16x1xf32>
    %251 = arith.addf %247, %250 : vector<16x1xf32>
    %252 = math.rsqrt %251 : vector<16x1xf32>
    %253 = vector.broadcast %252 : vector<16x1xf32> to vector<16x8xf32>
    %254 = arith.mulf %249, %253 : vector<16x8xf32>
    %255 = vector.broadcast %234 : vector<1x8xf32> to vector<16x8xf32>
    %256 = arith.mulf %254, %255 : vector<16x8xf32>
    %257 = vector.broadcast %236 : vector<1x8xf32> to vector<16x8xf32>
    %258 = arith.addf %256, %257 : vector<16x8xf32>
    %c0_123 = arith.constant 0 : index
    %c0_124 = arith.constant 0 : index
    %259 = vector.load %arg1[%c0_123, %c0_124] : memref<16x8xf32, #tpu.memory_space<vmem>>, vector<16x8xf32>
    %c0_125 = arith.constant 0 : index
    %c0_126 = arith.constant 0 : index
    %c0_127 = arith.constant 0 : index
    %260 = vector.load %arg12[%c0_125, %c0_126, %c0_127] : memref<2x8x24xf32, #tpu.memory_space<vmem>>, vector<1x8x24xf32>
    %261 = vector.shape_cast %260 : vector<1x8x24xf32> to vector<8x24xf32>
    %c0_128 = arith.constant 0 : index
    %c0_129 = arith.constant 0 : index
    %c0_130 = arith.constant 0 : index
    %262 = vector.load %arg13[%c0_128, %c0_129, %c0_130] : memref<2x1x24xf32, #tpu.memory_space<vmem>>, vector<1x1x24xf32>
    %263 = vector.shape_cast %262 : vector<1x1x24xf32> to vector<1x24xf32>
    %c0_131 = arith.constant 0 : index
    %c0_132 = arith.constant 0 : index
    %c0_133 = arith.constant 0 : index
    %264 = vector.load %arg14[%c0_131, %c0_132, %c0_133] : memref<2x8x8xf32, #tpu.memory_space<vmem>>, vector<1x8x8xf32>
    %265 = vector.shape_cast %264 : vector<1x8x8xf32> to vector<8x8xf32>
    %c0_134 = arith.constant 0 : index
    %c0_135 = arith.constant 0 : index
    %c0_136 = arith.constant 0 : index
    %266 = vector.load %arg15[%c0_134, %c0_135, %c0_136] : memref<2x1x8xf32, #tpu.memory_space<vmem>>, vector<1x1x8xf32>
    %267 = vector.shape_cast %266 : vector<1x1x8xf32> to vector<1x8xf32>
    %cst_137 = arith.constant dense<0.000000e+00> : vector<16x24xf32>
    %268 = tpu.matmul %259, %261, %cst_137 {dimension_numbers = #tpu.dot_dimension_numbers<[1], [0], [0], [1], [0, 0, 1, 1], [], []>} : vector<16x8xf32>, vector<8x24xf32>, vector<16x24xf32> -> vector<16x24xf32>
    %269 = vector.broadcast %263 : vector<1x24xf32> to vector<16x24xf32>
    %270 = arith.addf %268, %269 : vector<16x24xf32>
    %271 = vector.extract_strided_slice %270 {offsets = [0, 0], sizes = [16, 4], strides = [1, 1]} : vector<16x24xf32> to vector<16x4xf32>
    %272 = vector.extract_strided_slice %270 {offsets = [0, 4], sizes = [16, 4], strides = [1, 1]} : vector<16x24xf32> to vector<16x4xf32>
    %273 = vector.shape_cast %271 : vector<16x4xf32> to vector<1x16x4xf32>
    %274 = vector.shape_cast %272 : vector<16x4xf32> to vector<1x16x4xf32>
    %275 = tpu.concatenate %273, %274 in 0 : vector<1x16x4xf32>, vector<1x16x4xf32> -> vector<2x16x4xf32>
    %276 = vector.extract_strided_slice %270 {offsets = [0, 8], sizes = [16, 4], strides = [1, 1]} : vector<16x24xf32> to vector<16x4xf32>
    %277 = vector.extract_strided_slice %270 {offsets = [0, 12], sizes = [16, 4], strides = [1, 1]} : vector<16x24xf32> to vector<16x4xf32>
    %278 = vector.shape_cast %276 : vector<16x4xf32> to vector<1x16x4xf32>
    %279 = vector.shape_cast %277 : vector<16x4xf32> to vector<1x16x4xf32>
    %280 = tpu.concatenate %278, %279 in 0 : vector<1x16x4xf32>, vector<1x16x4xf32> -> vector<2x16x4xf32>
    %281 = vector.extract_strided_slice %270 {offsets = [0, 16], sizes = [16, 4], strides = [1, 1]} : vector<16x24xf32> to vector<16x4xf32>
    %282 = vector.extract_strided_slice %270 {offsets = [0, 20], sizes = [16, 4], strides = [1, 1]} : vector<16x24xf32> to vector<16x4xf32>
    %283 = vector.shape_cast %281 : vector<16x4xf32> to vector<1x16x4xf32>
    %284 = vector.shape_cast %282 : vector<16x4xf32> to vector<1x16x4xf32>
    %285 = tpu.concatenate %283, %284 in 0 : vector<1x16x4xf32>, vector<1x16x4xf32> -> vector<2x16x4xf32>
    "tpu.trace_start"() <{level = 10 : i32, message = "hqd,hkd->hqk"}> : () -> ()
    %cst_138 = arith.constant dense<0.000000e+00> : vector<2x16x16xf32>
    %286 = tpu.matmul %275, %280, %cst_138 {dimension_numbers = #tpu.dot_dimension_numbers<[2], [2], [1], [1], [0, 0, 0, 1, 1, 1], [0], [0]>} : vector<2x16x4xf32>, vector<2x16x4xf32>, vector<2x16x16xf32> -> vector<2x16x16xf32>
    "tpu.trace_stop"() : () -> ()
    %cst_139 = arith.constant 5.000000e-01 : f32
    %287 = vector.broadcast %cst_139 : f32 to vector<2x16x16xf32>
    %288 = arith.mulf %286, %287 : vector<2x16x16xf32>
    %289 = vector.shape_cast %15 : vector<16x16xf32> to vector<1x16x16xf32>
    %290 = vector.broadcast %289 : vector<1x16x16xf32> to vector<2x16x16xf32>
    %291 = arith.addf %288, %290 : vector<2x16x16xf32>
    %cst_140 = arith.constant dense<0xFF800000> : vector<2x16xf32>
    %292 = vector.multi_reduction <maximumf>, %291, %cst_140 [2] : vector<2x16x16xf32> to vector<2x16xf32>
    %293 = vector.shape_cast %292 : vector<2x16xf32> to vector<2x16x1xf32>
    %294 = vector.broadcast %293 : vector<2x16x1xf32> to vector<2x16x16xf32>
    %295 = arith.subf %291, %294 : vector<2x16x16xf32>
    %296 = math.exp %295 : vector<2x16x16xf32>
    %cst_141 = arith.constant dense<0.000000e+00> : vector<2x16xf32>
    %297 = vector.multi_reduction <add>, %296, %cst_141 [2] : vector<2x16x16xf32> to vector<2x16xf32>
    %298 = vector.shape_cast %297 : vector<2x16xf32> to vector<2x16x1xf32>
    %299 = tpu.reciprocal %298 {approx = true} : vector<2x16x1xf32> -> vector<2x16x1xf32>
    %300 = vector.broadcast %299 : vector<2x16x1xf32> to vector<2x16x16xf32>
    %301 = arith.mulf %296, %300 : vector<2x16x16xf32>
    "tpu.trace_start"() <{level = 10 : i32, message = "hqk,hkd->hqd"}> : () -> ()
    %cst_142 = arith.constant dense<0.000000e+00> : vector<2x16x4xf32>
    %302 = tpu.matmul %301, %285, %cst_142 {dimension_numbers = #tpu.dot_dimension_numbers<[2], [1], [1], [2], [0, 0, 0, 1, 1, 2], [0], [0]>} : vector<2x16x16xf32>, vector<2x16x4xf32>, vector<2x16x4xf32> -> vector<2x16x4xf32>
    "tpu.trace_stop"() : () -> ()
    %303 = vector.extract_strided_slice %302 {offsets = [0, 0, 0], sizes = [1, 16, 4], strides = [1, 1, 1]} : vector<2x16x4xf32> to vector<1x16x4xf32>
    %304 = vector.shape_cast %303 : vector<1x16x4xf32> to vector<16x4xf32>
    %305 = vector.extract_strided_slice %302 {offsets = [1, 0, 0], sizes = [1, 16, 4], strides = [1, 1, 1]} : vector<2x16x4xf32> to vector<1x16x4xf32>
    %306 = vector.shape_cast %305 : vector<1x16x4xf32> to vector<16x4xf32>
    %307 = tpu.concatenate %304, %306 in 1 : vector<16x4xf32>, vector<16x4xf32> -> vector<16x8xf32>
    %cst_143 = arith.constant dense<0.000000e+00> : vector<16x8xf32>
    %308 = tpu.matmul %307, %265, %cst_143 {dimension_numbers = #tpu.dot_dimension_numbers<[1], [0], [0], [1], [0, 0, 1, 1], [], []>} : vector<16x8xf32>, vector<8x8xf32>, vector<16x8xf32> -> vector<16x8xf32>
    %309 = vector.broadcast %267 : vector<1x8xf32> to vector<16x8xf32>
    %310 = arith.addf %308, %309 : vector<16x8xf32>
    %311 = arith.addf %259, %310 : vector<16x8xf32>
    %c0_144 = arith.constant 0 : index
    %c0_145 = arith.constant 0 : index
    %c0_146 = arith.constant 0 : index
    %c0_147 = arith.constant 0 : index
    %312 = vector.load %arg16[%c0_144, %c0_145, %c0_146, %c0_147] : memref<2x2x1x8xf32, #tpu.memory_space<vmem>>, vector<1x1x1x8xf32>
    %313 = vector.shape_cast %312 : vector<1x1x1x8xf32> to vector<1x8xf32>
    %c0_148 = arith.constant 0 : index
    %c1_149 = arith.constant 1 : index
    %c0_150 = arith.constant 0 : index
    %c0_151 = arith.constant 0 : index
    %314 = vector.load %arg16[%c0_148, %c1_149, %c0_150, %c0_151] : memref<2x2x1x8xf32, #tpu.memory_space<vmem>>, vector<1x1x1x8xf32>
    %315 = vector.shape_cast %314 : vector<1x1x1x8xf32> to vector<1x8xf32>
    %cst_152 = arith.constant dense<0.000000e+00> : vector<16xf32>
    %316 = vector.multi_reduction <add>, %311, %cst_152 [1] : vector<16x8xf32> to vector<16xf32>
    %317 = vector.shape_cast %316 : vector<16xf32> to vector<16x1xf32>
    %cst_153 = arith.constant 8.000000e+00 : f32
    %318 = vector.broadcast %cst_153 : f32 to vector<16x1xf32>
    %319 = arith.divf %317, %318 : vector<16x1xf32>
    %320 = vector.broadcast %319 : vector<16x1xf32> to vector<16x8xf32>
    %321 = arith.subf %311, %320 : vector<16x8xf32>
    %322 = arith.mulf %321, %321 : vector<16x8xf32>
    %cst_154 = arith.constant dense<0.000000e+00> : vector<16xf32>
    %323 = vector.multi_reduction <add>, %322, %cst_154 [1] : vector<16x8xf32> to vector<16xf32>
    %324 = vector.shape_cast %323 : vector<16xf32> to vector<16x1xf32>
    %cst_155 = arith.constant 8.000000e+00 : f32
    %325 = vector.broadcast %cst_155 : f32 to vector<16x1xf32>
    %326 = arith.divf %324, %325 : vector<16x1xf32>
    %327 = vector.broadcast %319 : vector<16x1xf32> to vector<16x8xf32>
    %328 = arith.subf %311, %327 : vector<16x8xf32>
    %cst_156 = arith.constant 9.99999974E-6 : f32
    %329 = vector.broadcast %cst_156 : f32 to vector<16x1xf32>
    %330 = arith.addf %326, %329 : vector<16x1xf32>
    %331 = math.rsqrt %330 : vector<16x1xf32>
    %332 = vector.broadcast %331 : vector<16x1xf32> to vector<16x8xf32>
    %333 = arith.mulf %328, %332 : vector<16x8xf32>
    %334 = vector.broadcast %313 : vector<1x8xf32> to vector<16x8xf32>
    %335 = arith.mulf %333, %334 : vector<16x8xf32>
    %336 = vector.broadcast %315 : vector<1x8xf32> to vector<16x8xf32>
    %337 = arith.addf %335, %336 : vector<16x8xf32>
    %c0_157 = arith.constant 0 : index
    %c0_158 = arith.constant 0 : index
    %c0_159 = arith.constant 0 : index
    %338 = vector.load %arg19[%c0_157, %c0_158, %c0_159] : memref<2x8x16xf32, #tpu.memory_space<vmem>>, vector<1x8x16xf32>
    %339 = vector.shape_cast %338 : vector<1x8x16xf32> to vector<8x16xf32>
    %cst_160 = arith.constant dense<0.000000e+00> : vector<16x16xf32>
    %340 = tpu.matmul %258, %339, %cst_160 {dimension_numbers = #tpu.dot_dimension_numbers<[1], [0], [0], [1], [0, 0, 1, 1], [], []>} : vector<16x8xf32>, vector<8x16xf32>, vector<16x16xf32> -> vector<16x16xf32>
    %c0_161 = arith.constant 0 : index
    %c0_162 = arith.constant 0 : index
    %c0_163 = arith.constant 0 : index
    %341 = vector.load %arg20[%c0_161, %c0_162, %c0_163] : memref<2x1x16xf32, #tpu.memory_space<vmem>>, vector<1x1x16xf32>
    %342 = vector.shape_cast %341 : vector<1x1x16xf32> to vector<1x16xf32>
    %343 = vector.broadcast %342 : vector<1x16xf32> to vector<16x16xf32>
    %344 = arith.addf %340, %343 : vector<16x16xf32>
    %345 = vector.extract_strided_slice %344 {offsets = [0, 0], sizes = [16, 4], strides = [1, 1]} : vector<16x16xf32> to vector<16x4xf32>
    %346 = vector.extract_strided_slice %344 {offsets = [0, 4], sizes = [16, 4], strides = [1, 1]} : vector<16x16xf32> to vector<16x4xf32>
    %347 = vector.shape_cast %345 : vector<16x4xf32> to vector<1x16x4xf32>
    %348 = vector.shape_cast %346 : vector<16x4xf32> to vector<1x16x4xf32>
    %349 = tpu.concatenate %347, %348 in 0 : vector<1x16x4xf32>, vector<1x16x4xf32> -> vector<2x16x4xf32>
    %350 = vector.extract_strided_slice %344 {offsets = [0, 8], sizes = [16, 4], strides = [1, 1]} : vector<16x16xf32> to vector<16x4xf32>
    %351 = vector.extract_strided_slice %344 {offsets = [0, 12], sizes = [16, 4], strides = [1, 1]} : vector<16x16xf32> to vector<16x4xf32>
    %352 = vector.shape_cast %350 : vector<16x4xf32> to vector<1x16x4xf32>
    %353 = vector.shape_cast %351 : vector<16x4xf32> to vector<1x16x4xf32>
    %354 = tpu.concatenate %352, %353 in 0 : vector<1x16x4xf32>, vector<1x16x4xf32> -> vector<2x16x4xf32>
    %c0_164 = arith.constant 0 : index
    %c0_165 = arith.constant 0 : index
    %c0_166 = arith.constant 0 : index
    %355 = vector.load %arg17[%c0_164, %c0_165, %c0_166] : memref<2x8x8xf32, #tpu.memory_space<vmem>>, vector<1x8x8xf32>
    %356 = vector.shape_cast %355 : vector<1x8x8xf32> to vector<8x8xf32>
    %c0_167 = arith.constant 0 : index
    %c0_168 = arith.constant 0 : index
    %c0_169 = arith.constant 0 : index
    %357 = vector.load %arg18[%c0_167, %c0_168, %c0_169] : memref<2x1x8xf32, #tpu.memory_space<vmem>>, vector<1x1x8xf32>
    %358 = vector.shape_cast %357 : vector<1x1x8xf32> to vector<1x8xf32>
    %c0_170 = arith.constant 0 : index
    %c0_171 = arith.constant 0 : index
    %c0_172 = arith.constant 0 : index
    %359 = vector.load %arg21[%c0_170, %c0_171, %c0_172] : memref<2x8x8xf32, #tpu.memory_space<vmem>>, vector<1x8x8xf32>
    %360 = vector.shape_cast %359 : vector<1x8x8xf32> to vector<8x8xf32>
    %c0_173 = arith.constant 0 : index
    %c0_174 = arith.constant 0 : index
    %c0_175 = arith.constant 0 : index
    %361 = vector.load %arg22[%c0_173, %c0_174, %c0_175] : memref<2x1x8xf32, #tpu.memory_space<vmem>>, vector<1x1x8xf32>
    %362 = vector.shape_cast %361 : vector<1x1x8xf32> to vector<1x8xf32>
    %cst_176 = arith.constant dense<0.000000e+00> : vector<16x8xf32>
    %363 = tpu.matmul %337, %356, %cst_176 {dimension_numbers = #tpu.dot_dimension_numbers<[1], [0], [0], [1], [0, 0, 1, 1], [], []>} : vector<16x8xf32>, vector<8x8xf32>, vector<16x8xf32> -> vector<16x8xf32>
    %364 = vector.broadcast %358 : vector<1x8xf32> to vector<16x8xf32>
    %365 = arith.addf %363, %364 : vector<16x8xf32>
    %366 = vector.extract_strided_slice %365 {offsets = [0, 0], sizes = [16, 4], strides = [1, 1]} : vector<16x8xf32> to vector<16x4xf32>
    %367 = vector.extract_strided_slice %365 {offsets = [0, 4], sizes = [16, 4], strides = [1, 1]} : vector<16x8xf32> to vector<16x4xf32>
    %368 = vector.shape_cast %366 : vector<16x4xf32> to vector<1x16x4xf32>
    %369 = vector.shape_cast %367 : vector<16x4xf32> to vector<1x16x4xf32>
    %370 = tpu.concatenate %368, %369 in 0 : vector<1x16x4xf32>, vector<1x16x4xf32> -> vector<2x16x4xf32>
    "tpu.trace_start"() <{level = 10 : i32, message = "hqd,hkd->hqk"}> : () -> ()
    %cst_177 = arith.constant dense<0.000000e+00> : vector<2x16x16xf32>
    %371 = tpu.matmul %370, %349, %cst_177 {dimension_numbers = #tpu.dot_dimension_numbers<[2], [2], [1], [1], [0, 0, 0, 1, 1, 1], [0], [0]>} : vector<2x16x4xf32>, vector<2x16x4xf32>, vector<2x16x16xf32> -> vector<2x16x16xf32>
    "tpu.trace_stop"() : () -> ()
    %cst_178 = arith.constant 5.000000e-01 : f32
    %372 = vector.broadcast %cst_178 : f32 to vector<2x16x16xf32>
    %373 = arith.mulf %371, %372 : vector<2x16x16xf32>
    %cst_179 = arith.constant dense<0xFF800000> : vector<2x16xf32>
    %374 = vector.multi_reduction <maximumf>, %373, %cst_179 [2] : vector<2x16x16xf32> to vector<2x16xf32>
    %375 = vector.shape_cast %374 : vector<2x16xf32> to vector<2x16x1xf32>
    %376 = vector.broadcast %375 : vector<2x16x1xf32> to vector<2x16x16xf32>
    %377 = arith.subf %373, %376 : vector<2x16x16xf32>
    %378 = math.exp %377 : vector<2x16x16xf32>
    %cst_180 = arith.constant dense<0.000000e+00> : vector<2x16xf32>
    %379 = vector.multi_reduction <add>, %378, %cst_180 [2] : vector<2x16x16xf32> to vector<2x16xf32>
    %380 = vector.shape_cast %379 : vector<2x16xf32> to vector<2x16x1xf32>
    %381 = tpu.reciprocal %380 {approx = true} : vector<2x16x1xf32> -> vector<2x16x1xf32>
    %382 = vector.broadcast %381 : vector<2x16x1xf32> to vector<2x16x16xf32>
    %383 = arith.mulf %378, %382 : vector<2x16x16xf32>
    "tpu.trace_start"() <{level = 10 : i32, message = "hqk,hkd->hqd"}> : () -> ()
    %cst_181 = arith.constant dense<0.000000e+00> : vector<2x16x4xf32>
    %384 = tpu.matmul %383, %354, %cst_181 {dimension_numbers = #tpu.dot_dimension_numbers<[2], [1], [1], [2], [0, 0, 0, 1, 1, 2], [0], [0]>} : vector<2x16x16xf32>, vector<2x16x4xf32>, vector<2x16x4xf32> -> vector<2x16x4xf32>
    "tpu.trace_stop"() : () -> ()
    %385 = vector.extract_strided_slice %384 {offsets = [0, 0, 0], sizes = [1, 16, 4], strides = [1, 1, 1]} : vector<2x16x4xf32> to vector<1x16x4xf32>
    %386 = vector.shape_cast %385 : vector<1x16x4xf32> to vector<16x4xf32>
    %387 = vector.extract_strided_slice %384 {offsets = [1, 0, 0], sizes = [1, 16, 4], strides = [1, 1, 1]} : vector<2x16x4xf32> to vector<1x16x4xf32>
    %388 = vector.shape_cast %387 : vector<1x16x4xf32> to vector<16x4xf32>
    %389 = tpu.concatenate %386, %388 in 1 : vector<16x4xf32>, vector<16x4xf32> -> vector<16x8xf32>
    %cst_182 = arith.constant dense<0.000000e+00> : vector<16x8xf32>
    %390 = tpu.matmul %389, %360, %cst_182 {dimension_numbers = #tpu.dot_dimension_numbers<[1], [0], [0], [1], [0, 0, 1, 1], [], []>} : vector<16x8xf32>, vector<8x8xf32>, vector<16x8xf32> -> vector<16x8xf32>
    %391 = vector.broadcast %362 : vector<1x8xf32> to vector<16x8xf32>
    %392 = arith.addf %390, %391 : vector<16x8xf32>
    %393 = arith.addf %337, %392 : vector<16x8xf32>
    %c0_183 = arith.constant 0 : index
    %c0_184 = arith.constant 0 : index
    %c0_185 = arith.constant 0 : index
    %c0_186 = arith.constant 0 : index
    %394 = vector.load %arg23[%c0_183, %c0_184, %c0_185, %c0_186] : memref<2x2x1x8xf32, #tpu.memory_space<vmem>>, vector<1x1x1x8xf32>
    %395 = vector.shape_cast %394 : vector<1x1x1x8xf32> to vector<1x8xf32>
    %c0_187 = arith.constant 0 : index
    %c1_188 = arith.constant 1 : index
    %c0_189 = arith.constant 0 : index
    %c0_190 = arith.constant 0 : index
    %396 = vector.load %arg23[%c0_187, %c1_188, %c0_189, %c0_190] : memref<2x2x1x8xf32, #tpu.memory_space<vmem>>, vector<1x1x1x8xf32>
    %397 = vector.shape_cast %396 : vector<1x1x1x8xf32> to vector<1x8xf32>
    %cst_191 = arith.constant dense<0.000000e+00> : vector<16xf32>
    %398 = vector.multi_reduction <add>, %393, %cst_191 [1] : vector<16x8xf32> to vector<16xf32>
    %399 = vector.shape_cast %398 : vector<16xf32> to vector<16x1xf32>
    %cst_192 = arith.constant 8.000000e+00 : f32
    %400 = vector.broadcast %cst_192 : f32 to vector<16x1xf32>
    %401 = arith.divf %399, %400 : vector<16x1xf32>
    %402 = vector.broadcast %401 : vector<16x1xf32> to vector<16x8xf32>
    %403 = arith.subf %393, %402 : vector<16x8xf32>
    %404 = arith.mulf %403, %403 : vector<16x8xf32>
    %cst_193 = arith.constant dense<0.000000e+00> : vector<16xf32>
    %405 = vector.multi_reduction <add>, %404, %cst_193 [1] : vector<16x8xf32> to vector<16xf32>
    %406 = vector.shape_cast %405 : vector<16xf32> to vector<16x1xf32>
    %cst_194 = arith.constant 8.000000e+00 : f32
    %407 = vector.broadcast %cst_194 : f32 to vector<16x1xf32>
    %408 = arith.divf %406, %407 : vector<16x1xf32>
    %409 = vector.broadcast %401 : vector<16x1xf32> to vector<16x8xf32>
    %410 = arith.subf %393, %409 : vector<16x8xf32>
    %cst_195 = arith.constant 9.99999974E-6 : f32
    %411 = vector.broadcast %cst_195 : f32 to vector<16x1xf32>
    %412 = arith.addf %408, %411 : vector<16x1xf32>
    %413 = math.rsqrt %412 : vector<16x1xf32>
    %414 = vector.broadcast %413 : vector<16x1xf32> to vector<16x8xf32>
    %415 = arith.mulf %410, %414 : vector<16x8xf32>
    %416 = vector.broadcast %395 : vector<1x8xf32> to vector<16x8xf32>
    %417 = arith.mulf %415, %416 : vector<16x8xf32>
    %418 = vector.broadcast %397 : vector<1x8xf32> to vector<16x8xf32>
    %419 = arith.addf %417, %418 : vector<16x8xf32>
    %c0_196 = arith.constant 0 : index
    %c0_197 = arith.constant 0 : index
    %c0_198 = arith.constant 0 : index
    %420 = vector.load %arg24[%c0_196, %c0_197, %c0_198] : memref<2x8x32xf32, #tpu.memory_space<vmem>>, vector<1x8x32xf32>
    %421 = vector.shape_cast %420 : vector<1x8x32xf32> to vector<8x32xf32>
    %c0_199 = arith.constant 0 : index
    %c0_200 = arith.constant 0 : index
    %c0_201 = arith.constant 0 : index
    %422 = vector.load %arg25[%c0_199, %c0_200, %c0_201] : memref<2x1x32xf32, #tpu.memory_space<vmem>>, vector<1x1x32xf32>
    %423 = vector.shape_cast %422 : vector<1x1x32xf32> to vector<1x32xf32>
    %c0_202 = arith.constant 0 : index
    %c0_203 = arith.constant 0 : index
    %c0_204 = arith.constant 0 : index
    %424 = vector.load %arg26[%c0_202, %c0_203, %c0_204] : memref<2x32x8xf32, #tpu.memory_space<vmem>>, vector<1x32x8xf32>
    %425 = vector.shape_cast %424 : vector<1x32x8xf32> to vector<32x8xf32>
    %c0_205 = arith.constant 0 : index
    %c0_206 = arith.constant 0 : index
    %c0_207 = arith.constant 0 : index
    %426 = vector.load %arg27[%c0_205, %c0_206, %c0_207] : memref<2x1x8xf32, #tpu.memory_space<vmem>>, vector<1x1x8xf32>
    %427 = vector.shape_cast %426 : vector<1x1x8xf32> to vector<1x8xf32>
    %cst_208 = arith.constant dense<0.000000e+00> : vector<16x32xf32>
    %428 = tpu.matmul %419, %421, %cst_208 {dimension_numbers = #tpu.dot_dimension_numbers<[1], [0], [0], [1], [0, 0, 1, 1], [], []>} : vector<16x8xf32>, vector<8x32xf32>, vector<16x32xf32> -> vector<16x32xf32>
    %429 = vector.broadcast %423 : vector<1x32xf32> to vector<16x32xf32>
    %430 = arith.addf %428, %429 : vector<16x32xf32>
    %cst_209 = arith.constant 0.000000e+00 : f32
    %431 = vector.broadcast %cst_209 : f32 to vector<16x32xf32>
    %432 = arith.maximumf %430, %431 : vector<16x32xf32>
    %cst_210 = arith.constant dense<0.000000e+00> : vector<16x8xf32>
    %433 = tpu.matmul %432, %425, %cst_210 {dimension_numbers = #tpu.dot_dimension_numbers<[1], [0], [0], [1], [0, 0, 1, 1], [], []>} : vector<16x32xf32>, vector<32x8xf32>, vector<16x8xf32> -> vector<16x8xf32>
    %434 = vector.broadcast %427 : vector<1x8xf32> to vector<16x8xf32>
    %435 = arith.addf %433, %434 : vector<16x8xf32>
    %436 = arith.addf %419, %435 : vector<16x8xf32>
    %c0_211 = arith.constant 0 : index
    %c0_212 = arith.constant 0 : index
    %c0_213 = arith.constant 0 : index
    %c0_214 = arith.constant 0 : index
    %437 = vector.load %arg28[%c0_211, %c0_212, %c0_213, %c0_214] : memref<2x2x1x8xf32, #tpu.memory_space<vmem>>, vector<1x1x1x8xf32>
    %438 = vector.shape_cast %437 : vector<1x1x1x8xf32> to vector<1x8xf32>
    %c0_215 = arith.constant 0 : index
    %c1_216 = arith.constant 1 : index
    %c0_217 = arith.constant 0 : index
    %c0_218 = arith.constant 0 : index
    %439 = vector.load %arg28[%c0_215, %c1_216, %c0_217, %c0_218] : memref<2x2x1x8xf32, #tpu.memory_space<vmem>>, vector<1x1x1x8xf32>
    %440 = vector.shape_cast %439 : vector<1x1x1x8xf32> to vector<1x8xf32>
    %cst_219 = arith.constant dense<0.000000e+00> : vector<16xf32>
    %441 = vector.multi_reduction <add>, %436, %cst_219 [1] : vector<16x8xf32> to vector<16xf32>
    %442 = vector.shape_cast %441 : vector<16xf32> to vector<16x1xf32>
    %cst_220 = arith.constant 8.000000e+00 : f32
    %443 = vector.broadcast %cst_220 : f32 to vector<16x1xf32>
    %444 = arith.divf %442, %443 : vector<16x1xf32>
    %445 = vector.broadcast %444 : vector<16x1xf32> to vector<16x8xf32>
    %446 = arith.subf %436, %445 : vector<16x8xf32>
    %447 = arith.mulf %446, %446 : vector<16x8xf32>
    %cst_221 = arith.constant dense<0.000000e+00> : vector<16xf32>
    %448 = vector.multi_reduction <add>, %447, %cst_221 [1] : vector<16x8xf32> to vector<16xf32>
    %449 = vector.shape_cast %448 : vector<16xf32> to vector<16x1xf32>
    %cst_222 = arith.constant 8.000000e+00 : f32
    %450 = vector.broadcast %cst_222 : f32 to vector<16x1xf32>
    %451 = arith.divf %449, %450 : vector<16x1xf32>
    %452 = vector.broadcast %444 : vector<16x1xf32> to vector<16x8xf32>
    %453 = arith.subf %436, %452 : vector<16x8xf32>
    %cst_223 = arith.constant 9.99999974E-6 : f32
    %454 = vector.broadcast %cst_223 : f32 to vector<16x1xf32>
    %455 = arith.addf %451, %454 : vector<16x1xf32>
    %456 = math.rsqrt %455 : vector<16x1xf32>
    %457 = vector.broadcast %456 : vector<16x1xf32> to vector<16x8xf32>
    %458 = arith.mulf %453, %457 : vector<16x8xf32>
    %459 = vector.broadcast %438 : vector<1x8xf32> to vector<16x8xf32>
    %460 = arith.mulf %458, %459 : vector<16x8xf32>
    %461 = vector.broadcast %440 : vector<1x8xf32> to vector<16x8xf32>
    %462 = arith.addf %460, %461 : vector<16x8xf32>
    %c1_224 = arith.constant 1 : index
    %c0_225 = arith.constant 0 : index
    %c0_226 = arith.constant 0 : index
    %463 = vector.load %arg12[%c1_224, %c0_225, %c0_226] : memref<2x8x24xf32, #tpu.memory_space<vmem>>, vector<1x8x24xf32>
    %464 = vector.shape_cast %463 : vector<1x8x24xf32> to vector<8x24xf32>
    %c1_227 = arith.constant 1 : index
    %c0_228 = arith.constant 0 : index
    %c0_229 = arith.constant 0 : index
    %465 = vector.load %arg13[%c1_227, %c0_228, %c0_229] : memref<2x1x24xf32, #tpu.memory_space<vmem>>, vector<1x1x24xf32>
    %466 = vector.shape_cast %465 : vector<1x1x24xf32> to vector<1x24xf32>
    %c1_230 = arith.constant 1 : index
    %c0_231 = arith.constant 0 : index
    %c0_232 = arith.constant 0 : index
    %467 = vector.load %arg14[%c1_230, %c0_231, %c0_232] : memref<2x8x8xf32, #tpu.memory_space<vmem>>, vector<1x8x8xf32>
    %468 = vector.shape_cast %467 : vector<1x8x8xf32> to vector<8x8xf32>
    %c1_233 = arith.constant 1 : index
    %c0_234 = arith.constant 0 : index
    %c0_235 = arith.constant 0 : index
    %469 = vector.load %arg15[%c1_233, %c0_234, %c0_235] : memref<2x1x8xf32, #tpu.memory_space<vmem>>, vector<1x1x8xf32>
    %470 = vector.shape_cast %469 : vector<1x1x8xf32> to vector<1x8xf32>
    %cst_236 = arith.constant dense<0.000000e+00> : vector<16x24xf32>
    %471 = tpu.matmul %462, %464, %cst_236 {dimension_numbers = #tpu.dot_dimension_numbers<[1], [0], [0], [1], [0, 0, 1, 1], [], []>} : vector<16x8xf32>, vector<8x24xf32>, vector<16x24xf32> -> vector<16x24xf32>
    %472 = vector.broadcast %466 : vector<1x24xf32> to vector<16x24xf32>
    %473 = arith.addf %471, %472 : vector<16x24xf32>
    %474 = vector.extract_strided_slice %473 {offsets = [0, 0], sizes = [16, 4], strides = [1, 1]} : vector<16x24xf32> to vector<16x4xf32>
    %475 = vector.extract_strided_slice %473 {offsets = [0, 4], sizes = [16, 4], strides = [1, 1]} : vector<16x24xf32> to vector<16x4xf32>
    %476 = vector.shape_cast %474 : vector<16x4xf32> to vector<1x16x4xf32>
    %477 = vector.shape_cast %475 : vector<16x4xf32> to vector<1x16x4xf32>
    %478 = tpu.concatenate %476, %477 in 0 : vector<1x16x4xf32>, vector<1x16x4xf32> -> vector<2x16x4xf32>
    %479 = vector.extract_strided_slice %473 {offsets = [0, 8], sizes = [16, 4], strides = [1, 1]} : vector<16x24xf32> to vector<16x4xf32>
    %480 = vector.extract_strided_slice %473 {offsets = [0, 12], sizes = [16, 4], strides = [1, 1]} : vector<16x24xf32> to vector<16x4xf32>
    %481 = vector.shape_cast %479 : vector<16x4xf32> to vector<1x16x4xf32>
    %482 = vector.shape_cast %480 : vector<16x4xf32> to vector<1x16x4xf32>
    %483 = tpu.concatenate %481, %482 in 0 : vector<1x16x4xf32>, vector<1x16x4xf32> -> vector<2x16x4xf32>
    %484 = vector.extract_strided_slice %473 {offsets = [0, 16], sizes = [16, 4], strides = [1, 1]} : vector<16x24xf32> to vector<16x4xf32>
    %485 = vector.extract_strided_slice %473 {offsets = [0, 20], sizes = [16, 4], strides = [1, 1]} : vector<16x24xf32> to vector<16x4xf32>
    %486 = vector.shape_cast %484 : vector<16x4xf32> to vector<1x16x4xf32>
    %487 = vector.shape_cast %485 : vector<16x4xf32> to vector<1x16x4xf32>
    %488 = tpu.concatenate %486, %487 in 0 : vector<1x16x4xf32>, vector<1x16x4xf32> -> vector<2x16x4xf32>
    "tpu.trace_start"() <{level = 10 : i32, message = "hqd,hkd->hqk"}> : () -> ()
    %cst_237 = arith.constant dense<0.000000e+00> : vector<2x16x16xf32>
    %489 = tpu.matmul %478, %483, %cst_237 {dimension_numbers = #tpu.dot_dimension_numbers<[2], [2], [1], [1], [0, 0, 0, 1, 1, 1], [0], [0]>} : vector<2x16x4xf32>, vector<2x16x4xf32>, vector<2x16x16xf32> -> vector<2x16x16xf32>
    "tpu.trace_stop"() : () -> ()
    %cst_238 = arith.constant 5.000000e-01 : f32
    %490 = vector.broadcast %cst_238 : f32 to vector<2x16x16xf32>
    %491 = arith.mulf %489, %490 : vector<2x16x16xf32>
    %492 = vector.shape_cast %15 : vector<16x16xf32> to vector<1x16x16xf32>
    %493 = vector.broadcast %492 : vector<1x16x16xf32> to vector<2x16x16xf32>
    %494 = arith.addf %491, %493 : vector<2x16x16xf32>
    %cst_239 = arith.constant dense<0xFF800000> : vector<2x16xf32>
    %495 = vector.multi_reduction <maximumf>, %494, %cst_239 [2] : vector<2x16x16xf32> to vector<2x16xf32>
    %496 = vector.shape_cast %495 : vector<2x16xf32> to vector<2x16x1xf32>
    %497 = vector.broadcast %496 : vector<2x16x1xf32> to vector<2x16x16xf32>
    %498 = arith.subf %494, %497 : vector<2x16x16xf32>
    %499 = math.exp %498 : vector<2x16x16xf32>
    %cst_240 = arith.constant dense<0.000000e+00> : vector<2x16xf32>
    %500 = vector.multi_reduction <add>, %499, %cst_240 [2] : vector<2x16x16xf32> to vector<2x16xf32>
    %501 = vector.shape_cast %500 : vector<2x16xf32> to vector<2x16x1xf32>
    %502 = tpu.reciprocal %501 {approx = true} : vector<2x16x1xf32> -> vector<2x16x1xf32>
    %503 = vector.broadcast %502 : vector<2x16x1xf32> to vector<2x16x16xf32>
    %504 = arith.mulf %499, %503 : vector<2x16x16xf32>
    "tpu.trace_start"() <{level = 10 : i32, message = "hqk,hkd->hqd"}> : () -> ()
    %cst_241 = arith.constant dense<0.000000e+00> : vector<2x16x4xf32>
    %505 = tpu.matmul %504, %488, %cst_241 {dimension_numbers = #tpu.dot_dimension_numbers<[2], [1], [1], [2], [0, 0, 0, 1, 1, 2], [0], [0]>} : vector<2x16x16xf32>, vector<2x16x4xf32>, vector<2x16x4xf32> -> vector<2x16x4xf32>
    "tpu.trace_stop"() : () -> ()
    %506 = vector.extract_strided_slice %505 {offsets = [0, 0, 0], sizes = [1, 16, 4], strides = [1, 1, 1]} : vector<2x16x4xf32> to vector<1x16x4xf32>
    %507 = vector.shape_cast %506 : vector<1x16x4xf32> to vector<16x4xf32>
    %508 = vector.extract_strided_slice %505 {offsets = [1, 0, 0], sizes = [1, 16, 4], strides = [1, 1, 1]} : vector<2x16x4xf32> to vector<1x16x4xf32>
    %509 = vector.shape_cast %508 : vector<1x16x4xf32> to vector<16x4xf32>
    %510 = tpu.concatenate %507, %509 in 1 : vector<16x4xf32>, vector<16x4xf32> -> vector<16x8xf32>
    %cst_242 = arith.constant dense<0.000000e+00> : vector<16x8xf32>
    %511 = tpu.matmul %510, %468, %cst_242 {dimension_numbers = #tpu.dot_dimension_numbers<[1], [0], [0], [1], [0, 0, 1, 1], [], []>} : vector<16x8xf32>, vector<8x8xf32>, vector<16x8xf32> -> vector<16x8xf32>
    %512 = vector.broadcast %470 : vector<1x8xf32> to vector<16x8xf32>
    %513 = arith.addf %511, %512 : vector<16x8xf32>
    %514 = arith.addf %462, %513 : vector<16x8xf32>
    %c1_243 = arith.constant 1 : index
    %c0_244 = arith.constant 0 : index
    %c0_245 = arith.constant 0 : index
    %c0_246 = arith.constant 0 : index
    %515 = vector.load %arg16[%c1_243, %c0_244, %c0_245, %c0_246] : memref<2x2x1x8xf32, #tpu.memory_space<vmem>>, vector<1x1x1x8xf32>
    %516 = vector.shape_cast %515 : vector<1x1x1x8xf32> to vector<1x8xf32>
    %c1_247 = arith.constant 1 : index
    %c1_248 = arith.constant 1 : index
    %c0_249 = arith.constant 0 : index
    %c0_250 = arith.constant 0 : index
    %517 = vector.load %arg16[%c1_247, %c1_248, %c0_249, %c0_250] : memref<2x2x1x8xf32, #tpu.memory_space<vmem>>, vector<1x1x1x8xf32>
    %518 = vector.shape_cast %517 : vector<1x1x1x8xf32> to vector<1x8xf32>
    %cst_251 = arith.constant dense<0.000000e+00> : vector<16xf32>
    %519 = vector.multi_reduction <add>, %514, %cst_251 [1] : vector<16x8xf32> to vector<16xf32>
    %520 = vector.shape_cast %519 : vector<16xf32> to vector<16x1xf32>
    %cst_252 = arith.constant 8.000000e+00 : f32
    %521 = vector.broadcast %cst_252 : f32 to vector<16x1xf32>
    %522 = arith.divf %520, %521 : vector<16x1xf32>
    %523 = vector.broadcast %522 : vector<16x1xf32> to vector<16x8xf32>
    %524 = arith.subf %514, %523 : vector<16x8xf32>
    %525 = arith.mulf %524, %524 : vector<16x8xf32>
    %cst_253 = arith.constant dense<0.000000e+00> : vector<16xf32>
    %526 = vector.multi_reduction <add>, %525, %cst_253 [1] : vector<16x8xf32> to vector<16xf32>
    %527 = vector.shape_cast %526 : vector<16xf32> to vector<16x1xf32>
    %cst_254 = arith.constant 8.000000e+00 : f32
    %528 = vector.broadcast %cst_254 : f32 to vector<16x1xf32>
    %529 = arith.divf %527, %528 : vector<16x1xf32>
    %530 = vector.broadcast %522 : vector<16x1xf32> to vector<16x8xf32>
    %531 = arith.subf %514, %530 : vector<16x8xf32>
    %cst_255 = arith.constant 9.99999974E-6 : f32
    %532 = vector.broadcast %cst_255 : f32 to vector<16x1xf32>
    %533 = arith.addf %529, %532 : vector<16x1xf32>
    %534 = math.rsqrt %533 : vector<16x1xf32>
    %535 = vector.broadcast %534 : vector<16x1xf32> to vector<16x8xf32>
    %536 = arith.mulf %531, %535 : vector<16x8xf32>
    %537 = vector.broadcast %516 : vector<1x8xf32> to vector<16x8xf32>
    %538 = arith.mulf %536, %537 : vector<16x8xf32>
    %539 = vector.broadcast %518 : vector<1x8xf32> to vector<16x8xf32>
    %540 = arith.addf %538, %539 : vector<16x8xf32>
    %c1_256 = arith.constant 1 : index
    %c0_257 = arith.constant 0 : index
    %c0_258 = arith.constant 0 : index
    %541 = vector.load %arg19[%c1_256, %c0_257, %c0_258] : memref<2x8x16xf32, #tpu.memory_space<vmem>>, vector<1x8x16xf32>
    %542 = vector.shape_cast %541 : vector<1x8x16xf32> to vector<8x16xf32>
    %cst_259 = arith.constant dense<0.000000e+00> : vector<16x16xf32>
    %543 = tpu.matmul %258, %542, %cst_259 {dimension_numbers = #tpu.dot_dimension_numbers<[1], [0], [0], [1], [0, 0, 1, 1], [], []>} : vector<16x8xf32>, vector<8x16xf32>, vector<16x16xf32> -> vector<16x16xf32>
    %c1_260 = arith.constant 1 : index
    %c0_261 = arith.constant 0 : index
    %c0_262 = arith.constant 0 : index
    %544 = vector.load %arg20[%c1_260, %c0_261, %c0_262] : memref<2x1x16xf32, #tpu.memory_space<vmem>>, vector<1x1x16xf32>
    %545 = vector.shape_cast %544 : vector<1x1x16xf32> to vector<1x16xf32>
    %546 = vector.broadcast %545 : vector<1x16xf32> to vector<16x16xf32>
    %547 = arith.addf %543, %546 : vector<16x16xf32>
    %548 = vector.extract_strided_slice %547 {offsets = [0, 0], sizes = [16, 4], strides = [1, 1]} : vector<16x16xf32> to vector<16x4xf32>
    %549 = vector.extract_strided_slice %547 {offsets = [0, 4], sizes = [16, 4], strides = [1, 1]} : vector<16x16xf32> to vector<16x4xf32>
    %550 = vector.shape_cast %548 : vector<16x4xf32> to vector<1x16x4xf32>
    %551 = vector.shape_cast %549 : vector<16x4xf32> to vector<1x16x4xf32>
    %552 = tpu.concatenate %550, %551 in 0 : vector<1x16x4xf32>, vector<1x16x4xf32> -> vector<2x16x4xf32>
    %553 = vector.extract_strided_slice %547 {offsets = [0, 8], sizes = [16, 4], strides = [1, 1]} : vector<16x16xf32> to vector<16x4xf32>
    %554 = vector.extract_strided_slice %547 {offsets = [0, 12], sizes = [16, 4], strides = [1, 1]} : vector<16x16xf32> to vector<16x4xf32>
    %555 = vector.shape_cast %553 : vector<16x4xf32> to vector<1x16x4xf32>
    %556 = vector.shape_cast %554 : vector<16x4xf32> to vector<1x16x4xf32>
    %557 = tpu.concatenate %555, %556 in 0 : vector<1x16x4xf32>, vector<1x16x4xf32> -> vector<2x16x4xf32>
    %c1_263 = arith.constant 1 : index
    %c0_264 = arith.constant 0 : index
    %c0_265 = arith.constant 0 : index
    %558 = vector.load %arg17[%c1_263, %c0_264, %c0_265] : memref<2x8x8xf32, #tpu.memory_space<vmem>>, vector<1x8x8xf32>
    %559 = vector.shape_cast %558 : vector<1x8x8xf32> to vector<8x8xf32>
    %c1_266 = arith.constant 1 : index
    %c0_267 = arith.constant 0 : index
    %c0_268 = arith.constant 0 : index
    %560 = vector.load %arg18[%c1_266, %c0_267, %c0_268] : memref<2x1x8xf32, #tpu.memory_space<vmem>>, vector<1x1x8xf32>
    %561 = vector.shape_cast %560 : vector<1x1x8xf32> to vector<1x8xf32>
    %c1_269 = arith.constant 1 : index
    %c0_270 = arith.constant 0 : index
    %c0_271 = arith.constant 0 : index
    %562 = vector.load %arg21[%c1_269, %c0_270, %c0_271] : memref<2x8x8xf32, #tpu.memory_space<vmem>>, vector<1x8x8xf32>
    %563 = vector.shape_cast %562 : vector<1x8x8xf32> to vector<8x8xf32>
    %c1_272 = arith.constant 1 : index
    %c0_273 = arith.constant 0 : index
    %c0_274 = arith.constant 0 : index
    %564 = vector.load %arg22[%c1_272, %c0_273, %c0_274] : memref<2x1x8xf32, #tpu.memory_space<vmem>>, vector<1x1x8xf32>
    %565 = vector.shape_cast %564 : vector<1x1x8xf32> to vector<1x8xf32>
    %cst_275 = arith.constant dense<0.000000e+00> : vector<16x8xf32>
    %566 = tpu.matmul %540, %559, %cst_275 {dimension_numbers = #tpu.dot_dimension_numbers<[1], [0], [0], [1], [0, 0, 1, 1], [], []>} : vector<16x8xf32>, vector<8x8xf32>, vector<16x8xf32> -> vector<16x8xf32>
    %567 = vector.broadcast %561 : vector<1x8xf32> to vector<16x8xf32>
    %568 = arith.addf %566, %567 : vector<16x8xf32>
    %569 = vector.extract_strided_slice %568 {offsets = [0, 0], sizes = [16, 4], strides = [1, 1]} : vector<16x8xf32> to vector<16x4xf32>
    %570 = vector.extract_strided_slice %568 {offsets = [0, 4], sizes = [16, 4], strides = [1, 1]} : vector<16x8xf32> to vector<16x4xf32>
    %571 = vector.shape_cast %569 : vector<16x4xf32> to vector<1x16x4xf32>
    %572 = vector.shape_cast %570 : vector<16x4xf32> to vector<1x16x4xf32>
    %573 = tpu.concatenate %571, %572 in 0 : vector<1x16x4xf32>, vector<1x16x4xf32> -> vector<2x16x4xf32>
    "tpu.trace_start"() <{level = 10 : i32, message = "hqd,hkd->hqk"}> : () -> ()
    %cst_276 = arith.constant dense<0.000000e+00> : vector<2x16x16xf32>
    %574 = tpu.matmul %573, %552, %cst_276 {dimension_numbers = #tpu.dot_dimension_numbers<[2], [2], [1], [1], [0, 0, 0, 1, 1, 1], [0], [0]>} : vector<2x16x4xf32>, vector<2x16x4xf32>, vector<2x16x16xf32> -> vector<2x16x16xf32>
    "tpu.trace_stop"() : () -> ()
    %cst_277 = arith.constant 5.000000e-01 : f32
    %575 = vector.broadcast %cst_277 : f32 to vector<2x16x16xf32>
    %576 = arith.mulf %574, %575 : vector<2x16x16xf32>
    %cst_278 = arith.constant dense<0xFF800000> : vector<2x16xf32>
    %577 = vector.multi_reduction <maximumf>, %576, %cst_278 [2] : vector<2x16x16xf32> to vector<2x16xf32>
    %578 = vector.shape_cast %577 : vector<2x16xf32> to vector<2x16x1xf32>
    %579 = vector.broadcast %578 : vector<2x16x1xf32> to vector<2x16x16xf32>
    %580 = arith.subf %576, %579 : vector<2x16x16xf32>
    %581 = math.exp %580 : vector<2x16x16xf32>
    %cst_279 = arith.constant dense<0.000000e+00> : vector<2x16xf32>
    %582 = vector.multi_reduction <add>, %581, %cst_279 [2] : vector<2x16x16xf32> to vector<2x16xf32>
    %583 = vector.shape_cast %582 : vector<2x16xf32> to vector<2x16x1xf32>
    %584 = tpu.reciprocal %583 {approx = true} : vector<2x16x1xf32> -> vector<2x16x1xf32>
    %585 = vector.broadcast %584 : vector<2x16x1xf32> to vector<2x16x16xf32>
    %586 = arith.mulf %581, %585 : vector<2x16x16xf32>
    "tpu.trace_start"() <{level = 10 : i32, message = "hqk,hkd->hqd"}> : () -> ()
    %cst_280 = arith.constant dense<0.000000e+00> : vector<2x16x4xf32>
    %587 = tpu.matmul %586, %557, %cst_280 {dimension_numbers = #tpu.dot_dimension_numbers<[2], [1], [1], [2], [0, 0, 0, 1, 1, 2], [0], [0]>} : vector<2x16x16xf32>, vector<2x16x4xf32>, vector<2x16x4xf32> -> vector<2x16x4xf32>
    "tpu.trace_stop"() : () -> ()
    %588 = vector.extract_strided_slice %587 {offsets = [0, 0, 0], sizes = [1, 16, 4], strides = [1, 1, 1]} : vector<2x16x4xf32> to vector<1x16x4xf32>
    %589 = vector.shape_cast %588 : vector<1x16x4xf32> to vector<16x4xf32>
    %590 = vector.extract_strided_slice %587 {offsets = [1, 0, 0], sizes = [1, 16, 4], strides = [1, 1, 1]} : vector<2x16x4xf32> to vector<1x16x4xf32>
    %591 = vector.shape_cast %590 : vector<1x16x4xf32> to vector<16x4xf32>
    %592 = tpu.concatenate %589, %591 in 1 : vector<16x4xf32>, vector<16x4xf32> -> vector<16x8xf32>
    %cst_281 = arith.constant dense<0.000000e+00> : vector<16x8xf32>
    %593 = tpu.matmul %592, %563, %cst_281 {dimension_numbers = #tpu.dot_dimension_numbers<[1], [0], [0], [1], [0, 0, 1, 1], [], []>} : vector<16x8xf32>, vector<8x8xf32>, vector<16x8xf32> -> vector<16x8xf32>
    %594 = vector.broadcast %565 : vector<1x8xf32> to vector<16x8xf32>
    %595 = arith.addf %593, %594 : vector<16x8xf32>
    %596 = arith.addf %540, %595 : vector<16x8xf32>
    %c1_282 = arith.constant 1 : index
    %c0_283 = arith.constant 0 : index
    %c0_284 = arith.constant 0 : index
    %c0_285 = arith.constant 0 : index
    %597 = vector.load %arg23[%c1_282, %c0_283, %c0_284, %c0_285] : memref<2x2x1x8xf32, #tpu.memory_space<vmem>>, vector<1x1x1x8xf32>
    %598 = vector.shape_cast %597 : vector<1x1x1x8xf32> to vector<1x8xf32>
    %c1_286 = arith.constant 1 : index
    %c1_287 = arith.constant 1 : index
    %c0_288 = arith.constant 0 : index
    %c0_289 = arith.constant 0 : index
    %599 = vector.load %arg23[%c1_286, %c1_287, %c0_288, %c0_289] : memref<2x2x1x8xf32, #tpu.memory_space<vmem>>, vector<1x1x1x8xf32>
    %600 = vector.shape_cast %599 : vector<1x1x1x8xf32> to vector<1x8xf32>
    %cst_290 = arith.constant dense<0.000000e+00> : vector<16xf32>
    %601 = vector.multi_reduction <add>, %596, %cst_290 [1] : vector<16x8xf32> to vector<16xf32>
    %602 = vector.shape_cast %601 : vector<16xf32> to vector<16x1xf32>
    %cst_291 = arith.constant 8.000000e+00 : f32
    %603 = vector.broadcast %cst_291 : f32 to vector<16x1xf32>
    %604 = arith.divf %602, %603 : vector<16x1xf32>
    %605 = vector.broadcast %604 : vector<16x1xf32> to vector<16x8xf32>
    %606 = arith.subf %596, %605 : vector<16x8xf32>
    %607 = arith.mulf %606, %606 : vector<16x8xf32>
    %cst_292 = arith.constant dense<0.000000e+00> : vector<16xf32>
    %608 = vector.multi_reduction <add>, %607, %cst_292 [1] : vector<16x8xf32> to vector<16xf32>
    %609 = vector.shape_cast %608 : vector<16xf32> to vector<16x1xf32>
    %cst_293 = arith.constant 8.000000e+00 : f32
    %610 = vector.broadcast %cst_293 : f32 to vector<16x1xf32>
    %611 = arith.divf %609, %610 : vector<16x1xf32>
    %612 = vector.broadcast %604 : vector<16x1xf32> to vector<16x8xf32>
    %613 = arith.subf %596, %612 : vector<16x8xf32>
    %cst_294 = arith.constant 9.99999974E-6 : f32
    %614 = vector.broadcast %cst_294 : f32 to vector<16x1xf32>
    %615 = arith.addf %611, %614 : vector<16x1xf32>
    %616 = math.rsqrt %615 : vector<16x1xf32>
    %617 = vector.broadcast %616 : vector<16x1xf32> to vector<16x8xf32>
    %618 = arith.mulf %613, %617 : vector<16x8xf32>
    %619 = vector.broadcast %598 : vector<1x8xf32> to vector<16x8xf32>
    %620 = arith.mulf %618, %619 : vector<16x8xf32>
    %621 = vector.broadcast %600 : vector<1x8xf32> to vector<16x8xf32>
    %622 = arith.addf %620, %621 : vector<16x8xf32>
    %c1_295 = arith.constant 1 : index
    %c0_296 = arith.constant 0 : index
    %c0_297 = arith.constant 0 : index
    %623 = vector.load %arg24[%c1_295, %c0_296, %c0_297] : memref<2x8x32xf32, #tpu.memory_space<vmem>>, vector<1x8x32xf32>
    %624 = vector.shape_cast %623 : vector<1x8x32xf32> to vector<8x32xf32>
    %c1_298 = arith.constant 1 : index
    %c0_299 = arith.constant 0 : index
    %c0_300 = arith.constant 0 : index
    %625 = vector.load %arg25[%c1_298, %c0_299, %c0_300] : memref<2x1x32xf32, #tpu.memory_space<vmem>>, vector<1x1x32xf32>
    %626 = vector.shape_cast %625 : vector<1x1x32xf32> to vector<1x32xf32>
    %c1_301 = arith.constant 1 : index
    %c0_302 = arith.constant 0 : index
    %c0_303 = arith.constant 0 : index
    %627 = vector.load %arg26[%c1_301, %c0_302, %c0_303] : memref<2x32x8xf32, #tpu.memory_space<vmem>>, vector<1x32x8xf32>
    %628 = vector.shape_cast %627 : vector<1x32x8xf32> to vector<32x8xf32>
    %c1_304 = arith.constant 1 : index
    %c0_305 = arith.constant 0 : index
    %c0_306 = arith.constant 0 : index
    %629 = vector.load %arg27[%c1_304, %c0_305, %c0_306] : memref<2x1x8xf32, #tpu.memory_space<vmem>>, vector<1x1x8xf32>
    %630 = vector.shape_cast %629 : vector<1x1x8xf32> to vector<1x8xf32>
    %cst_307 = arith.constant dense<0.000000e+00> : vector<16x32xf32>
    %631 = tpu.matmul %622, %624, %cst_307 {dimension_numbers = #tpu.dot_dimension_numbers<[1], [0], [0], [1], [0, 0, 1, 1], [], []>} : vector<16x8xf32>, vector<8x32xf32>, vector<16x32xf32> -> vector<16x32xf32>
    %632 = vector.broadcast %626 : vector<1x32xf32> to vector<16x32xf32>
    %633 = arith.addf %631, %632 : vector<16x32xf32>
    %cst_308 = arith.constant 0.000000e+00 : f32
    %634 = vector.broadcast %cst_308 : f32 to vector<16x32xf32>
    %635 = arith.maximumf %633, %634 : vector<16x32xf32>
    %cst_309 = arith.constant dense<0.000000e+00> : vector<16x8xf32>
    %636 = tpu.matmul %635, %628, %cst_309 {dimension_numbers = #tpu.dot_dimension_numbers<[1], [0], [0], [1], [0, 0, 1, 1], [], []>} : vector<16x32xf32>, vector<32x8xf32>, vector<16x8xf32> -> vector<16x8xf32>
    %637 = vector.broadcast %630 : vector<1x8xf32> to vector<16x8xf32>
    %638 = arith.addf %636, %637 : vector<16x8xf32>
    %639 = arith.addf %622, %638 : vector<16x8xf32>
    %c1_310 = arith.constant 1 : index
    %c0_311 = arith.constant 0 : index
    %c0_312 = arith.constant 0 : index
    %c0_313 = arith.constant 0 : index
    %640 = vector.load %arg28[%c1_310, %c0_311, %c0_312, %c0_313] : memref<2x2x1x8xf32, #tpu.memory_space<vmem>>, vector<1x1x1x8xf32>
    %641 = vector.shape_cast %640 : vector<1x1x1x8xf32> to vector<1x8xf32>
    %c1_314 = arith.constant 1 : index
    %c1_315 = arith.constant 1 : index
    %c0_316 = arith.constant 0 : index
    %c0_317 = arith.constant 0 : index
    %642 = vector.load %arg28[%c1_314, %c1_315, %c0_316, %c0_317] : memref<2x2x1x8xf32, #tpu.memory_space<vmem>>, vector<1x1x1x8xf32>
    %643 = vector.shape_cast %642 : vector<1x1x1x8xf32> to vector<1x8xf32>
    %cst_318 = arith.constant dense<0.000000e+00> : vector<16xf32>
    %644 = vector.multi_reduction <add>, %639, %cst_318 [1] : vector<16x8xf32> to vector<16xf32>
    %645 = vector.shape_cast %644 : vector<16xf32> to vector<16x1xf32>
    %cst_319 = arith.constant 8.000000e+00 : f32
    %646 = vector.broadcast %cst_319 : f32 to vector<16x1xf32>
    %647 = arith.divf %645, %646 : vector<16x1xf32>
    %648 = vector.broadcast %647 : vector<16x1xf32> to vector<16x8xf32>
    %649 = arith.subf %639, %648 : vector<16x8xf32>
    %650 = arith.mulf %649, %649 : vector<16x8xf32>
    %cst_320 = arith.constant dense<0.000000e+00> : vector<16xf32>
    %651 = vector.multi_reduction <add>, %650, %cst_320 [1] : vector<16x8xf32> to vector<16xf32>
    %652 = vector.shape_cast %651 : vector<16xf32> to vector<16x1xf32>
    %cst_321 = arith.constant 8.000000e+00 : f32
    %653 = vector.broadcast %cst_321 : f32 to vector<16x1xf32>
    %654 = arith.divf %652, %653 : vector<16x1xf32>
    %655 = vector.broadcast %647 : vector<16x1xf32> to vector<16x8xf32>
    %656 = arith.subf %639, %655 : vector<16x8xf32>
    %cst_322 = arith.constant 9.99999974E-6 : f32
    %657 = vector.broadcast %cst_322 : f32 to vector<16x1xf32>
    %658 = arith.addf %654, %657 : vector<16x1xf32>
    %659 = math.rsqrt %658 : vector<16x1xf32>
    %660 = vector.broadcast %659 : vector<16x1xf32> to vector<16x8xf32>
    %661 = arith.mulf %656, %660 : vector<16x8xf32>
    %662 = vector.broadcast %641 : vector<1x8xf32> to vector<16x8xf32>
    %663 = arith.mulf %661, %662 : vector<16x8xf32>
    %664 = vector.broadcast %643 : vector<1x8xf32> to vector<16x8xf32>
    %665 = arith.addf %663, %664 : vector<16x8xf32>
    %c0_323 = arith.constant 0 : index
    %c0_324 = arith.constant 0 : index
    %666 = vector.load %arg29[%c0_323, %c0_324] : memref<16x8xf32, #tpu.memory_space<vmem>>, vector<16x8xf32>
    tpu.vector_store %arg29[%c0_323, %c0_324], %258 {strides = array<i32>} : memref<16x8xf32, #tpu.memory_space<vmem>>, vector<16x8xf32>,
    %c0_325 = arith.constant 0 : index
    %c0_326 = arith.constant 0 : index
    %667 = vector.load %arg30[%c0_325, %c0_326] : memref<16x8xf32, #tpu.memory_space<vmem>>, vector<16x8xf32>
    tpu.vector_store %arg30[%c0_325, %c0_326], %665 {strides = array<i32>} : memref<16x8xf32, #tpu.memory_space<vmem>>, vector<16x8xf32>,
    return
  }
}

</mosaic_0001>

<bundles_post_ra>
// kernel: transformer_forward.1
= control target key start
LH: loop header
LB: loop body
LE: loop exit
PB: predicated region body
PF: predicated region fallthrough
CT: control target
= control target key end

     0   :  { %s6485_s6 = smov 1   ;;  %s6486_s10 = smov 2   ;;  %s7287_s0 = inlined_call_operand.smem [shape: u32[31], index: -1, kind: input, shape index: {}] }
   0x1   :  { %s6538_s5 = sld [smem:[%s7287_s0]]   ;;  %s6487_s14 = smov 3  }
   0x2   :  { %s6543_s9 = sld [smem:[%s7287_s0 + %s6485_s6]]   ;;  %s6488_s18 = smov 4  }
   0x3   :  { %s6548_s13 = sld [smem:[%s7287_s0 + %s6486_s10]]   ;;  %s6489_s22 = smov 5  }
   0x4   :  { %s6553_s17 = sld [smem:[%s7287_s0 + %s6487_s14]]   ;;  %s6490_s26 = smov 6  }
   0x5   :  { %s6558_s21 = sld [smem:[%s7287_s0 + %s6488_s18]]   ;;  %s6491_s30 = smov 7  }
   0x6   :  { %s6563_s25 = sld [smem:[%s7287_s0 + %s6489_s22]]   ;;  %s6492_s4 = smov 8  }
   0x7   :  { %s6568_s29 = sld [smem:[%s7287_s0 + %s6490_s26]]   ;;  %s6493_s10 = smov 9  }
   0x8   :  { %7301 = sst [smem:[#allocation16_spill]] %s6543_s9  ;;  %s6494_s15 = smov 10  }
   0x9   :  { %s6573_s3 = sld [smem:[%s7287_s0 + %s6491_s30]]   ;;  %s6495_s20 = smov 11  }
   0xa   :  { %s6578_s8 = sld [smem:[%s7287_s0 + %s6492_s4]]   ;;  %s6496_s26 = smov 12  }
   0xb   :  { %s6583_s14 = sld [smem:[%s7287_s0 + %s6493_s10]]   ;;  %s6497_s1 = smov 13  }
   0xc   :  { %s6588_s19 = sld [smem:[%s7287_s0 + %s6494_s15]]   ;;  %s6498_s7 = smov 14  }
   0xd   :  { %s6593_s24 = sld [smem:[%s7287_s0 + %s6495_s20]]   ;;  %s6499_s15 = smov 15  }
   0xe   :  { %s6598_s30 = sld [smem:[%s7287_s0 + %s6496_s26]]   ;;  %s6500_s22 = smov 16  }
   0xf   :  { %s6603_s6 = sld [smem:[%s7287_s0 + %s6497_s1]]   ;;  %s6501_s28 = smov 17  }
  0x10   :  { %s6608_s12 = sld [smem:[%s7287_s0 + %s6498_s7]]   ;;  %s6502_s7 = smov 18  }
  0x11   :  { %s6613_s20 = sld [smem:[%s7287_s0 + %s6499_s15]]   ;;  %s6503_s15 = smov 19  }
  0x12   :  { %s6618_s27 = sld [smem:[%s7287_s0 + %s6500_s22]]   ;;  %s6504_s22 = smov 20  }
  0x13   :  { %7302 = sst [smem:[#allocation17_spill]] %s6593_s24 }
  0x14   :  { %7303 = sst [smem:[#allocation18_spill]] %s6598_s30 }
  0x15   :  { %7304 = sst [smem:[#allocation19_spill]] %s6603_s6 }
  0x16   :  { %7305 = sst [smem:[#allocation20_spill]] %s6608_s12 }
  0x17   :  { %7306 = sst [smem:[#allocation21_spill]] %s6613_s20 }
  0x18   :  { %7307 = sst [smem:[#allocation22_spill]] %s6618_s27 }
  0x19   :  { %s6623_s4 = sld [smem:[%s7287_s0 + %s6501_s28]]   ;;  %s6505_s28 = smov 21  }
  0x1a   :  { %s6628_s12 = sld [smem:[%s7287_s0 + %s6502_s7]]   ;;  %s6506_s7 = smov 22  }
  0x1b   :  { %s6633_s20 = sld [smem:[%s7287_s0 + %s6503_s15]]   ;;  %s6507_s15 = smov 23  }
  0x1c   :  { %s6638_s27 = sld [smem:[%s7287_s0 + %s6504_s22]]   ;;  %s6508_s22 = smov 24  }
  0x1d   :  { %s6648_s6 = sld [smem:[%s7287_s0 + %s6506_s7]]   ;;  %s6510_s7 = smov 26  }
  0x1e   :  { %s6658_s9 = sld [smem:[%s7287_s0 + %s6508_s22]]   ;;  %s6512_s22 = smov 28  }
  0x1f   :  { %7308 = sst [smem:[#allocation23_spill]] %s6623_s4 }
  0x20   :  { %s6643_s4 = sld [smem:[%s7287_s0 + %s6505_s28]]   ;;  %s6509_s28 = smov 25  }
  0x21   :  { %7309 = sst [smem:[#allocation24_spill]] %s6633_s20 }
  0x22   :  { %s6653_s20 = sld [smem:[%s7287_s0 + %s6507_s15]]   ;;  %s6511_s15 = smov 27  }
  0x23   :  { %s6668_s30 = sld [smem:[%s7287_s0 + %s6510_s7]]   ;;  %s6514_s7 = smov 30  }
  0x24   :  { %7312 = sst [smem:[#allocation27_spill]] %s6658_s9 }
  0x25   :  { %s6678_s9 = sld [smem:[%s7287_s0 + %s6512_s22]]  }
  0x26   :  { %7310 = sst [smem:[#allocation25_spill]] %s6643_s4 }
  0x27   :  { %s6663_s4 = sld [smem:[%s7287_s0 + %s6509_s28]]   ;;  %s6513_s28 = smov 29  }
  0x28   :  { %7311 = sst [smem:[#allocation26_spill]] %s6653_s20 }
  0x29   :  { %7313 = sst [smem:[#allocation28_spill]] %s6668_s30 }
  0x2a   :  { %s6673_s20 = sld [smem:[%s7287_s0 + %s6511_s15]]  }
  0x2b   :  { %s6683_s24 = sld [smem:[%s7287_s0 + %s6513_s28]]  }
  0x2c   :  { %s6688_s30 = sld [smem:[%s7287_s0 + %s6514_s7]]  }
  0x2d   :  { %67 = vsyncpa [#allocation3], 0 }
  0x2e   :  { %68 = vsyncpa [#allocation6], 0 }
  0x2f   :  { %69 = vsyncpa [#allocation9], 0 }
  0x30   :  { %70 = vsyncpa [#allocation4], 0  ;;  %s6515_s15 = smov [#allocation5]   ;;  %s6516_s18 = smov [#allocation8]  }
  0x31   :  { %s126_s16 = sshll.u32 %s6515_s15, 4  ;;  %s156_s22 = sshll.u32 %s6516_s18, 4  ;;  %s127_s16 = int_to_ptr.vmem [resolvable:$true] %s126_s16  ;;  %s6690_s22 = int_to_ptr.vmem [resolvable:$true] %s156_s22 }
  0x32   :  { %s6345_s23 = scalar_lea.hbm %s6638_s27, 32 }
  0x33   :  { %p6346_p0 = scmp.ne.s32.totalorder %s6638_s27, %s6345_s23  ;;  %p6349_p1 = scmp.lt.u32.totalorder %s6345_s23, %s6638_s27 }
  0x35   :  { %p6351_p2 = pnand %p6349_p1, %p6346_p0 }
  0x37   :  { %6354 = shalt.err (!%p6351_p2)
}
  0x38   :  { %s6355_s0 = scalar_lea.vmem %s127_s16, 32  ;;  %p6360_p4 = scmp.lt.s32.totalorder %s127_s16, %s127_s16 }
  0x39   :  { %p6356_p3 = scmp.ne.s32.totalorder %s127_s16, %s6355_s0  ;;  %p6361_p5 = scmp.lt.s32.totalorder %s6355_s0, %s6355_s0 }
  0x3b   :  { %p6362_p6 = por %p6361_p5, %p6360_p4 }
  0x3d   :  { %p6363_p7 = pnand %p6362_p6, %p6356_p3 }
  0x3f   :  { %6366 = shalt.err (!%p6363_p7)
}
  0x40   :  { %s6517_s26 = smov 16   ;;  %s6518_s28 = smov 1  }
  0x41   :  { %132 = dma.hbm_to_vmem [thread:$0]  %s6638_s27, 32, %s127_s16, [#allocation6], %s6517_s26, %s6517_s26, %s6518_s28  }
  0x42   :  { %s6367_s1 = scalar_lea.hbm %s6663_s4, 32 }
  0x43   :  { %p6368_p8 = scmp.ne.s32.totalorder %s6663_s4, %s6367_s1  ;;  %p6371_p9 = scmp.lt.u32.totalorder %s6367_s1, %s6663_s4 }
  0x45   :  { %p6373_p10 = pnand %p6371_p9, %p6368_p8 }
  0x47   :  { %6376 = shalt.err (!%p6373_p10)
}
  0x48   :  { %s6377_s2 = scalar_lea.vmem %s6690_s22, 32  ;;  %p6382_p12 = scmp.lt.s32.totalorder %s6690_s22, %s6690_s22 }
  0x49   :  { %p6378_p11 = scmp.ne.s32.totalorder %s6690_s22, %s6377_s2  ;;  %p6383_p13 = scmp.lt.s32.totalorder %s6377_s2, %s6377_s2 }
  0x4b   :  { %p6384_p0 = por %p6383_p13, %p6382_p12 }
  0x4d   :  { %p6385_p1 = pnand %p6384_p0, %p6378_p11 }
  0x4f   :  { %6388 = shalt.err (!%p6385_p1)
}
  0x50   :  { %162 = dma.hbm_to_vmem [thread:$0]  %s6663_s4, 32, %s6690_s22, [#allocation9], %s6517_s26, %s6517_s26, %s6518_s28  }
  0x51   :  { %s6519_s27 = smov [#allocation2]   ;;  %s6520_s10 = smov [#allocation7]  }
  0x52   :  { %s112_s7 = sshll.u32 %s6519_s27, 4  ;;  %s140_s11 = sshll.u32 %s6520_s10, 4  ;;  %s113_s7 = int_to_ptr.vmem [resolvable:$true] %s112_s7  ;;  %s6711_s11 = int_to_ptr.vmem [resolvable:$true] %s140_s11 }
  0x53   :  { %s6389_s15 = scalar_lea.hbm %s6628_s12, 32 }
  0x54   :  { %p6390_p2 = scmp.ne.s32.totalorder %s6628_s12, %s6389_s15  ;;  %p6393_p3 = scmp.lt.u32.totalorder %s6389_s15, %s6628_s12 }
  0x56   :  { %p6395_p4 = pnand %p6393_p3, %p6390_p2 }
  0x58   :  { %6398 = shalt.err (!%p6395_p4)
}
  0x59   :  { %s6399_s16 = scalar_lea.vmem %s113_s7, 32  ;;  %p6404_p6 = scmp.lt.s32.totalorder %s113_s7, %s113_s7 }
  0x5a   :  { %p6400_p5 = scmp.ne.s32.totalorder %s113_s7, %s6399_s16  ;;  %p6405_p7 = scmp.lt.s32.totalorder %s6399_s16, %s6399_s16 }
  0x5c   :  { %p6406_p8 = por %p6405_p7, %p6404_p6 }
  0x5e   :  { %p6407_p9 = pnand %p6406_p8, %p6400_p5 }
  0x60   :  { %6410 = shalt.err (!%p6407_p9)
}
  0x61   :  { %118 = dma.hbm_to_vmem [thread:$0]  %s6628_s12, 32, %s113_s7, [#allocation3], %s6517_s26, %s6517_s26, %s6518_s28  }
  0x62   :  { %s6411_s4 = scalar_lea.hbm %s6648_s6, 32 }
  0x63   :  { %p6412_p10 = scmp.ne.s32.totalorder %s6648_s6, %s6411_s4  ;;  %p6415_p11 = scmp.lt.u32.totalorder %s6411_s4, %s6648_s6 }
  0x65   :  { %p6417_p12 = pnand %p6415_p11, %p6412_p10 }
  0x67   :  { %6420 = shalt.err (!%p6417_p12)
}
  0x68   :  { %s6421_s18 = scalar_lea.vmem %s6711_s11, 32  ;;  %p6426_p0 = scmp.lt.s32.totalorder %s6711_s11, %s6711_s11 }
  0x69   :  { %p6422_p13 = scmp.ne.s32.totalorder %s6711_s11, %s6421_s18  ;;  %p6427_p1 = scmp.lt.s32.totalorder %s6421_s18, %s6421_s18 }
  0x6b   :  { %p6428_p2 = por %p6427_p1, %p6426_p0 }
  0x6d   :  { %p6429_p3 = pnand %p6428_p2, %p6422_p13 }
  0x6f   :  { %6432 = shalt.err (!%p6429_p3)
}
  0x70   :  { %146 = dma.hbm_to_vmem [thread:$0]  %s6648_s6, 32, %s6711_s11, [#allocation6], %s6517_s26, %s6517_s26, %s6518_s28  }
  0x71   :  { %s6521_s12 = smov [#allocation10]   ;;  %s6433_s23 = scalar_lea.hbm %s6673_s20, 32 }
  0x72   :  { %s170_s22 = sshll.u32 %s6521_s12, 4  ;;  %p6434_p4 = scmp.ne.s32.totalorder %s6673_s20, %s6433_s23  ;;  %s171_s22 = int_to_ptr.vmem [resolvable:$true] %s170_s22 }
  0x73   :  { %p6437_p5 = scmp.lt.u32.totalorder %s6433_s23, %s6673_s20 }
  0x75   :  { %p6439_p6 = pnand %p6437_p5, %p6434_p4 }
  0x77   :  { %6442 = shalt.err (!%p6439_p6)
}
  0x78   :  { %s6443_s0 = scalar_lea.vmem %s171_s22, 32  ;;  %p6448_p8 = scmp.lt.s32.totalorder %s171_s22, %s171_s22 }
  0x79   :  { %p6444_p7 = scmp.ne.s32.totalorder %s171_s22, %s6443_s0  ;;  %p6449_p9 = scmp.lt.s32.totalorder %s6443_s0, %s6443_s0 }
  0x7b   :  { %p6450_p10 = por %p6449_p9, %p6448_p8 }
  0x7d   :  { %p6451_p11 = pnand %p6450_p10, %p6444_p7 }
  0x7f   :  { %6454 = shalt.err (!%p6451_p11)
}
  0x80   :  { %176 = dma.hbm_to_vmem [thread:$0]  %s6673_s20, 32, %s171_s22, [#allocation9], %s6517_s26, %s6517_s26, %s6518_s28  }
  0x81   :  { %6477 = dma.done.wait [#allocation3], 32  }
  0x82   :  { %6478 = vsyncadd [#allocation3], 4294967264 }
  0x83   :  { %6479 = dma.done.wait [#allocation6], 64  }
  0x84   :  { %6480 = vsyncadd [#allocation6], 4294967232 }
  0x85   :  { %6481 = dma.done.wait [#allocation9], 64  }
  0x86   :  { %6482 = vsyncadd [#allocation9], 4294967232  ;;  %vm223_vm0 = vcmask 64512   ;;  %v213_v0 = vld [vmem:[%s6548_s13] sm:$0xff]  ;;  %v6744_v2 = vld [vmem:[%s6538_s5 + $0x8] sm:$0xff]  ;;  %vm315_vm1 = vcmask 31744   ;;  %v194_v21 = vlaneseq }
  0x87   :  { %v6741_v1 = vld [vmem:[%s6538_s5] sm:$0xff]  ;;  %5600 = vmatprep.subr.mxu1 %v213_v0  ;;  %s6522_s6 = smov 124   ;;  %s6523_s5 = smov 120   ;;  %vm6765_vm2 = vmpackc.low %vm315_vm1, %vm315_vm1  ;;  %v6524_v26 = vmov -1e+30   ;;  %vm494_vm5 = vcmask 130048  }
  0x88   :  { %5602 = vmatprep.mubr.msk.f32.mxu1 %vm223_vm0, %v6741_v1  ;;  %5601 = vmatpush3.msra.mxu1 %v213_v0  ;;  %v5230_v3 = vld [vmem:[%s6553_s17] ss:$0 sm:$0xff]  ;;  %v6779_v22 = vshrl.u32 %v194_v21, 7  ;;  %v6784_v24 = vand.u32 127, %v194_v21  ;;  %s6525_s20 = smov 112   ;;  %s6526_s26 = smov 4  }
  0x89   :  { %5603 = vmatmul.mubr.msk.f32.vlgmr.msra.gmra.mrb[0].mxu1 %vm223_vm0, %v6744_v2  ;;  %vm960_vm6 = vcmask 261120   ;;  %s7316_s28 = sld [smem:[#allocation17_spill]]  ;;  %s7327_s1 = sld [smem:[#allocation28_spill]] }
  0x8a   :  { %v6782_v23 = vadd.s32 8, %v6779_v22  ;;  %vm199_vm4 = vcmp.le.s32.totalorder %v6784_v24, %v6779_v22  ;;  %s7328_s2 = sld [smem:[#allocation26_spill]]  ;;  %s6527_s27 = smov [#allocation11]  }
  0x8b   :  { %v6800_v30 = vsel %vm199_vm4, 0.0, %v6524_v26  ;;  %s5184_s7 = sshll.u32 %s6527_s27, 4  ;;  %s5185_s7 = int_to_ptr.vmem [resolvable:$true] %s5184_s7 }
  0x8c   :  { %vm200_vm3 = vcmp.le.s32.totalorder %v6784_v24, %v6782_v23  ;;  %s6455_s10 = scalar_lea.vmem %s5185_s7, 256  ;;  %p6460_p13 = scmp.lt.s32.totalorder %s5185_s7, %s5185_s7 }
  0x8d   :  { %v6794_v27 = vsel %vm200_vm3, 0.0, %v6524_v26  ;;  %p6456_p12 = scmp.ne.s32.totalorder %s5185_s7, %s6455_s10  ;;  %p6461_p0 = scmp.lt.s32.totalorder %s6455_s10, %s6455_s10 }
  0x8f   :  { %p6462_p1 = por %p6461_p0, %p6460_p13 }
  0x91   :  { %p6463_p2 = pnand %p6462_p1, %p6456_p12 }
 0x15c   :  { %v5604_v4 = vpop.f32.mrb[0].mxu1 }
 0x15d   :  { %v296_v5 = vpop.f32.mrb[1].mxu1  ;;  %v302_v7 = vadd.f32 %v5604_v4, %v5230_v3 }
 0x15e   :  { %v297_v6 = vadd.f32 %v5230_v3, %v296_v5 }
 0x160   :  { %307 = vrot.lane.b32.xlu0 %v297_v6, %s6522_s6  ;;  %5609 = vmatprep.mubr.msk.f32.mxu1 %vm315_vm1, %v297_v6  ;;  %v6759_v11 = vpack.i.bf16 %v302_v7, %v297_v6 }
 0x164   :  { %309 = vrot.lane.b32.xlu0 %v302_v7, %s6522_s6 }
 0x1d2   :  { %v308_v8 = vpop.permute.xlu0 %307 }
 0x1d3   :  { %5616 = vmatprep.mubr.msk.f32.mxu0 %vm315_vm1, %v308_v8 }
 0x1d6   :  { %v310_v9 = vpop.permute.xlu0 %309 }
 0x1d7   :  { %v6755_v10 = vpack.i.bf16 %v310_v9, %v308_v8 }
 0x1d9   :  { %6100 = vrot.lane.b32.xlu1 %v6755_v10, %s6523_s5 }
 0x1dd   :  { %6105 = vrot.lane.b32.xlu1 %v6759_v11, %s6523_s5 }
 0x24b   :  { %v6101_v12 = vpop.permute.xlu1 %6100 }
 0x24c   :  { %v6103_v13 = vunpack.i.h.bf16 %v6101_v12  ;;  %v6102_v14 = vunpack.i.l.bf16 %v6101_v12 }
 0x24e   :  { %v5908_v16 = vpack.c.bf16 %v6103_v13, %v6102_v14 }
 0x24f   :  { %v6106_v17 = vpop.permute.xlu1 %6105 }
 0x250   :  { %v6108_v18 = vunpack.i.h.bf16 %v6106_v17  ;;  %v6107_v19 = vunpack.i.l.bf16 %v6106_v17  ;;  %5910 = vmatprep.subr.msk.bf16.mxu0 %vm6765_vm2, %v5908_v16 }
 0x251   :  { %5913 = vmatpush3.bf16.xpose.msk.msra.mxu0 %vm6765_vm2, %v5908_v16 }
 0x252   :  { %v5902_v20 = vpack.c.bf16 %v6108_v18, %v6107_v19 }
 0x254   :  { %5904 = vmatprep.subr.msk.bf16.mxu1 %vm6765_vm2, %v5902_v20 }
 0x255   :  { %5907 = vmatpush3.bf16.xpose.msk.msra.mxu1 %vm6765_vm2, %v5902_v20 }
 0x258   :  { %5617 = vmatmul.mubr.msk.f32.vlgmr.msra.gmra.mrb[0].mxu0 %vm315_vm1, %v310_v9 }
 0x25c   :  { %5610 = vmatmul.mubr.msk.f32.vlgmr.msra.gmra.mrb[2].mxu1 %vm315_vm1, %v302_v7 }
 0x32b   :  { %v5618_v25 = vpop.f32.mrb[0].mxu0 }
 0x32c   :  { %v489_v28 = vmul.f32 0.5, %v5618_v25  ;;  %v477_v29 = vpop.f32.mrb[1].mxu0 }
 0x32d   :  { %v488_v31 = vmul.f32 0.5, %v477_v29 }
 0x32e   :  { %v493_v32 = vadd.f32 %v489_v28, %v6794_v27  ;;  %v215_v28 = vld [vmem:[%s6558_s21] sm:$0xff] }
 0x32f   :  { %v5611_v33 = vpop.f32.mrb[2].mxu1  ;;  %v492_v34 = vadd.f32 %v488_v31, %v6800_v30 }
 0x330   :  { %v390_v35 = vpop.f32.mrb[3].mxu1  ;;  %v504_v36 = vsel %vm494_vm5, %v493_v32, -inf  ;;  %v487_v37 = vmul.f32 0.5, %v5611_v33 }
 0x331   :  { %v486_v38 = vmul.f32 0.5, %v390_v35  ;;  %505 = vmax.xlane.f32.xlu1 %v504_v36  ;;  %v501_v39 = vsel %vm494_vm5, %v492_v34, -inf }
 0x332   :  { %502 = vmax.xlane.f32.xlu0 %v501_v39  ;;  %v491_v42 = vadd.f32 %v487_v37, %v6794_v27 }
 0x333   :  { %v490_v40 = vadd.f32 %v486_v38, %v6800_v30  ;;  %v5245_v38 = vld [vmem:[%s6563_s25] ss:$0 sm:$0xff] }
 0x334   :  { %v498_v43 = vsel %vm494_vm5, %v491_v42, -inf }
 0x335   :  { %v495_v41 = vsel %vm494_vm5, %v490_v40, -inf }
 0x336   :  { %496 = vmax.xlane.f32.xlu0 %v495_v41 }
 0x33a   :  { %499 = vmax.xlane.f32.xlu0 %v498_v43 }
 0x3be   :  { %v506_v44 = vpop.xlane.xlu1 %505 }
 0x3bf   :  { %v510_v45 = vsub.f32 %v493_v32, %v506_v44  ;;  %v503_v46 = vpop.xlane.xlu0 %502 }
 0x3c0   :  { %v509_v47 = vsub.f32 %v492_v34, %v503_v46 }
 0x3c1   :  { %v517_v48 = vmul.f32 1.442695, %v510_v45 }
 0x3c2   :  { %v515_v49 = vmul.f32 1.442695, %v509_v47 }
 0x3c3   :  { %6209 = vpow2.f32 %v517_v48  ;;  %v497_v50 = vpop.xlane.xlu0 %496 }
 0x3c4   :  { %6211 = vpow2.f32 %v515_v49  ;;  %v507_v51 = vsub.f32 %v490_v40, %v497_v50 }
 0x3c6   :  { %v511_v52 = vmul.f32 1.442695, %v507_v51 }
 0x3c7   :  { %v500_v53 = vpop.xlane.xlu0 %499 }
 0x3c8   :  { %6213 = vpow2.f32 %v511_v52  ;;  %v508_v54 = vsub.f32 %v491_v42, %v500_v53 }
 0x3ca   :  { %v513_v55 = vmul.f32 1.442695, %v508_v54 }
 0x3cc   :  { %6215 = vpow2.f32 %v513_v55  ;;  %v858_v55 = vld [vmem:[%s6573_s3] sm:$0xff] }
 0x3cd   :  { %v6210_v56 = vpop.eup %6209 }
 0x3ce   :  { %v6212_v57 = vpop.eup %6211  ;;  %v528_v58 = vsel %vm494_vm5, %v6210_v56, 0.0 }
 0x3cf   :  { %529 = vadd.xlane.f32.xlu0 %v528_v58  ;;  %v525_v59 = vsel %vm494_vm5, %v6212_v57, 0.0 }
 0x3d0   :  { %526 = vadd.xlane.f32.xlu1 %v525_v59 }
 0x3d2   :  { %v6214_v60 = vpop.eup %6213 }
 0x3d3   :  { %v519_v61 = vsel %vm494_vm5, %v6214_v60, 0.0 }
 0x3d4   :  { %520 = vadd.xlane.f32.xlu0 %v519_v61 }
 0x3d6   :  { %v6216_v62 = vpop.eup %6215 }
 0x3d7   :  { %v522_v63 = vsel %vm494_vm5, %v6216_v62, 0.0 }
 0x3d8   :  { %523 = vadd.xlane.f32.xlu0 %v522_v63 }
 0x3e1   :  { %6110 = vrot.lane.b32.xlu1 %v6755_v10, %s6525_s20 }
 0x3ee   :  { %6115 = vrot.lane.b32.xlu0 %v6759_v11, %s6525_s20 }
 0x45c   :  { %v530_v0 = vpop.xlane.xlu0 %529 }
 0x45d   :  { %6217 = vrcp.f32 %v530_v0  ;;  %v527_v3 = vpop.xlane.xlu1 %526 }
 0x45e   :  { %6219 = vrcp.f32 %v527_v3 }
 0x461   :  { %v6111_v4 = vpop.permute.xlu1 %6110  ;;  %v521_v5 = vpop.xlane.xlu0 %520 }
 0x462   :  { %v6113_v6 = vunpack.i.h.bf16 %v6111_v4  ;;  %v6112_v7 = vunpack.i.l.bf16 %v6111_v4  ;;  %6221 = vrcp.f32 %v521_v5  ;;  %v5249_v4 = vld [vmem:[%s6568_s29] ss:$0 sm:$0xff] }
 0x464   :  { %v5918_v8 = vpack.c.bf16 %v6113_v6, %v6112_v7 }
 0x465   :  { %v524_v9 = vpop.xlane.xlu0 %523 }
 0x466   :  { %6223 = vrcp.f32 %v524_v9  ;;  %5919 = vmatprep.subr.bf16.mxu0 %v5918_v8 }
 0x467   :  { %v6218_v12 = vpop.eup %6217  ;;  %5921 = vmatpush3.bf16.msra.mxu0 %v5918_v8  ;;  %v5250_v8 = vld [vmem:[%s6568_s29 + $0x1] ss:$0 sm:$0xff] }
 0x468   :  { %v6220_v13 = vpop.eup %6219  ;;  %v538_v17 = vmul.f32 %v6218_v12, %v6210_v56  ;;  %5638 = vmatprep.subr.mxu0 %v858_v55  ;;  %v860_v56 = vld [vmem:[%s6583_s14] sm:$0xff] }
 0x469   :  { %v6116_v10 = vpop.permute.xlu0 %6115  ;;  %v537_v14 = vmul.f32 %v6220_v13, %v6212_v57  ;;  %v861_v57 = vld [vmem:[%s6583_s14 + $0x8] sm:$0xff] }
 0x46a   :  { %v6118_v11 = vunpack.i.h.bf16 %v6116_v10  ;;  %v6117_v16 = vunpack.i.l.bf16 %v6116_v10  ;;  %v5922_v58 = vpack.c.bf16 %v861_v57, %v860_v56 }
 0x46b   :  { %5630 = vmatprep.mubr.msk.f32.mxu0 %vm494_vm5, %v537_v14  ;;  %v862_v14 = vld [vmem:[%s6583_s14 + $0x10] sm:$0xff] }
 0x46c   :  { %v6222_v18 = vpop.eup %6221  ;;  %5631 = vmatmul.mubr.msk.f32.vlgmr.msra.gmra.mrb[2].mxu0 %vm494_vm5, %v538_v17  ;;  %v5914_v19 = vpack.c.bf16 %v6118_v11, %v6117_v16  ;;  %v863_v11 = vld [vmem:[%s6583_s14 + $0x18] sm:$0xff]  ;;  %v5251_v17 = vld [vmem:[%s6578_s8] ss:$0 sm:$0xff] }
 0x46d   :  { %v535_v20 = vmul.f32 %v6222_v18, %v6214_v60  ;;  %5639 = vmatpush3.msra.mxu0 %v858_v55  ;;  %v5926_v16 = vpack.c.bf16 %v863_v11, %v862_v14  ;;  %v5258_v55 = vld [vmem:[%s7316_s28] ss:$0 sm:$0xff] }
 0x46e   :  { %5915 = vmatprep.subr.bf16.mxu1 %v5914_v19 }
 0x46f   :  { %5917 = vmatpush3.bf16.msra.mxu1 %v5914_v19  ;;  %5623 = vmatprep.mubr.msk.f32.mxu1 %vm494_vm5, %v535_v20 }
 0x470   :  { %v6224_v21 = vpop.eup %6223  ;;  %5633 = vmatprep.subr.mxu1 %v215_v28 }
 0x471   :  { %v536_v25 = vmul.f32 %v6224_v21, %v6216_v62 }
 0x473   :  { %5624 = vmatmul.mubr.msk.f32.vlgmr.msra.gmra.mrb[4].mxu1 %vm494_vm5, %v536_v25 }
 0x474   :  { %5634 = vmatpush3.msra.mxu1 %v215_v28 }
 0x475   :  { %5923 = vmatprep.subr.bf16.mxu1 %v5922_v58 }
 0x53f   :  { %v5632_v29 = vpop.f32.mrb[2].mxu0 }
 0x540   :  { %v704_v31 = vpop.f32.mrb[3].mxu0 }
 0x541   :  { %715 = vrot.lane.b32.xlu1 %v704_v31, %s6526_s26 }
 0x545   :  { %717 = vrot.lane.b32.xlu1 %v5632_v29, %s6526_s26  ;;  %v5254_v29 = vld [vmem:[%s6588_s19] ss:$0 sm:$0xff] }
 0x546   :  { %v5625_v32 = vpop.f32.mrb[4].mxu1 }
 0x547   :  { %v617_v33 = vpop.f32.mrb[5].mxu1 }
 0x5b3   :  { %v716_v34 = vpop.permute.xlu1 %715 }
 0x5b4   :  { %v721_v35 = vsel %vm315_vm1, %v617_v33, %v716_v34 }
 0x5b5   :  { %5635 = vmatprep.mubr.msk.f32.mxu1 %vm223_vm0, %v721_v35 }
 0x5b7   :  { %v718_v36 = vpop.permute.xlu1 %717 }
 0x5b8   :  { %v722_v37 = vsel %vm315_vm1, %v5625_v32, %v718_v36 }
 0x5b9   :  { %5636 = vmatmul.mubr.msk.f32.vlgmr.msra.gmra.mrb[6].mxu1 %vm223_vm0, %v722_v37 }
 0x5ba   :  { %5925 = vmatpush3.bf16.msra.mxu1 %v5922_v58 }
 0x5bb   :  { %5927 = vmatprep.subr.bf16.mxu1 %v5926_v16 }
 0x5be   :  { %5929 = vmatpush3.bf16.msra.mxu1 %v5926_v16 }
 0x68c   :  { %v5637_v39 = vpop.f32.mrb[6].mxu1 }
 0x68d   :  { %v807_v40 = vadd.f32 %v5637_v39, %v5245_v38  ;;  %v801_v41 = vpop.f32.mrb[7].mxu1 }
 0x68e   :  { %v802_v42 = vadd.f32 %v5245_v38, %v801_v41 }
 0x68f   :  { %v811_v43 = vadd.f32 %v807_v40, %v6744_v2 }
 0x690   :  { %v810_v44 = vadd.f32 %v802_v42, %v6741_v1 }
 0x691   :  { %v818_v45 = vsel %vm223_vm0, %v811_v43, 0.0 }
 0x692   :  { %819 = vadd.xlane.f32.xlu0 %v818_v45  ;;  %v815_v46 = vsel %vm223_vm0, %v810_v44, 0.0 }
 0x693   :  { %816 = vadd.xlane.f32.xlu1 %v815_v46 }
 0x71f   :  { %v820_v47 = vpop.xlane.xlu0 %819 }
 0x720   :  { %v823_v48 = vmul.f32 0.125, %v820_v47  ;;  %v817_v49 = vpop.xlane.xlu1 %816 }
 0x721   :  { %v822_v50 = vmul.f32 0.125, %v817_v49  ;;  %v5260_v49 = vld [vmem:[%s6548_s13 + $0x8] sm:$0xff]  ;;  %s7317_s13 = sld [smem:[#allocation18_spill]] }
 0x722   :  { %v825_v51 = vsub.f32 %v811_v43, %v823_v48  ;;  %5654 = vmatprep.subr.mxu0 %v5260_v49 }
 0x723   :  { %v824_v52 = vsub.f32 %v810_v44, %v822_v50 }
 0x724   :  { %v827_v53 = vmul.f32 %v825_v51, %v825_v51 }
 0x725   :  { %v826_v54 = vmul.f32 %v824_v52, %v824_v52 }
 0x726   :  { %v831_v2 = vsel %vm223_vm0, %v827_v53, 0.0 }
 0x727   :  { %832 = vadd.xlane.f32.xlu0 %v831_v2  ;;  %v828_v1 = vsel %vm223_vm0, %v826_v54, 0.0 }
 0x728   :  { %829 = vadd.xlane.f32.xlu1 %v828_v1 }
 0x7b4   :  { %v833_v59 = vpop.xlane.xlu0 %832 }
 0x7b5   :  { %v835_v60 = vmul.f32 0.125, %v833_v59  ;;  %v830_v61 = vpop.xlane.xlu1 %829  ;;  %v5259_v59 = vld [vmem:[%s7316_s28 + $0x1] ss:$0 sm:$0xff] }
 0x7b6   :  { %v834_v62 = vmul.f32 0.125, %v830_v61 }
 0x7b7   :  { %v837_v63 = vadd.f32 1e-05, %v835_v60 }
 0x7b8   :  { %v836_v0 = vadd.f32 1e-05, %v834_v62 }
 0x7b9   :  { %6225 = vrsqrt.f32 %v837_v63 }
 0x7ba   :  { %6227 = vrsqrt.f32 %v836_v0  ;;  %v5264_v0 = vld [vmem:[%s6553_s17 + $0x1] ss:$0 sm:$0xff]  ;;  %s7318_s17 = sld [smem:[#allocation16_spill]] }
 0x7c3   :  { %v6226_v3 = vpop.eup %6225 }
 0x7c4   :  { %v6228_v5 = vpop.eup %6227  ;;  %v841_v6 = vmul.f32 %v6226_v3, %v825_v51 }
 0x7c5   :  { %v840_v7 = vmul.f32 %v6228_v5, %v824_v52 }
 0x7c6   :  { %v849_v9 = vmul.f32 %v5249_v4, %v841_v6 }
 0x7c7   :  { %v848_v12 = vmul.f32 %v5249_v4, %v840_v7 }
 0x7c8   :  { %v857_v10 = vadd.f32 %v5250_v8, %v849_v9 }
 0x7c9   :  { %v856_v13 = vadd.f32 %v5250_v8, %v848_v12 }
 0x7cb   :  { %5640 = vmatprep.mubr.msk.f32.mxu0 %vm223_vm0, %v856_v13 }
 0x7cc   :  { %5641 = vmatmul.mubr.msk.f32.vlgmr.msra.gmra.mrb[4].mxu0 %vm223_vm0, %v857_v10 }
 0x7cd   :  { %5655 = vmatpush3.msra.mxu0 %v5260_v49 }
 0x89f   :  { %v5642_v18 = vpop.f32.mrb[4].mxu0 }
 0x8a0   :  { %v949_v19 = vadd.f32 %v5642_v18, %v5251_v17  ;;  %v943_v20 = vpop.f32.mrb[5].mxu0 }
 0x8a1   :  { %v944_v21 = vadd.f32 %v5251_v17, %v943_v20 }
 0x8a2   :  { %v953_v28 = vmax.f32 %v949_v19, 0.0 }
 0x8a3   :  { %v952_v25 = vmax.f32 %v944_v21, 0.0 }
 0x8a5   :  { %5651 = vmatprep.mubr.msk.f32.mxu1 %vm960_vm6, %v952_v25 }
 0x8a6   :  { %5652 = vmatmul.mubr.msk.f32.vlgmr.msra.gmra.mrb[8].mxu1 %vm960_vm6, %v953_v28 }
 0x979   :  { %v5653_v31 = vpop.f32.mrb[8].mxu1 }
 0x97a   :  { %v1039_v32 = vadd.f32 %v5653_v31, %v5254_v29  ;;  %v1033_v33 = vpop.f32.mrb[9].mxu1 }
 0x97b   :  { %v1034_v34 = vadd.f32 %v5254_v29, %v1033_v33 }
 0x97c   :  { %v1043_v35 = vadd.f32 %v1039_v32, %v857_v10 }
 0x97d   :  { %v1042_v36 = vadd.f32 %v1034_v34, %v856_v13 }
 0x97e   :  { %v1050_v37 = vsel %vm223_vm0, %v1043_v35, 0.0 }
 0x97f   :  { %1051 = vadd.xlane.f32.xlu0 %v1050_v37  ;;  %v1047_v38 = vsel %vm223_vm0, %v1042_v36, 0.0 }
 0x980   :  { %1048 = vadd.xlane.f32.xlu1 %v1047_v38 }
 0xa0c   :  { %v1052_v39 = vpop.xlane.xlu0 %1051 }
 0xa0d   :  { %v1054_v40 = vmul.f32 0.125, %v1052_v39  ;;  %v1049_v41 = vpop.xlane.xlu1 %1048 }
 0xa0e   :  { %v1053_v42 = vmul.f32 0.125, %v1049_v41 }
 0xa0f   :  { %v1056_v43 = vsub.f32 %v1043_v35, %v1054_v40 }
 0xa10   :  { %v1055_v44 = vsub.f32 %v1042_v36, %v1053_v42 }
 0xa11   :  { %v1058_v45 = vmul.f32 %v1056_v43, %v1056_v43 }
 0xa12   :  { %v1057_v46 = vmul.f32 %v1055_v44, %v1055_v44 }
 0xa13   :  { %v1062_v47 = vsel %vm223_vm0, %v1058_v45, 0.0 }
 0xa14   :  { %1063 = vadd.xlane.f32.xlu0 %v1062_v47  ;;  %v1059_v48 = vsel %vm223_vm0, %v1057_v46, 0.0 }
 0xa15   :  { %1060 = vadd.xlane.f32.xlu1 %v1059_v48 }
 0xaa1   :  { %v1064_v50 = vpop.xlane.xlu0 %1063 }
 0xaa2   :  { %v1066_v51 = vmul.f32 0.125, %v1064_v50  ;;  %v1061_v52 = vpop.xlane.xlu1 %1060 }
 0xaa3   :  { %v1065_v53 = vmul.f32 0.125, %v1061_v52 }
 0xaa4   :  { %v1068_v54 = vadd.f32 1e-05, %v1066_v51 }
 0xaa5   :  { %v1067_v2 = vadd.f32 1e-05, %v1065_v53 }
 0xaa6   :  { %6229 = vrsqrt.f32 %v1068_v54 }
 0xaa7   :  { %6231 = vrsqrt.f32 %v1067_v2 }
 0xab0   :  { %v6230_v1 = vpop.eup %6229 }
 0xab1   :  { %v6232_v56 = vpop.eup %6231  ;;  %v1072_v57 = vmul.f32 %v6230_v1, %v1056_v43 }
 0xab2   :  { %v1071_v58 = vmul.f32 %v6232_v56, %v1055_v44 }
 0xab3   :  { %v1080_v60 = vmul.f32 %v5258_v55, %v1072_v57 }
 0xab4   :  { %v1079_v61 = vmul.f32 %v5258_v55, %v1071_v58 }
 0xab5   :  { %v6858_v63 = vadd.f32 %v5259_v59, %v1080_v60 }
 0xab6   :  { %v6856_v62 = vadd.f32 %v5259_v59, %v1079_v61 }
 0xab8   :  { %5656 = vmatprep.mubr.msk.f32.mxu0 %vm223_vm0, %v6856_v62 }
 0xab9   :  { %5657 = vmatmul.mubr.msk.f32.vlgmr.msra.gmra.mrb[6].mxu0 %vm223_vm0, %v6858_v63 }
 0xb8c   :  { %v5658_v3 = vpop.f32.mrb[6].mxu0 }
 0xb8d   :  { %v1181_v4 = vadd.f32 %v5658_v3, %v5264_v0  ;;  %v1175_v5 = vpop.f32.mrb[7].mxu0 }
 0xb8e   :  { %v1176_v6 = vadd.f32 %v5264_v0, %v1175_v5 }
 0xb8f   :  { %1188 = vrot.lane.b32.xlu0 %v1181_v4, %s6522_s6 }
 0xb90   :  { %1186 = vrot.lane.b32.xlu1 %v1176_v6, %s6522_s6  ;;  %5663 = vmatprep.mubr.msk.f32.mxu0 %vm315_vm1, %v1176_v6  ;;  %v6873_v12 = vpack.i.bf16 %v1181_v4, %v1176_v6 }
 0xc01   :  { %v1189_v7 = vpop.permute.xlu0 %1188 }
 0xc02   :  { %v1187_v8 = vpop.permute.xlu1 %1186 }
 0xc03   :  { %5670 = vmatprep.mubr.msk.f32.mxu1 %vm315_vm1, %v1187_v8  ;;  %v6869_v9 = vpack.i.bf16 %v1189_v7, %v1187_v8 }
 0xc05   :  { %6120 = vrot.lane.b32.xlu1 %v6869_v9, %s6523_s5 }
 0xc09   :  { %6125 = vrot.lane.b32.xlu1 %v6873_v12, %s6523_s5 }
 0xc77   :  { %v6121_v13 = vpop.permute.xlu1 %6120 }
 0xc78   :  { %v6123_v10 = vunpack.i.h.bf16 %v6121_v13  ;;  %v6122_v14 = vunpack.i.l.bf16 %v6121_v13 }
 0xc7a   :  { %v5936_v11 = vpack.c.bf16 %v6123_v10, %v6122_v14 }
 0xc7b   :  { %v6126_v16 = vpop.permute.xlu1 %6125 }
 0xc7c   :  { %v6128_v17 = vunpack.i.h.bf16 %v6126_v16  ;;  %v6127_v18 = vunpack.i.l.bf16 %v6126_v16  ;;  %5938 = vmatprep.subr.msk.bf16.mxu1 %vm6765_vm2, %v5936_v11 }
 0xc7d   :  { %5941 = vmatpush3.bf16.xpose.msk.msra.mxu1 %vm6765_vm2, %v5936_v11 }
 0xc7e   :  { %v5930_v19 = vpack.c.bf16 %v6128_v17, %v6127_v18 }
 0xc80   :  { %5932 = vmatprep.subr.msk.bf16.mxu0 %vm6765_vm2, %v5930_v19 }
 0xc81   :  { %5935 = vmatpush3.bf16.xpose.msk.msra.mxu0 %vm6765_vm2, %v5930_v19  ;;  %v5262_v19 = vld [vmem:[%s6558_s21 + $0x8] sm:$0xff]  ;;  %s7319_s21 = sld [smem:[#allocation19_spill]] }
 0xc84   :  { %5671 = vmatmul.mubr.msk.f32.vlgmr.msra.gmra.mrb[10].mxu1 %vm315_vm1, %v1189_v7 }
 0xc88   :  { %5664 = vmatmul.mubr.msk.f32.vlgmr.msra.gmra.mrb[8].mxu0 %vm315_vm1, %v1181_v4 }
 0xd57   :  { %v5672_v20 = vpop.f32.mrb[10].mxu1 }
 0xd58   :  { %v1367_v21 = vmul.f32 0.5, %v5672_v20  ;;  %v1355_v25 = vpop.f32.mrb[11].mxu1 }
 0xd59   :  { %v1366_v28 = vmul.f32 0.5, %v1355_v25 }
 0xd5a   :  { %v1371_v29 = vadd.f32 %v1367_v21, %v6794_v27 }
 0xd5b   :  { %v5665_v31 = vpop.f32.mrb[8].mxu0  ;;  %v1370_v32 = vadd.f32 %v1366_v28, %v6800_v30 }
 0xd5c   :  { %v1268_v33 = vpop.f32.mrb[9].mxu0  ;;  %v1381_v34 = vsel %vm494_vm5, %v1371_v29, -inf  ;;  %v1365_v35 = vmul.f32 0.5, %v5665_v31 }
 0xd5d   :  { %v1364_v36 = vmul.f32 0.5, %v1268_v33  ;;  %1382 = vmax.xlane.f32.xlu1 %v1381_v34  ;;  %v1378_v37 = vsel %vm494_vm5, %v1370_v32, -inf  ;;  %v5279_v34 = vld [vmem:[%s6563_s25 + $0x1] ss:$0 sm:$0xff]  ;;  %s7320_s25 = sld [smem:[#allocation20_spill]] }
 0xd5e   :  { %1379 = vmax.xlane.f32.xlu0 %v1378_v37  ;;  %v1369_v40 = vadd.f32 %v1365_v35, %v6794_v27 }
 0xd5f   :  { %v1368_v38 = vadd.f32 %v1364_v36, %v6800_v30 }
 0xd60   :  { %v1375_v41 = vsel %vm494_vm5, %v1369_v40, -inf }
 0xd61   :  { %v1372_v39 = vsel %vm494_vm5, %v1368_v38, -inf }
 0xd62   :  { %1373 = vmax.xlane.f32.xlu0 %v1372_v39 }
 0xd66   :  { %1376 = vmax.xlane.f32.xlu0 %v1375_v41 }
 0xdea   :  { %v1383_v42 = vpop.xlane.xlu1 %1382 }
 0xdeb   :  { %v1387_v43 = vsub.f32 %v1371_v29, %v1383_v42  ;;  %v1380_v44 = vpop.xlane.xlu0 %1379 }
 0xdec   :  { %v1386_v45 = vsub.f32 %v1370_v32, %v1380_v44 }
 0xded   :  { %v1394_v46 = vmul.f32 1.442695, %v1387_v43 }
 0xdee   :  { %v1392_v47 = vmul.f32 1.442695, %v1386_v45 }
 0xdef   :  { %6233 = vpow2.f32 %v1394_v46  ;;  %v1374_v48 = vpop.xlane.xlu0 %1373 }
 0xdf0   :  { %6235 = vpow2.f32 %v1392_v47  ;;  %v1384_v49 = vsub.f32 %v1368_v38, %v1374_v48 }
 0xdf2   :  { %v1388_v50 = vmul.f32 1.442695, %v1384_v49 }
 0xdf3   :  { %v1377_v30 = vpop.xlane.xlu0 %1376 }
 0xdf4   :  { %6237 = vpow2.f32 %v1388_v50  ;;  %v1385_v51 = vsub.f32 %v1369_v40, %v1377_v30  ;;  %v5286_v30 = vld [vmem:[%s6573_s3 + $0x8] sm:$0xff]  ;;  %s7322_s3 = sld [smem:[#allocation24_spill]] }
 0xdf6   :  { %v1390_v52 = vmul.f32 1.442695, %v1385_v51  ;;  %v1972_v51 = vld [vmem:[%s7317_s13] sm:$0xff] }
 0xdf8   :  { %6239 = vpow2.f32 %v1390_v52  ;;  %v5288_v52 = vld [vmem:[%s6583_s14 + $0x20] sm:$0xff] }
 0xdf9   :  { %v6234_v27 = vpop.eup %6233 }
 0xdfa   :  { %v6236_v53 = vpop.eup %6235  ;;  %v1405_v54 = vsel %vm494_vm5, %v6234_v27, 0.0 }
 0xdfb   :  { %1406 = vadd.xlane.f32.xlu0 %v1405_v54  ;;  %v1402_v2 = vsel %vm494_vm5, %v6236_v53, 0.0 }
 0xdfc   :  { %1403 = vadd.xlane.f32.xlu1 %v1402_v2 }
 0xdfe   :  { %v6238_v1 = vpop.eup %6237 }
 0xdff   :  { %v1396_v55 = vsel %vm494_vm5, %v6238_v1, 0.0 }
 0xe00   :  { %1397 = vadd.xlane.f32.xlu0 %v1396_v55 }
 0xe02   :  { %v6240_v56 = vpop.eup %6239 }
 0xe03   :  { %v1399_v57 = vsel %vm494_vm5, %v6240_v56, 0.0 }
 0xe04   :  { %1400 = vadd.xlane.f32.xlu0 %v1399_v57 }
 0xe0d   :  { %6130 = vrot.lane.b32.xlu1 %v6869_v9, %s6525_s20 }
 0xe1a   :  { %6135 = vrot.lane.b32.xlu0 %v6873_v12, %s6525_s20 }
 0xe88   :  { %v1407_v58 = vpop.xlane.xlu0 %1406 }
 0xe89   :  { %6241 = vrcp.f32 %v1407_v58  ;;  %v1404_v59 = vpop.xlane.xlu1 %1403 }
 0xe8a   :  { %6243 = vrcp.f32 %v1404_v59  ;;  %v5284_v59 = vld [vmem:[%s6568_s29 + $0x2] ss:$0 sm:$0xff] }
 0xe8d   :  { %v6131_v60 = vpop.permute.xlu1 %6130  ;;  %v1398_v61 = vpop.xlane.xlu0 %1397 }
 0xe8e   :  { %v6133_v0 = vunpack.i.h.bf16 %v6131_v60  ;;  %v6132_v3 = vunpack.i.l.bf16 %v6131_v60  ;;  %6245 = vrcp.f32 %v1398_v61 }
 0xe90   :  { %v5946_v4 = vpack.c.bf16 %v6133_v0, %v6132_v3  ;;  %v5285_v3 = vld [vmem:[%s6568_s29 + $0x3] ss:$0 sm:$0xff]  ;;  %s7321_s29 = sld [smem:[#allocation21_spill]] }
 0xe91   :  { %v1401_v5 = vpop.xlane.xlu0 %1400 }
 0xe92   :  { %6247 = vrcp.f32 %v1401_v5  ;;  %5947 = vmatprep.subr.bf16.mxu1 %v5946_v4 }
 0xe93   :  { %v6242_v6 = vpop.eup %6241  ;;  %5949 = vmatpush3.bf16.msra.mxu1 %v5946_v4 }
 0xe94   :  { %v6244_v7 = vpop.eup %6243  ;;  %v1415_v10 = vmul.f32 %v6242_v6, %v6234_v27  ;;  %5692 = vmatprep.subr.mxu1 %v5286_v30  ;;  %v5289_v27 = vld [vmem:[%s6583_s14 + $0x28] sm:$0xff] }
 0xe95   :  { %v6136_v8 = vpop.permute.xlu0 %6135  ;;  %v1414_v9 = vmul.f32 %v6244_v7, %v6236_v53  ;;  %v5950_v53 = vpack.c.bf16 %v5289_v27, %v5288_v52 }
 0xe96   :  { %v6138_v12 = vunpack.i.h.bf16 %v6136_v8  ;;  %v6137_v13 = vunpack.i.l.bf16 %v6136_v8  ;;  %v6932_v8 = vld [vmem:[%s7318_s17] sm:$0xff] }
 0xe97   :  { %5684 = vmatprep.mubr.msk.f32.mxu1 %vm494_vm5, %v1414_v9  ;;  %v6941_v9 = vld [vmem:[%s7318_s17 + $0x8] sm:$0xff] }
 0xe98   :  { %v6246_v14 = vpop.eup %6245  ;;  %v5942_v11 = vpack.c.bf16 %v6138_v12, %v6137_v13  ;;  %5685 = vmatmul.mubr.msk.f32.vlgmr.msra.gmra.mrb[12].mxu1 %vm494_vm5, %v1415_v10  ;;  %v5290_v12 = vld [vmem:[%s6583_s14 + $0x30] sm:$0xff]  ;;  %v5291_v13 = vld [vmem:[%s6583_s14 + $0x38] sm:$0xff]  ;;  %s7324_s14 = sld [smem:[#allocation22_spill]] }
 0xe99   :  { %v1412_v16 = vmul.f32 %v6246_v14, %v6238_v1  ;;  %5693 = vmatpush3.msra.mxu1 %v5286_v30  ;;  %v5954_v10 = vpack.c.bf16 %v5291_v13, %v5290_v12  ;;  %v5293_v14 = vld [vmem:[%s6578_s8 + $0x1] ss:$0 sm:$0xff]  ;;  %s7323_s8 = sld [smem:[#allocation23_spill]] }
 0xe9a   :  { %5943 = vmatprep.subr.bf16.mxu0 %v5942_v11  ;;  %5708 = vmatprep.subr.mxu1 %v1972_v51 }
 0xe9b   :  { %5945 = vmatpush3.bf16.msra.mxu0 %v5942_v11  ;;  %5677 = vmatprep.mubr.msk.f32.mxu0 %vm494_vm5, %v1412_v16 }
 0xe9c   :  { %v6248_v17 = vpop.eup %6247  ;;  %5687 = vmatprep.subr.mxu0 %v5262_v19 }
 0xe9d   :  { %v1413_v18 = vmul.f32 %v6248_v17, %v6240_v56 }
 0xe9f   :  { %5678 = vmatmul.mubr.msk.f32.vlgmr.msra.gmra.mrb[10].mxu0 %vm494_vm5, %v1413_v18 }
 0xea0   :  { %5688 = vmatpush3.msra.mxu0 %v5262_v19  ;;  %v5303_v19 = vld [vmem:[%s7319_s21] ss:$0 sm:$0xff] }
 0xea1   :  { %5951 = vmatprep.subr.bf16.mxu0 %v5950_v53 }
 0xf6b   :  { %v5686_v20 = vpop.f32.mrb[12].mxu1 }
 0xf6c   :  { %v1581_v21 = vpop.f32.mrb[13].mxu1 }
 0xf6d   :  { %1592 = vrot.lane.b32.xlu1 %v1581_v21, %s6526_s26 }
 0xf71   :  { %1594 = vrot.lane.b32.xlu1 %v5686_v20, %s6526_s26 }
 0xf72   :  { %v5679_v25 = vpop.f32.mrb[10].mxu0 }
 0xf73   :  { %v1494_v28 = vpop.f32.mrb[11].mxu0 }
 0xfdf   :  { %v1593_v29 = vpop.permute.xlu1 %1592 }
 0xfe0   :  { %v1598_v31 = vsel %vm315_vm1, %v1494_v28, %v1593_v29 }
 0xfe1   :  { %5689 = vmatprep.mubr.msk.f32.mxu0 %vm223_vm0, %v1598_v31 }
 0xfe3   :  { %v1595_v32 = vpop.permute.xlu1 %1594 }
 0xfe4   :  { %v1599_v33 = vsel %vm315_vm1, %v5679_v25, %v1595_v32 }
 0xfe5   :  { %5690 = vmatmul.mubr.msk.f32.vlgmr.msra.gmra.mrb[12].mxu0 %vm223_vm0, %v1599_v33 }
 0xfe6   :  { %5953 = vmatpush3.bf16.msra.mxu0 %v5950_v53 }
 0xfe7   :  { %5955 = vmatprep.subr.bf16.mxu0 %v5954_v10 }
 0xfea   :  { %5957 = vmatpush3.bf16.msra.mxu0 %v5954_v10 }
0x10b8   :  { %v5691_v35 = vpop.f32.mrb[12].mxu0 }
0x10b9   :  { %v1684_v36 = vadd.f32 %v5691_v35, %v5279_v34  ;;  %v1678_v37 = vpop.f32.mrb[13].mxu0 }
0x10ba   :  { %v1679_v38 = vadd.f32 %v5279_v34, %v1678_v37 }
0x10bb   :  { %v1688_v39 = vadd.f32 %v1684_v36, %v6858_v63  ;;  %v6964_v36 = vld [vmem:[%s6588_s19 + $0x1] ss:$0 sm:$0xff]  ;;  %s7325_s19 = sld [smem:[#allocation25_spill]] }
0x10bc   :  { %v1687_v40 = vadd.f32 %v1679_v38, %v6856_v62 }
0x10bd   :  { %v1696_v41 = vsel %vm223_vm0, %v1688_v39, 0.0 }
0x10be   :  { %1697 = vadd.xlane.f32.xlu0 %v1696_v41  ;;  %v1693_v42 = vsel %vm223_vm0, %v1687_v40, 0.0 }
0x10bf   :  { %1694 = vadd.xlane.f32.xlu1 %v1693_v42 }
0x114b   :  { %v1698_v43 = vpop.xlane.xlu0 %1697 }
0x114c   :  { %v1700_v44 = vmul.f32 0.125, %v1698_v43  ;;  %v1695_v45 = vpop.xlane.xlu1 %1694 }
0x114d   :  { %v1699_v46 = vmul.f32 0.125, %v1695_v45 }
0x114e   :  { %v1702_v47 = vsub.f32 %v1688_v39, %v1700_v44 }
0x114f   :  { %v1701_v48 = vsub.f32 %v1687_v40, %v1699_v46 }
0x1150   :  { %v1704_v49 = vmul.f32 %v1702_v47, %v1702_v47 }
0x1151   :  { %v1703_v63 = vmul.f32 %v1701_v48, %v1701_v48 }
0x1152   :  { %v1708_v62 = vsel %vm223_vm0, %v1704_v49, 0.0  ;;  %v203_v49 = vxor.u32 %v6784_v24, %v6779_v22 }
0x1153   :  { %1709 = vadd.xlane.f32.xlu0 %v1708_v62  ;;  %v1705_v50 = vsel %vm223_vm0, %v1703_v63, 0.0 }
0x1154   :  { %1706 = vadd.xlane.f32.xlu1 %v1705_v50  ;;  %vm205_vm8 = vcmp.lt.s32.totalorder %v203_v49, 8 }
0x1155   :  { %vm207_vm10 = vmand %vm205_vm8, %vm199_vm4 }
0x11e0   :  { %v1710_v54 = vpop.xlane.xlu0 %1709 }
0x11e1   :  { %v1712_v2 = vmul.f32 0.125, %v1710_v54  ;;  %v1707_v1 = vpop.xlane.xlu1 %1706 }
0x11e2   :  { %v1711_v55 = vmul.f32 0.125, %v1707_v1 }
0x11e3   :  { %v1714_v56 = vadd.f32 1e-05, %v1712_v2 }
0x11e4   :  { %v1713_v57 = vadd.f32 1e-05, %v1711_v55 }
0x11e5   :  { %6249 = vrsqrt.f32 %v1714_v56 }
0x11e6   :  { %6251 = vrsqrt.f32 %v1713_v57 }
0x11ef   :  { %v6250_v58 = vpop.eup %6249 }
0x11f0   :  { %v6252_v60 = vpop.eup %6251  ;;  %v1718_v61 = vmul.f32 %v6250_v58, %v1702_v47 }
0x11f1   :  { %v1717_v0 = vmul.f32 %v6252_v60, %v1701_v48  ;;  %v204_v48 = vxor.u32 %v6784_v24, %v6782_v23 }
0x11f2   :  { %v1726_v4 = vmul.f32 %v5284_v59, %v1718_v61 }
0x11f3   :  { %v1725_v5 = vmul.f32 %v5284_v59, %v1717_v0  ;;  %vm206_vm7 = vcmp.lt.s32.totalorder %v204_v48, 8 }
0x11f4   :  { %v6929_v7 = vadd.f32 %v5285_v3, %v1726_v4  ;;  %vm208_vm9 = vmand %vm206_vm7, %vm200_vm3 }
0x11f5   :  { %v6927_v6 = vadd.f32 %v5285_v3, %v1725_v5  ;;  %v6992_v62 = vsel %vm208_vm9, 0.0, %v6524_v26 }
0x11f7   :  { %5694 = vmatprep.mubr.msk.f32.mxu1 %vm223_vm0, %v6927_v6 }
0x11f8   :  { %5695 = vmatmul.mubr.msk.f32.vlgmr.msra.gmra.mrb[14].mxu1 %vm223_vm0, %v6929_v7 }
0x11f9   :  { %5709 = vmatpush3.msra.mxu1 %v1972_v51  ;;  %5710 = vmatprep.mubr.msk.f32.mxu1 %vm223_vm0, %v6932_v8  ;;  %v6995_v51 = vsel %vm207_vm10, 0.0, %v6524_v26 }
0x11fc   :  { %5711 = vmatmul.mubr.msk.f32.vlgmr.msra.gmra.mrb[16].mxu1 %vm223_vm0, %v6941_v9 }
0x12cb   :  { %v5696_v11 = vpop.f32.mrb[14].mxu1 }
0x12cc   :  { %v1830_v16 = vadd.f32 %v5696_v11, %v5293_v14  ;;  %v1824_v17 = vpop.f32.mrb[15].mxu1 }
0x12cd   :  { %v1825_v18 = vadd.f32 %v5293_v14, %v1824_v17 }
0x12ce   :  { %v1834_v25 = vmax.f32 %v1830_v16, 0.0 }
0x12cf   :  { %v1833_v20 = vmax.f32 %v1825_v18, 0.0  ;;  %v5712_v21 = vpop.f32.mrb[16].mxu1 }
0x12d0   :  { %v2060_v28 = vadd.f32 %v5712_v21, %v5303_v19  ;;  %v2054_v29 = vpop.f32.mrb[17].mxu1 }
0x12d1   :  { %v2055_v31 = vadd.f32 %v5303_v19, %v2054_v29  ;;  %5705 = vmatprep.mubr.msk.f32.mxu0 %vm960_vm6, %v1833_v20 }
0x12d2   :  { %2067 = vrot.lane.b32.xlu0 %v2060_v28, %s6522_s6  ;;  %5706 = vmatmul.mubr.msk.f32.vlgmr.msra.gmra.mrb[14].mxu0 %vm960_vm6, %v1834_v25 }
0x12d3   :  { %2065 = vrot.lane.b32.xlu1 %v2055_v31, %s6522_s6  ;;  %5717 = vmatprep.mubr.msk.f32.mxu1 %vm315_vm1, %v2055_v31  ;;  %v6959_v35 = vpack.i.bf16 %v2060_v28, %v2055_v31 }
0x1344   :  { %v2068_v32 = vpop.permute.xlu0 %2067 }
0x1345   :  { %v2066_v33 = vpop.permute.xlu1 %2065 }
0x1346   :  { %v6954_v34 = vpack.i.bf16 %v2068_v32, %v2066_v33  ;;  %5724 = vmatprep.mubr.msk.f32.mxu0 %vm315_vm1, %v2066_v33 }
0x1348   :  { %6140 = vrot.lane.b32.xlu1 %v6954_v34, %s6523_s5 }
0x134c   :  { %6145 = vrot.lane.b32.xlu1 %v6959_v35, %s6523_s5 }
0x13a5   :  { %v6966_v37 = vpop.f32.mrb[14].mxu0 }
0x13a6   :  { %v1913_v38 = vpop.f32.mrb[15].mxu0 }
0x13a7   :  { %v6969_v39 = vadd.f32 %v6964_v36, %v1913_v38 }
0x13ba   :  { %v6141_v40 = vpop.permute.xlu1 %6140 }
0x13bb   :  { %v6143_v41 = vunpack.i.h.bf16 %v6141_v40  ;;  %v6142_v42 = vunpack.i.l.bf16 %v6141_v40 }
0x13bd   :  { %v5964_v43 = vpack.c.bf16 %v6143_v41, %v6142_v42 }
0x13be   :  { %v6146_v44 = vpop.permute.xlu1 %6145 }
0x13bf   :  { %v6148_v45 = vunpack.i.h.bf16 %v6146_v44  ;;  %v6147_v46 = vunpack.i.l.bf16 %v6146_v44  ;;  %5966 = vmatprep.subr.msk.bf16.mxu0 %vm6765_vm2, %v5964_v43 }
0x13c0   :  { %5969 = vmatpush3.bf16.xpose.msk.msra.mxu0 %vm6765_vm2, %v5964_v43 }
0x13c1   :  { %v5958_v47 = vpack.c.bf16 %v6148_v45, %v6147_v46 }
0x13c3   :  { %5960 = vmatprep.subr.msk.bf16.mxu1 %vm6765_vm2, %v5958_v47 }
0x13c4   :  { %5963 = vmatpush3.bf16.xpose.msk.msra.mxu1 %vm6765_vm2, %v5958_v47 }
0x13c7   :  { %5725 = vmatmul.mubr.msk.f32.vlgmr.msra.gmra.mrb[16].mxu0 %vm315_vm1, %v2068_v32 }
0x13cb   :  { %5718 = vmatmul.mubr.msk.f32.vlgmr.msra.gmra.mrb[18].mxu1 %vm315_vm1, %v2060_v28  ;;  %v1919_v28 = vadd.f32 %v6966_v37, %v6964_v36 }
0x13cd   :  { %v1923_v29 = vadd.f32 %v1919_v28, %v6929_v7 }
0x13cf   :  { %v1931_v31 = vsel %vm223_vm0, %v1923_v29, 0.0 }
0x149a   :  { %v5726_v63 = vpop.f32.mrb[16].mxu0 }
0x149b   :  { %v2246_v50 = vmul.f32 0.5, %v5726_v63  ;;  %v2234_v30 = vpop.f32.mrb[17].mxu0 }
0x149c   :  { %v2245_v52 = vmul.f32 0.5, %v2234_v30  ;;  %v1974_v30 = vld [vmem:[%s7320_s25] sm:$0xff] }
0x149d   :  { %v2250_v27 = vadd.f32 %v2246_v50, %v6992_v62 }
0x149e   :  { %v5719_v53 = vpop.f32.mrb[18].mxu1  ;;  %v2249_v23 = vadd.f32 %v2245_v52, %v6995_v51 }
0x149f   :  { %v2147_v54 = vpop.f32.mrb[19].mxu1  ;;  %v2260_v2 = vsel %vm494_vm5, %v2250_v27, -inf  ;;  %v2244_v22 = vmul.f32 0.5, %v5719_v53 }
0x14a0   :  { %v2243_v24 = vmul.f32 0.5, %v2147_v54  ;;  %2261 = vmax.xlane.f32.xlu1 %v2260_v2  ;;  %v2257_v1 = vsel %vm494_vm5, %v2249_v23, -inf  ;;  %v1922_v54 = vadd.f32 %v6969_v39, %v6927_v6 }
0x14a1   :  { %2258 = vmax.xlane.f32.xlu0 %v2257_v1  ;;  %v2248_v56 = vadd.f32 %v2244_v22, %v6992_v62 }
0x14a2   :  { %v2247_v55 = vadd.f32 %v2243_v24, %v6995_v51  ;;  %v1928_v2 = vsel %vm223_vm0, %v1922_v54, 0.0 }
0x14a3   :  { %v2254_v57 = vsel %vm494_vm5, %v2248_v56, -inf }
0x14a4   :  { %v2251_v26 = vsel %vm494_vm5, %v2247_v55, -inf }
0x14a5   :  { %2252 = vmax.xlane.f32.xlu0 %v2251_v26 }
0x14a9   :  { %2255 = vmax.xlane.f32.xlu0 %v2254_v57 }
0x152d   :  { %v2262_v58 = vpop.xlane.xlu1 %2261 }
0x152e   :  { %v2266_v59 = vsub.f32 %v2250_v27, %v2262_v58  ;;  %v2259_v60 = vpop.xlane.xlu0 %2258 }
0x152f   :  { %v2265_v61 = vsub.f32 %v2249_v23, %v2259_v60 }
0x1530   :  { %v2273_v0 = vmul.f32 1.442695, %v2266_v59  ;;  %v5318_v59 = vld [vmem:[%s7321_s29] ss:$0 sm:$0xff] }
0x1531   :  { %v2271_v3 = vmul.f32 1.442695, %v2265_v61 }
0x1532   :  { %6253 = vpow2.f32 %v2273_v0  ;;  %v2253_v4 = vpop.xlane.xlu0 %2252 }
0x1533   :  { %6255 = vpow2.f32 %v2271_v3  ;;  %v2263_v5 = vsub.f32 %v2247_v55, %v2253_v4 }
0x1535   :  { %v2267_v12 = vmul.f32 1.442695, %v2263_v5 }
0x1536   :  { %v2256_v13 = vpop.xlane.xlu0 %2255 }
0x1537   :  { %6257 = vpow2.f32 %v2267_v12  ;;  %v2264_v10 = vsub.f32 %v2248_v56, %v2256_v13 }
0x1539   :  { %v2269_v14 = vmul.f32 1.442695, %v2264_v10 }
0x153b   :  { %6259 = vpow2.f32 %v2269_v14 }
0x153c   :  { %v6254_v11 = vpop.eup %6253 }
0x153d   :  { %v6256_v16 = vpop.eup %6255  ;;  %v2284_v17 = vsel %vm494_vm5, %v6254_v11, 0.0 }
0x153e   :  { %2285 = vadd.xlane.f32.xlu0 %v2284_v17  ;;  %v2281_v18 = vsel %vm494_vm5, %v6256_v16, 0.0  ;;  %v2613_v17 = vld [vmem:[%s7322_s3] sm:$0xff] }
0x153f   :  { %2282 = vadd.xlane.f32.xlu1 %v2281_v18 }
0x1541   :  { %v6258_v19 = vpop.eup %6257 }
0x1542   :  { %v2275_v20 = vsel %vm494_vm5, %v6258_v19, 0.0 }
0x1543   :  { %2276 = vadd.xlane.f32.xlu0 %v2275_v20 }
0x1545   :  { %v6260_v21 = vpop.eup %6259 }
0x1546   :  { %v2278_v25 = vsel %vm494_vm5, %v6260_v21, 0.0 }
0x1547   :  { %2279 = vadd.xlane.f32.xlu0 %v2278_v25 }
0x1550   :  { %6150 = vrot.lane.b32.xlu1 %v6954_v34, %s6525_s20 }
0x155d   :  { %6155 = vrot.lane.b32.xlu0 %v6959_v35, %s6525_s20 }
0x157c   :  { %1932 = vadd.xlane.f32.xlu0 %v1931_v31 }
0x15cb   :  { %v2286_v32 = vpop.xlane.xlu0 %2285 }
0x15cc   :  { %6261 = vrcp.f32 %v2286_v32  ;;  %v2283_v33 = vpop.xlane.xlu1 %2282 }
0x15cd   :  { %6263 = vrcp.f32 %v2283_v33 }
0x15d0   :  { %v6151_v38 = vpop.permute.xlu1 %6150  ;;  %v2277_v40 = vpop.xlane.xlu0 %2276 }
0x15d1   :  { %v6153_v41 = vunpack.i.h.bf16 %v6151_v38  ;;  %v6152_v42 = vunpack.i.l.bf16 %v6151_v38  ;;  %6265 = vrcp.f32 %v2277_v40 }
0x15d3   :  { %v5974_v34 = vpack.c.bf16 %v6153_v41, %v6152_v42 }
0x15d4   :  { %v2280_v43 = vpop.xlane.xlu0 %2279 }
0x15d5   :  { %6267 = vrcp.f32 %v2280_v43  ;;  %5975 = vmatprep.subr.bf16.mxu0 %v5974_v34  ;;  %v5301_v43 = vld [vmem:[%s7316_s28 + $0x2] ss:$0 sm:$0xff] }
0x15d6   :  { %v6262_v35 = vpop.eup %6261  ;;  %5977 = vmatpush3.bf16.msra.mxu0 %v5974_v34 }
0x15d7   :  { %v6264_v36 = vpop.eup %6263  ;;  %v2294_v44 = vmul.f32 %v6262_v35, %v6254_v11  ;;  %5746 = vmatprep.subr.mxu0 %v2613_v17 }
0x15d8   :  { %v6156_v7 = vpop.permute.xlu0 %6155  ;;  %v2293_v37 = vmul.f32 %v6264_v36, %v6256_v16 }
0x15d9   :  { %v6158_v45 = vunpack.i.h.bf16 %v6156_v7  ;;  %v6157_v46 = vunpack.i.l.bf16 %v6156_v7  ;;  %v5302_v7 = vld [vmem:[%s7316_s28 + $0x3] ss:$0 sm:$0xff] }
0x15da   :  { %5738 = vmatprep.mubr.msk.f32.mxu0 %vm494_vm5, %v2293_v37 }
0x15db   :  { %v6266_v47 = vpop.eup %6265  ;;  %v5970_v48 = vpack.c.bf16 %v6158_v45, %v6157_v46  ;;  %5739 = vmatmul.mubr.msk.f32.vlgmr.msra.gmra.mrb[18].mxu0 %vm494_vm5, %v2294_v44 }
0x15dc   :  { %v2291_v49 = vmul.f32 %v6266_v47, %v6258_v19  ;;  %5747 = vmatpush3.msra.mxu0 %v2613_v17 }
0x15dd   :  { %5971 = vmatprep.subr.bf16.mxu1 %v5970_v48 }
0x15de   :  { %5973 = vmatpush3.bf16.msra.mxu1 %v5970_v48  ;;  %5731 = vmatprep.mubr.msk.f32.mxu1 %vm494_vm5, %v2291_v49  ;;  %v2708_v48 = vld [vmem:[%s7323_s8] sm:$0xff] }
0x15df   :  { %v6268_v63 = vpop.eup %6267  ;;  %5741 = vmatprep.subr.mxu1 %v1974_v30 }
0x15e0   :  { %v2292_v50 = vmul.f32 %v6268_v63, %v6260_v21 }
0x15e2   :  { %5732 = vmatmul.mubr.msk.f32.vlgmr.msra.gmra.mrb[20].mxu1 %vm494_vm5, %v2292_v50 }
0x15e3   :  { %5742 = vmatpush3.msra.mxu1 %v1974_v30 }
0x15e4   :  { %5751 = vmatprep.subr.mxu1 %v2708_v48 }
0x1609   :  { %v1933_v26 = vpop.xlane.xlu0 %1932 }
0x160a   :  { %v1935_v57 = vmul.f32 0.125, %v1933_v26 }
0x160c   :  { %v1937_v6 = vsub.f32 %v1923_v29, %v1935_v57  ;;  %v5324_v57 = vld [vmem:[#allocation5] ss:$0 sm:$0xff] }
0x160e   :  { %v1939_v13 = vmul.f32 %v1937_v6, %v1937_v6 }
0x1610   :  { %v1943_v11 = vsel %vm223_vm0, %v1939_v13, 0.0 }
0x16ae   :  { %v5740_v52 = vpop.f32.mrb[18].mxu0 }
0x16af   :  { %v2460_v27 = vpop.f32.mrb[19].mxu0 }
0x16b0   :  { %2471 = vrot.lane.b32.xlu1 %v2460_v27, %s6526_s26 }
0x16b4   :  { %2473 = vrot.lane.b32.xlu1 %v5740_v52, %s6526_s26 }
0x16b5   :  { %v5733_v53 = vpop.f32.mrb[20].mxu1 }
0x16b6   :  { %v2373_v23 = vpop.f32.mrb[21].mxu1 }
0x16d8   :  { %1929 = vadd.xlane.f32.xlu1 %v1928_v2 }
0x1722   :  { %v2472_v22 = vpop.permute.xlu1 %2471 }
0x1723   :  { %v2477_v24 = vsel %vm315_vm1, %v2373_v23, %v2472_v22  ;;  %v5322_v23 = vld [vmem:[%s7324_s14] ss:$0 sm:$0xff] }
0x1724   :  { %5743 = vmatprep.mubr.msk.f32.mxu1 %vm223_vm0, %v2477_v24  ;;  %v5323_v24 = vld [vmem:[%s7324_s14 + $0x1] ss:$0 sm:$0xff] }
0x1726   :  { %v2474_v1 = vpop.permute.xlu1 %2473 }
0x1727   :  { %v2478_v55 = vsel %vm315_vm1, %v5733_v53, %v2474_v1 }
0x1728   :  { %5744 = vmatmul.mubr.msk.f32.vlgmr.msra.gmra.mrb[22].mxu1 %vm223_vm0, %v2478_v55 }
0x1729   :  { %5752 = vmatpush3.msra.mxu1 %v2708_v48 }
0x1765   :  { %v1930_v56 = vpop.xlane.xlu1 %1929 }
0x1766   :  { %v1934_v58 = vmul.f32 0.125, %v1930_v56 }
0x1768   :  { %v1936_v0 = vsub.f32 %v1922_v54, %v1934_v58 }
0x176a   :  { %v1938_v14 = vmul.f32 %v1936_v0, %v1936_v0 }
0x176c   :  { %v1940_v16 = vsel %vm223_vm0, %v1938_v14, 0.0 }
0x17fb   :  { %v5745_v60 = vpop.f32.mrb[22].mxu1 }
0x17fc   :  { %v2563_v39 = vadd.f32 %v5745_v60, %v5318_v59  ;;  %v2557_v61 = vpop.f32.mrb[23].mxu1 }
0x17fd   :  { %v2558_v3 = vadd.f32 %v5318_v59, %v2557_v61 }
0x17fe   :  { %v2567_v4 = vadd.f32 %v2563_v39, %v6941_v9 }
0x17ff   :  { %v2566_v5 = vadd.f32 %v2558_v3, %v6932_v8 }
0x1800   :  { %v2574_v12 = vsel %vm223_vm0, %v2567_v4, 0.0 }
0x1801   :  { %2575 = vadd.xlane.f32.xlu0 %v2574_v12  ;;  %v2571_v10 = vsel %vm223_vm0, %v2566_v5, 0.0  ;;  %v5327_v12 = vld [vmem:[#allocation2] ss:$0 sm:$0xff] }
0x1802   :  { %2572 = vadd.xlane.f32.xlu1 %v2571_v10 }
0x1805   :  { %1944 = vadd.xlane.f32.xlu0 %v1943_v11 }
0x1806   :  { %1941 = vadd.xlane.f32.xlu1 %v1940_v16 }
0x188e   :  { %v2576_v9 = vpop.xlane.xlu0 %2575 }
0x188f   :  { %v2578_v18 = vmul.f32 0.125, %v2576_v9  ;;  %v2573_v8 = vpop.xlane.xlu1 %2572 }
0x1890   :  { %v2577_v19 = vmul.f32 0.125, %v2573_v8 }
0x1891   :  { %v2580_v20 = vsub.f32 %v2567_v4, %v2578_v18 }
0x1892   :  { %v2579_v21 = vsub.f32 %v2566_v5, %v2577_v19  ;;  %v1945_v25 = vpop.xlane.xlu0 %1944 }
0x1893   :  { %v1947_v28 = vmul.f32 0.125, %v1945_v25  ;;  %v1942_v29 = vpop.xlane.xlu1 %1941  ;;  %v2582_v31 = vmul.f32 %v2580_v20, %v2580_v20 }
0x1894   :  { %v1946_v32 = vmul.f32 0.125, %v1942_v29  ;;  %v2581_v33 = vmul.f32 %v2579_v21, %v2579_v21 }
0x1895   :  { %v1949_v38 = vadd.f32 1e-05, %v1947_v28  ;;  %v2586_v40 = vsel %vm223_vm0, %v2582_v31, 0.0 }
0x1896   :  { %v1948_v41 = vadd.f32 1e-05, %v1946_v32  ;;  %2587 = vadd.xlane.f32.xlu0 %v2586_v40  ;;  %v2583_v42 = vsel %vm223_vm0, %v2581_v33, 0.0 }
0x1897   :  { %6269 = vrsqrt.f32 %v1949_v38  ;;  %2584 = vadd.xlane.f32.xlu1 %v2583_v42 }
0x1898   :  { %6271 = vrsqrt.f32 %v1948_v41 }
0x18a1   :  { %v6270_v34 = vpop.eup %6269 }
0x18a2   :  { %v6272_v35 = vpop.eup %6271  ;;  %v1953_v36 = vmul.f32 %v6270_v34, %v1937_v6 }
0x18a3   :  { %v1952_v37 = vmul.f32 %v6272_v35, %v1936_v0 }
0x18a4   :  { %v1961_v44 = vmul.f32 %v5301_v43, %v1953_v36 }
0x18a5   :  { %v1960_v45 = vmul.f32 %v5301_v43, %v1952_v37 }
0x18a6   :  { %v7043_v46 = vadd.f32 %v5302_v7, %v1961_v44 }
0x18a7   :  { %v7045_v47 = vadd.f32 %v5302_v7, %v1960_v45 }
0x18a8   :  { %5174 = vst.msk [vmem:[%s6683_s24 + $0x8] sm:$0xff] %vm223_vm0, %v7043_v46 }
0x18a9   :  { %5748 = vmatprep.mubr.msk.f32.mxu0 %vm223_vm0, %v7045_v47  ;;  %5173 = vst.msk [vmem:[%s6683_s24] sm:$0xff] %vm223_vm0, %v7045_v47  ;;  %s7326_s24 = sld [smem:[#allocation27_spill]] }
0x18aa   :  { %5749 = vmatmul.mubr.msk.f32.vlgmr.msra.gmra.mrb[20].mxu0 %vm223_vm0, %v7043_v46 }
0x1923   :  { %v2588_v49 = vpop.xlane.xlu0 %2587 }
0x1924   :  { %v2590_v63 = vmul.f32 0.125, %v2588_v49  ;;  %v2585_v50 = vpop.xlane.xlu1 %2584 }
0x1925   :  { %v2589_v30 = vmul.f32 0.125, %v2585_v50 }
0x1926   :  { %v2592_v52 = vadd.f32 1e-05, %v2590_v63 }
0x1927   :  { %v2591_v27 = vadd.f32 1e-05, %v2589_v30 }
0x1928   :  { %6273 = vrsqrt.f32 %v2592_v52 }
0x1929   :  { %6275 = vrsqrt.f32 %v2591_v27 }
0x1932   :  { %v6274_v53 = vpop.eup %6273 }
0x1933   :  { %v6276_v54 = vpop.eup %6275  ;;  %v2596_v2 = vmul.f32 %v6274_v53, %v2580_v20 }
0x1934   :  { %v2595_v22 = vmul.f32 %v6276_v54, %v2579_v21 }
0x1935   :  { %v2604_v1 = vmul.f32 %v5322_v23, %v2596_v2 }
0x1936   :  { %v2603_v55 = vmul.f32 %v5322_v23, %v2595_v22 }
0x1937   :  { %v7062_v56 = vadd.f32 %v5323_v24, %v2604_v1 }
0x1938   :  { %v7060_v26 = vadd.f32 %v5323_v24, %v2603_v55 }
0x193a   :  { %5753 = vmatprep.mubr.msk.f32.mxu1 %vm223_vm0, %v7060_v26 }
0x193b   :  { %5754 = vmatmul.mubr.msk.f32.vlgmr.msra.gmra.mrb[24].mxu1 %vm223_vm0, %v7062_v56 }
0x197d   :  { %v5750_v58 = vpop.f32.mrb[20].mxu0 }
0x197e   :  { %v2699_v59 = vadd.f32 %v5750_v58, %v5324_v57  ;;  %v2693_v60 = vpop.f32.mrb[21].mxu0 }
0x197f   :  { %v2694_v6 = vadd.f32 %v5324_v57, %v2693_v60 }
0x1981   :  { %v5978_v39 = vpack.c.bf16 %v2699_v59, %v2694_v6  ;;  %v7068_v61 = vpack.i.bf16 %v2699_v59, %v2694_v6 }
0x1983   :  { %6160 = vrot.lane.b32.xlu1 %v7068_v61, %s6522_s6  ;;  %5980 = vmatprep.subr.msk.bf16.mxu0 %vm6765_vm2, %v5978_v39 }
0x1984   :  { %5983 = vmatpush3.bf16.xpose.msk.msra.mxu0 %vm6765_vm2, %v5978_v39 }
0x19f5   :  { %v6161_v0 = vpop.permute.xlu1 %6160 }
0x19f6   :  { %v6163_v3 = vunpack.i.h.bf16 %v6161_v0  ;;  %v6162_v4 = vunpack.i.l.bf16 %v6161_v0 }
0x19f8   :  { %v5984_v5 = vpack.c.bf16 %v6163_v3, %v6162_v4 }
0x19fa   :  { %5986 = vmatprep.subr.msk.bf16.mxu1 %vm6765_vm2, %v5984_v5 }
0x19fb   :  { %5989 = vmatpush3.bf16.xpose.msk.msra.mxu1 %vm6765_vm2, %v5984_v5 }
0x1a0e   :  { %v5755_v13 = vpop.f32.mrb[24].mxu1 }
0x1a0f   :  { %v2796_v10 = vadd.f32 %v5755_v13, %v5327_v12  ;;  %v2790_v14 = vpop.f32.mrb[25].mxu1 }
0x1a10   :  { %v2791_v11 = vadd.f32 %v5327_v12, %v2790_v14 }
0x1a11   :  { %2803 = vrot.lane.b32.xlu1 %v2796_v10, %s6522_s6 }
0x1a12   :  { %2801 = vrot.lane.b32.xlu0 %v2791_v11, %s6522_s6  ;;  %5760 = vmatprep.mubr.msk.f32.mxu0 %vm315_vm1, %v2791_v11 }
0x1a13   :  { %5761 = vmatmul.mubr.msk.f32.vlgmr.msra.gmra.mrb[22].mxu0 %vm315_vm1, %v2796_v10  ;;  %v2710_v10 = vld [vmem:[%s7325_s19] sm:$0xff] }
0x1a83   :  { %v2804_v17 = vpop.permute.xlu1 %2803 }
0x1a84   :  { %v2802_v16 = vpop.permute.xlu0 %2801 }
0x1a85   :  { %5767 = vmatprep.mubr.msk.f32.mxu1 %vm315_vm1, %v2802_v16 }
0x1a86   :  { %5768 = vmatmul.mubr.msk.f32.vlgmr.msra.gmra.mrb[26].mxu1 %vm315_vm1, %v2804_v17 }
0x1ae6   :  { %v5762_v9 = vpop.f32.mrb[22].mxu0 }
0x1ae7   :  { %v2879_v18 = vpop.f32.mrb[23].mxu0  ;;  %v2972_v29 = vmul.f32 0.5, %v5762_v9 }
0x1ae8   :  { %v2971_v25 = vmul.f32 0.5, %v2879_v18 }
0x1ae9   :  { %v2978_v33 = vsel %vm494_vm5, %v2972_v29, -inf }
0x1aea   :  { %v2975_v32 = vsel %vm494_vm5, %v2971_v25, -inf }
0x1b59   :  { %v5769_v8 = vpop.f32.mrb[26].mxu1 }
0x1b5a   :  { %v2974_v19 = vmul.f32 0.5, %v5769_v8  ;;  %v2962_v20 = vpop.f32.mrb[27].mxu1 }
0x1b5b   :  { %v2973_v21 = vmul.f32 0.5, %v2962_v20  ;;  %v5342_v20 = vld [vmem:[#allocation7] ss:$0 sm:$0xff] }
0x1b5c   :  { %v2984_v28 = vsel %vm494_vm5, %v2974_v19, -inf }
0x1b5d   :  { %2985 = vmax.xlane.f32.xlu0 %v2984_v28  ;;  %v2981_v31 = vsel %vm494_vm5, %v2973_v21, -inf }
0x1b5e   :  { %2982 = vmax.xlane.f32.xlu1 %v2981_v31 }
0x1b61   :  { %2976 = vmax.xlane.f32.xlu0 %v2975_v32 }
0x1b62   :  { %2979 = vmax.xlane.f32.xlu1 %v2978_v33 }
0x1bea   :  { %v2986_v38 = vpop.xlane.xlu0 %2985 }
0x1beb   :  { %v2990_v40 = vsub.f32 %v2974_v19, %v2986_v38  ;;  %v2983_v41 = vpop.xlane.xlu1 %2982 }
0x1bec   :  { %v2989_v42 = vsub.f32 %v2973_v21, %v2983_v41 }
0x1bed   :  { %v2997_v34 = vmul.f32 1.442695, %v2990_v40 }
0x1bee   :  { %v2995_v43 = vmul.f32 1.442695, %v2989_v42  ;;  %v2977_v35 = vpop.xlane.xlu0 %2976 }
0x1bef   :  { %6277 = vpow2.f32 %v2997_v34  ;;  %v2987_v36 = vsub.f32 %v2971_v25, %v2977_v35  ;;  %v2980_v7 = vpop.xlane.xlu1 %2979 }
0x1bf0   :  { %6279 = vpow2.f32 %v2995_v43  ;;  %v2988_v37 = vsub.f32 %v2972_v29, %v2980_v7 }
0x1bf1   :  { %v2991_v44 = vmul.f32 1.442695, %v2987_v36 }
0x1bf2   :  { %v2993_v45 = vmul.f32 1.442695, %v2988_v37  ;;  %v3337_v37 = vld [vmem:[%s7326_s24] sm:$0xff] }
0x1bf3   :  { %6281 = vpow2.f32 %v2991_v44  ;;  %v3339_v44 = vld [vmem:[%s7327_s1] sm:$0xff] }
0x1bf4   :  { %6283 = vpow2.f32 %v2993_v45  ;;  %v3340_v45 = vld [vmem:[%s7327_s1 + $0x8] sm:$0xff] }
0x1bf9   :  { %v6278_v48 = vpop.eup %6277 }
0x1bfa   :  { %v6280_v49 = vpop.eup %6279  ;;  %v3008_v63 = vsel %vm494_vm5, %v6278_v48, 0.0 }
0x1bfb   :  { %3009 = vadd.xlane.f32.xlu1 %v3008_v63  ;;  %v3005_v50 = vsel %vm494_vm5, %v6280_v49, 0.0 }
0x1bfc   :  { %3006 = vadd.xlane.f32.xlu0 %v3005_v50 }
0x1bfd   :  { %v6282_v30 = vpop.eup %6281 }
0x1bfe   :  { %v2999_v52 = vsel %vm494_vm5, %v6282_v30, 0.0  ;;  %v6284_v27 = vpop.eup %6283 }
0x1bff   :  { %3000 = vadd.xlane.f32.xlu1 %v2999_v52  ;;  %v3002_v53 = vsel %vm494_vm5, %v6284_v27, 0.0 }
0x1c03   :  { %3003 = vadd.xlane.f32.xlu1 %v3002_v53 }
0x1c12   :  { %6165 = vrot.lane.b32.xlu0 %v6161_v0, %s6523_s5 }
0x1c14   :  { %6170 = vrot.lane.b32.xlu1 %v7068_v61, %s6523_s5 }
0x1c88   :  { %v3010_v23 = vpop.xlane.xlu1 %3009 }
0x1c89   :  { %6285 = vrcp.f32 %v3010_v23  ;;  %v3007_v54 = vpop.xlane.xlu0 %3006  ;;  %v5346_v23 = vld [vmem:[%s7328_s2] ss:$0 sm:$0xff] }
0x1c8a   :  { %6287 = vrcp.f32 %v3007_v54 }
0x1c8c   :  { %v3001_v2 = vpop.xlane.xlu1 %3000 }
0x1c8d   :  { %6289 = vrcp.f32 %v3001_v2  ;;  %v6166_v22 = vpop.permute.xlu0 %6165 }
0x1c8e   :  { %v6168_v24 = vunpack.i.h.bf16 %v6166_v22  ;;  %v6167_v1 = vunpack.i.l.bf16 %v6166_v22 }
0x1c90   :  { %v5994_v55 = vpack.c.bf16 %v6168_v24, %v6167_v1  ;;  %v3004_v57 = vpop.xlane.xlu1 %3003  ;;  %v5347_v24 = vld [vmem:[%s7328_s2 + $0x1] ss:$0 sm:$0xff] }
0x1c91   :  { %6291 = vrcp.f32 %v3004_v57 }
0x1c92   :  { %5995 = vmatprep.subr.bf16.mxu1 %v5994_v55 }
0x1c93   :  { %v6286_v58 = vpop.eup %6285  ;;  %5997 = vmatpush3.bf16.msra.mxu1 %v5994_v55 }
0x1c94   :  { %v6288_v59 = vpop.eup %6287  ;;  %v6171_v60 = vpop.permute.xlu1 %6170  ;;  %v3018_v0 = vmul.f32 %v6286_v58, %v6278_v48  ;;  %5789 = vmatprep.subr.mxu1 %v3337_v37  ;;  %v5998_v48 = vpack.c.bf16 %v3340_v45, %v3339_v44  ;;  %v5356_v45 = vld [vmem:[%s6678_s9 + $0x1] ss:$0 sm:$0xff] }
0x1c95   :  { %v6173_v6 = vunpack.i.h.bf16 %v6171_v60  ;;  %v6172_v39 = vunpack.i.l.bf16 %v6171_v60  ;;  %v3017_v61 = vmul.f32 %v6288_v59, %v6280_v49  ;;  %v3341_v59 = vld [vmem:[%s7327_s1 + $0x10] sm:$0xff]  ;;  %v3342_v60 = vld [vmem:[%s7327_s1 + $0x18] sm:$0xff] }
0x1c97   :  { %v6290_v3 = vpop.eup %6289  ;;  %v5990_v4 = vpack.c.bf16 %v6173_v6, %v6172_v39  ;;  %5781 = vmatprep.mubr.msk.f32.mxu1 %vm494_vm5, %v3017_v61  ;;  %v6002_v6 = vpack.c.bf16 %v3342_v60, %v3341_v59  ;;  %v5348_v39 = vld [vmem:[#allocation8] ss:$0 sm:$0xff] }
0x1c98   :  { %5782 = vmatmul.mubr.msk.f32.vlgmr.msra.gmra.mrb[28].mxu1 %vm494_vm5, %v3018_v0  ;;  %v3015_v5 = vmul.f32 %v6290_v3, %v6282_v30 }
0x1c99   :  { %5991 = vmatprep.subr.bf16.mxu0 %v5990_v4  ;;  %5790 = vmatpush3.msra.mxu1 %v3337_v37 }
0x1c9a   :  { %5993 = vmatpush3.bf16.msra.mxu0 %v5990_v4  ;;  %5774 = vmatprep.mubr.msk.f32.mxu0 %vm494_vm5, %v3015_v5 }
0x1c9b   :  { %v6292_v12 = vpop.eup %6291  ;;  %5784 = vmatprep.subr.mxu0 %v2710_v10 }
0x1c9c   :  { %v3016_v13 = vmul.f32 %v6292_v12, %v6284_v27 }
0x1c9e   :  { %5775 = vmatmul.mubr.msk.f32.vlgmr.msra.gmra.mrb[24].mxu0 %vm494_vm5, %v3016_v13  ;;  %v5351_v13 = vld [vmem:[#allocation10] ss:$0 sm:$0xff] }
0x1c9f   :  { %5785 = vmatpush3.msra.mxu0 %v2710_v10 }
0x1ca0   :  { %5999 = vmatprep.subr.bf16.mxu0 %v5998_v48 }
0x1d6b   :  { %v5783_v14 = vpop.f32.mrb[28].mxu1 }
0x1d6c   :  { %v3184_v11 = vpop.f32.mrb[29].mxu1 }
0x1d6d   :  { %3195 = vrot.lane.b32.xlu0 %v3184_v11, %s6526_s26 }
0x1d71   :  { %v5776_v16 = vpop.f32.mrb[24].mxu0  ;;  %3197 = vrot.lane.b32.xlu0 %v5783_v14, %s6526_s26 }
0x1d72   :  { %v3097_v17 = vpop.f32.mrb[25].mxu0 }
0x1ddf   :  { %v3196_v9 = vpop.permute.xlu0 %3195 }
0x1de0   :  { %v3201_v18 = vsel %vm315_vm1, %v3097_v17, %v3196_v9 }
0x1de1   :  { %5786 = vmatprep.mubr.msk.f32.mxu0 %vm223_vm0, %v3201_v18 }
0x1de3   :  { %v3198_v8 = vpop.permute.xlu0 %3197 }
0x1de4   :  { %v3202_v19 = vsel %vm315_vm1, %v5776_v16, %v3198_v8 }
0x1de5   :  { %5787 = vmatmul.mubr.msk.f32.vlgmr.msra.gmra.mrb[26].mxu0 %vm223_vm0, %v3202_v19 }
0x1de6   :  { %6001 = vmatpush3.bf16.msra.mxu0 %v5998_v48 }
0x1de7   :  { %6003 = vmatprep.subr.bf16.mxu0 %v6002_v6 }
0x1dea   :  { %6005 = vmatpush3.bf16.msra.mxu0 %v6002_v6 }
0x1eb8   :  { %v5788_v21 = vpop.f32.mrb[26].mxu0 }
0x1eb9   :  { %v3287_v25 = vadd.f32 %v5788_v21, %v5342_v20  ;;  %v3281_v28 = vpop.f32.mrb[27].mxu0 }
0x1eba   :  { %v3282_v29 = vadd.f32 %v5342_v20, %v3281_v28 }
0x1ebb   :  { %v3291_v31 = vadd.f32 %v3287_v25, %v7062_v56 }
0x1ebc   :  { %v3290_v32 = vadd.f32 %v3282_v29, %v7060_v26 }
0x1ebd   :  { %v3298_v33 = vsel %vm223_vm0, %v3291_v31, 0.0 }
0x1ebe   :  { %3299 = vadd.xlane.f32.xlu0 %v3298_v33  ;;  %v3295_v38 = vsel %vm223_vm0, %v3290_v32, 0.0 }
0x1ebf   :  { %3296 = vadd.xlane.f32.xlu1 %v3295_v38 }
0x1f4b   :  { %v3300_v40 = vpop.xlane.xlu0 %3299 }
0x1f4c   :  { %v3302_v41 = vmul.f32 0.125, %v3300_v40  ;;  %v3297_v42 = vpop.xlane.xlu1 %3296  ;;  %v5357_v40 = vld [vmem:[%s7317_s13 + $0x8] sm:$0xff] }
0x1f4d   :  { %v3301_v34 = vmul.f32 0.125, %v3297_v42  ;;  %5805 = vmatprep.subr.mxu1 %v5357_v40 }
0x1f4e   :  { %v3304_v43 = vsub.f32 %v3291_v31, %v3302_v41 }
0x1f4f   :  { %v3303_v35 = vsub.f32 %v3290_v32, %v3301_v34 }
0x1f50   :  { %v3306_v36 = vmul.f32 %v3304_v43, %v3304_v43 }
0x1f51   :  { %v3305_v7 = vmul.f32 %v3303_v35, %v3303_v35 }
0x1f52   :  { %v3310_v56 = vsel %vm223_vm0, %v3306_v36, 0.0 }
0x1f53   :  { %3311 = vadd.xlane.f32.xlu1 %v3310_v56  ;;  %v3307_v26 = vsel %vm223_vm0, %v3305_v7, 0.0  ;;  %v5355_v56 = vld [vmem:[%s6678_s9] ss:$0 sm:$0xff] }
0x1f54   :  { %3308 = vadd.xlane.f32.xlu0 %v3307_v26 }
0x1fe0   :  { %v3312_v49 = vpop.xlane.xlu1 %3311 }
0x1fe1   :  { %v3314_v63 = vmul.f32 0.125, %v3312_v49  ;;  %v3309_v50 = vpop.xlane.xlu0 %3308 }
0x1fe2   :  { %v3313_v30 = vmul.f32 0.125, %v3309_v50 }
0x1fe3   :  { %v3316_v52 = vadd.f32 1e-05, %v3314_v63 }
0x1fe4   :  { %v3315_v27 = vadd.f32 1e-05, %v3313_v30  ;;  %v5361_v30 = vld [vmem:[%s7319_s21 + $0x1] ss:$0 sm:$0xff] }
0x1fe5   :  { %6293 = vrsqrt.f32 %v3316_v52 }
0x1fe6   :  { %6295 = vrsqrt.f32 %v3315_v27 }
0x1fef   :  { %v6294_v53 = vpop.eup %6293 }
0x1ff0   :  { %v6296_v54 = vpop.eup %6295  ;;  %v3320_v2 = vmul.f32 %v6294_v53, %v3304_v43 }
0x1ff1   :  { %v3319_v22 = vmul.f32 %v6296_v54, %v3303_v35 }
0x1ff2   :  { %v3328_v1 = vmul.f32 %v5346_v23, %v3320_v2 }
0x1ff3   :  { %v3327_v55 = vmul.f32 %v5346_v23, %v3319_v22 }
0x1ff4   :  { %v3336_v58 = vadd.f32 %v5347_v24, %v3328_v1 }
0x1ff5   :  { %v3335_v57 = vadd.f32 %v5347_v24, %v3327_v55 }
0x1ff7   :  { %5791 = vmatprep.mubr.msk.f32.mxu1 %vm223_vm0, %v3335_v57 }
0x1ff8   :  { %5792 = vmatmul.mubr.msk.f32.vlgmr.msra.gmra.mrb[30].mxu1 %vm223_vm0, %v3336_v58 }
0x1ff9   :  { %5806 = vmatpush3.msra.mxu1 %v5357_v40 }
0x20cb   :  { %v5793_v61 = vpop.f32.mrb[30].mxu1 }
0x20cc   :  { %v3428_v0 = vadd.f32 %v5793_v61, %v5348_v39  ;;  %v3422_v3 = vpop.f32.mrb[31].mxu1 }
0x20cd   :  { %v3423_v4 = vadd.f32 %v5348_v39, %v3422_v3 }
0x20ce   :  { %v3432_v12 = vmax.f32 %v3428_v0, 0.0 }
0x20cf   :  { %v3431_v5 = vmax.f32 %v3423_v4, 0.0 }
0x20d1   :  { %5802 = vmatprep.mubr.msk.f32.mxu0 %vm960_vm6, %v3431_v5 }
0x20d2   :  { %5803 = vmatmul.mubr.msk.f32.vlgmr.msra.gmra.mrb[28].mxu0 %vm960_vm6, %v3432_v12 }
0x21a5   :  { %v5804_v10 = vpop.f32.mrb[28].mxu0 }
0x21a6   :  { %v3517_v14 = vadd.f32 %v5804_v10, %v5351_v13  ;;  %v3511_v11 = vpop.f32.mrb[29].mxu0 }
0x21a7   :  { %v3512_v16 = vadd.f32 %v5351_v13, %v3511_v11 }
0x21a8   :  { %v3521_v17 = vadd.f32 %v3517_v14, %v3336_v58 }
0x21a9   :  { %v3520_v9 = vadd.f32 %v3512_v16, %v3335_v57 }
0x21aa   :  { %v3528_v18 = vsel %vm223_vm0, %v3521_v17, 0.0 }
0x21ab   :  { %3529 = vadd.xlane.f32.xlu1 %v3528_v18  ;;  %v3525_v8 = vsel %vm223_vm0, %v3520_v9, 0.0 }
0x21ac   :  { %3526 = vadd.xlane.f32.xlu0 %v3525_v8 }
0x2238   :  { %v3530_v19 = vpop.xlane.xlu1 %3529 }
0x2239   :  { %v3532_v20 = vmul.f32 0.125, %v3530_v19  ;;  %v3527_v21 = vpop.xlane.xlu0 %3526 }
0x223a   :  { %v3531_v25 = vmul.f32 0.125, %v3527_v21 }
0x223b   :  { %v3534_v28 = vsub.f32 %v3521_v17, %v3532_v20 }
0x223c   :  { %v3533_v29 = vsub.f32 %v3520_v9, %v3531_v25 }
0x223d   :  { %v3536_v31 = vmul.f32 %v3534_v28, %v3534_v28 }
0x223e   :  { %v3535_v32 = vmul.f32 %v3533_v29, %v3533_v29 }
0x223f   :  { %v3540_v33 = vsel %vm223_vm0, %v3536_v31, 0.0 }
0x2240   :  { %3541 = vadd.xlane.f32.xlu1 %v3540_v33  ;;  %v3537_v38 = vsel %vm223_vm0, %v3535_v32, 0.0 }
0x2241   :  { %3538 = vadd.xlane.f32.xlu0 %v3537_v38 }
0x22cd   :  { %v3542_v41 = vpop.xlane.xlu1 %3541 }
0x22ce   :  { %v3544_v42 = vmul.f32 0.125, %v3542_v41  ;;  %v3539_v34 = vpop.xlane.xlu0 %3538 }
0x22cf   :  { %v3543_v43 = vmul.f32 0.125, %v3539_v34 }
0x22d0   :  { %v3546_v35 = vadd.f32 1e-05, %v3544_v42 }
0x22d1   :  { %v3545_v36 = vadd.f32 1e-05, %v3543_v43 }
0x22d2   :  { %6297 = vrsqrt.f32 %v3546_v35 }
0x22d3   :  { %6299 = vrsqrt.f32 %v3545_v36 }
0x22dc   :  { %v6298_v7 = vpop.eup %6297 }
0x22dd   :  { %v6300_v26 = vpop.eup %6299  ;;  %v3550_v37 = vmul.f32 %v6298_v7, %v3534_v28 }
0x22de   :  { %v3549_v44 = vmul.f32 %v6300_v26, %v3533_v29 }
0x22df   :  { %v3558_v48 = vmul.f32 %v5355_v56, %v3550_v37 }
0x22e0   :  { %v3557_v49 = vmul.f32 %v5355_v56, %v3549_v44 }
0x22e1   :  { %v7134_v50 = vadd.f32 %v5356_v45, %v3558_v48 }
0x22e2   :  { %v7132_v63 = vadd.f32 %v5356_v45, %v3557_v49 }
0x22e4   :  { %5807 = vmatprep.mubr.msk.f32.mxu1 %vm223_vm0, %v7132_v63 }
0x22e5   :  { %5808 = vmatmul.mubr.msk.f32.vlgmr.msra.gmra.mrb[32].mxu1 %vm223_vm0, %v7134_v50 }
0x23b8   :  { %v5809_v52 = vpop.f32.mrb[32].mxu1 }
0x23b9   :  { %v3659_v27 = vadd.f32 %v5809_v52, %v5361_v30  ;;  %v3653_v53 = vpop.f32.mrb[33].mxu1 }
0x23ba   :  { %v3654_v23 = vadd.f32 %v5361_v30, %v3653_v53 }
0x23bb   :  { %3666 = vrot.lane.b32.xlu1 %v3659_v27, %s6522_s6 }
0x23bc   :  { %3664 = vrot.lane.b32.xlu0 %v3654_v23, %s6522_s6  ;;  %5814 = vmatprep.mubr.msk.f32.mxu1 %vm315_vm1, %v3654_v23  ;;  %v7144_v54 = vpack.i.bf16 %v3659_v27, %v3654_v23 }
0x23c0   :  { %6180 = vrot.lane.b32.xlu0 %v7144_v54, %s6523_s5 }
0x242d   :  { %v3667_v2 = vpop.permute.xlu1 %3666 }
0x242e   :  { %v3665_v22 = vpop.permute.xlu0 %3664 }
0x242f   :  { %v7148_v24 = vpack.i.bf16 %v3667_v2, %v3665_v22  ;;  %5821 = vmatprep.mubr.msk.f32.mxu0 %vm315_vm1, %v3665_v22 }
0x2431   :  { %6175 = vrot.lane.b32.xlu1 %v7148_v24, %s6523_s5 }
0x2432   :  { %v6181_v1 = vpop.permute.xlu0 %6180 }
0x2433   :  { %v6183_v55 = vunpack.i.h.bf16 %v6181_v1  ;;  %v6182_v57 = vunpack.i.l.bf16 %v6181_v1 }
0x2435   :  { %v6006_v58 = vpack.c.bf16 %v6183_v55, %v6182_v57 }
0x2437   :  { %6008 = vmatprep.subr.msk.bf16.mxu1 %vm6765_vm2, %v6006_v58 }
0x2438   :  { %6011 = vmatpush3.bf16.xpose.msk.msra.mxu1 %vm6765_vm2, %v6006_v58 }
0x243f   :  { %5815 = vmatmul.mubr.msk.f32.vlgmr.msra.gmra.mrb[34].mxu1 %vm315_vm1, %v3659_v27  ;;  %v5383_v27 = vld [vmem:[%s7322_s3 + $0x8] sm:$0xff] }
0x24a3   :  { %v6176_v59 = vpop.permute.xlu1 %6175 }
0x24a4   :  { %v6178_v60 = vunpack.i.h.bf16 %v6176_v59  ;;  %v6177_v6 = vunpack.i.l.bf16 %v6176_v59 }
0x24a6   :  { %v6012_v39 = vpack.c.bf16 %v6178_v60, %v6177_v6  ;;  %v5359_v6 = vld [vmem:[%s7320_s25 + $0x8] sm:$0xff] }
0x24a8   :  { %6014 = vmatprep.subr.msk.bf16.mxu0 %vm6765_vm2, %v6012_v39 }
0x24a9   :  { %6017 = vmatpush3.bf16.xpose.msk.msra.mxu0 %vm6765_vm2, %v6012_v39 }
0x24b0   :  { %5822 = vmatmul.mubr.msk.f32.vlgmr.msra.gmra.mrb[30].mxu0 %vm315_vm1, %v3667_v2 }
0x2512   :  { %v5816_v61 = vpop.f32.mrb[34].mxu1 }
0x2513   :  { %v3746_v0 = vpop.f32.mrb[35].mxu1  ;;  %v3843_v13 = vmul.f32 0.5, %v5816_v61 }
0x2514   :  { %v3842_v4 = vmul.f32 0.5, %v3746_v0  ;;  %v5384_v0 = vld [vmem:[#allocation5 + $0x1] ss:$0 sm:$0xff] }
0x2515   :  { %v3847_v18 = vadd.f32 %v3843_v13, %v6992_v62 }
0x2516   :  { %v3846_v16 = vadd.f32 %v3842_v4, %v6995_v51 }
0x2517   :  { %v3853_v19 = vsel %vm494_vm5, %v3847_v18, -inf }
0x2518   :  { %v3850_v8 = vsel %vm494_vm5, %v3846_v16, -inf }
0x2583   :  { %v5823_v3 = vpop.f32.mrb[30].mxu0 }
0x2584   :  { %v3845_v5 = vmul.f32 0.5, %v5823_v3  ;;  %v3833_v12 = vpop.f32.mrb[31].mxu0 }
0x2585   :  { %v3844_v10 = vmul.f32 0.5, %v3833_v12 }
0x2586   :  { %v3849_v14 = vadd.f32 %v3845_v5, %v6992_v62 }
0x2587   :  { %v3848_v11 = vadd.f32 %v3844_v10, %v6995_v51 }
0x2588   :  { %v3859_v17 = vsel %vm494_vm5, %v3849_v14, -inf }
0x2589   :  { %3860 = vmax.xlane.f32.xlu0 %v3859_v17  ;;  %v3856_v9 = vsel %vm494_vm5, %v3848_v11, -inf }
0x258a   :  { %3857 = vmax.xlane.f32.xlu1 %v3856_v9  ;;  %v5376_v9 = vld [vmem:[%s7321_s29 + $0x1] ss:$0 sm:$0xff] }
0x258d   :  { %3851 = vmax.xlane.f32.xlu0 %v3850_v8 }
0x258e   :  { %3854 = vmax.xlane.f32.xlu1 %v3853_v19 }
0x2616   :  { %v3861_v20 = vpop.xlane.xlu0 %3860 }
0x2617   :  { %v3865_v21 = vsub.f32 %v3849_v14, %v3861_v20  ;;  %v3858_v25 = vpop.xlane.xlu1 %3857 }
0x2618   :  { %v3864_v28 = vsub.f32 %v3848_v11, %v3858_v25 }
0x2619   :  { %v3872_v29 = vmul.f32 1.442695, %v3865_v21 }
0x261a   :  { %v3870_v51 = vmul.f32 1.442695, %v3864_v28  ;;  %v3852_v31 = vpop.xlane.xlu0 %3851 }
0x261b   :  { %6301 = vpow2.f32 %v3872_v29  ;;  %v3862_v32 = vsub.f32 %v3846_v16, %v3852_v31  ;;  %v3855_v33 = vpop.xlane.xlu1 %3854 }
0x261c   :  { %6303 = vpow2.f32 %v3870_v51  ;;  %v3863_v38 = vsub.f32 %v3847_v18, %v3855_v33 }
0x261d   :  { %v3866_v62 = vmul.f32 1.442695, %v3862_v32 }
0x261e   :  { %v3868_v40 = vmul.f32 1.442695, %v3863_v38 }
0x261f   :  { %6305 = vpow2.f32 %v3866_v62 }
0x2620   :  { %6307 = vpow2.f32 %v3868_v40 }
0x2625   :  { %v6302_v41 = vpop.eup %6301 }
0x2626   :  { %v6304_v42 = vpop.eup %6303  ;;  %v3883_v34 = vsel %vm494_vm5, %v6302_v41, 0.0 }
0x2627   :  { %3884 = vadd.xlane.f32.xlu1 %v3883_v34  ;;  %v3880_v43 = vsel %vm494_vm5, %v6304_v42, 0.0 }
0x2628   :  { %3881 = vadd.xlane.f32.xlu0 %v3880_v43 }
0x2629   :  { %v6306_v35 = vpop.eup %6305 }
0x262a   :  { %v3874_v36 = vsel %vm494_vm5, %v6306_v35, 0.0  ;;  %v6308_v7 = vpop.eup %6307 }
0x262b   :  { %3875 = vadd.xlane.f32.xlu1 %v3874_v36  ;;  %v3877_v56 = vsel %vm494_vm5, %v6308_v7, 0.0 }
0x262f   :  { %3878 = vadd.xlane.f32.xlu1 %v3877_v56 }
0x263e   :  { %6185 = vrot.lane.b32.xlu0 %v7148_v24, %s6525_s20 }
0x2640   :  { %6190 = vrot.lane.b32.xlu1 %v7144_v54, %s6525_s20 }
0x26b4   :  { %v3885_v26 = vpop.xlane.xlu1 %3884 }
0x26b5   :  { %6309 = vrcp.f32 %v3885_v26  ;;  %v3882_v37 = vpop.xlane.xlu0 %3881 }
0x26b6   :  { %6311 = vrcp.f32 %v3882_v37 }
0x26b8   :  { %v3876_v44 = vpop.xlane.xlu1 %3875 }
0x26b9   :  { %6313 = vrcp.f32 %v3876_v44  ;;  %v6186_v45 = vpop.permute.xlu0 %6185 }
0x26ba   :  { %v6188_v48 = vunpack.i.h.bf16 %v6186_v45  ;;  %v6187_v49 = vunpack.i.l.bf16 %v6186_v45 }
0x26bc   :  { %v6022_v30 = vpack.c.bf16 %v6188_v48, %v6187_v49  ;;  %v3879_v52 = vpop.xlane.xlu1 %3878  ;;  %v5381_v49 = vld [vmem:[%s7324_s14 + $0x2] ss:$0 sm:$0xff] }
0x26bd   :  { %6315 = vrcp.f32 %v3879_v52 }
0x26be   :  { %6023 = vmatprep.subr.bf16.mxu0 %v6022_v30 }
0x26bf   :  { %v6310_v53 = vpop.eup %6309  ;;  %6025 = vmatpush3.bf16.msra.mxu0 %v6022_v30 }
0x26c0   :  { %v6312_v23 = vpop.eup %6311  ;;  %v6191_v2 = vpop.permute.xlu1 %6190  ;;  %5843 = vmatprep.subr.mxu0 %v5383_v27  ;;  %v3893_v1 = vmul.f32 %v6310_v53, %v6302_v41  ;;  %v5382_v53 = vld [vmem:[%s7324_s14 + $0x3] ss:$0 sm:$0xff] }
0x26c1   :  { %v6193_v54 = vunpack.i.h.bf16 %v6191_v2  ;;  %v6192_v22 = vunpack.i.l.bf16 %v6191_v2  ;;  %v3892_v24 = vmul.f32 %v6312_v23, %v6304_v42 }
0x26c3   :  { %v6314_v55 = vpop.eup %6313  ;;  %v6018_v57 = vpack.c.bf16 %v6193_v54, %v6192_v22  ;;  %5835 = vmatprep.mubr.msk.f32.mxu0 %vm494_vm5, %v3892_v24  ;;  %v5389_v24 = vld [vmem:[#allocation2 + $0x1] ss:$0 sm:$0xff] }
0x26c4   :  { %5836 = vmatmul.mubr.msk.f32.vlgmr.msra.gmra.mrb[32].mxu0 %vm494_vm5, %v3893_v1  ;;  %v3890_v58 = vmul.f32 %v6314_v55, %v6306_v35 }
0x26c5   :  { %6019 = vmatprep.subr.bf16.mxu1 %v6018_v57  ;;  %5845 = vmatprep.mubr.msk.f32.mxu0 %vm223_vm0, %v7045_v47 }
0x26c6   :  { %6021 = vmatpush3.bf16.msra.mxu1 %v6018_v57  ;;  %5828 = vmatprep.mubr.msk.f32.mxu1 %vm494_vm5, %v3890_v58 }
0x26c7   :  { %v6316_v59 = vpop.eup %6315  ;;  %5844 = vmatpush3.msra.mxu0 %v5383_v27  ;;  %5838 = vmatprep.subr.mxu1 %v5359_v6 }
0x26c8   :  { %v3891_v60 = vmul.f32 %v6316_v59, %v6308_v7  ;;  %5846 = vmatmul.mubr.msk.f32.vlgmr.msra.gmra.mrb[34].mxu0 %vm223_vm0, %v7043_v46 }
0x26ca   :  { %5829 = vmatmul.mubr.msk.f32.vlgmr.msra.gmra.mrb[36].mxu1 %vm494_vm5, %v3891_v60 }
0x26cb   :  { %5839 = vmatpush3.msra.mxu1 %v5359_v6 }
0x2797   :  { %v5837_v39 = vpop.f32.mrb[32].mxu0 }
0x2798   :  { %v4059_v61 = vpop.f32.mrb[33].mxu0 }
0x2799   :  { %4070 = vrot.lane.b32.xlu0 %v4059_v61, %s6526_s26 }
0x279b   :  { %v5847_v47 = vpop.f32.mrb[34].mxu0 }
0x279c   :  { %v4295_v3 = vadd.f32 %v5847_v47, %v5384_v0  ;;  %v4289_v4 = vpop.f32.mrb[35].mxu0 }
0x279d   :  { %v4290_v5 = vadd.f32 %v5384_v0, %v4289_v4  ;;  %v5830_v12 = vpop.f32.mrb[36].mxu1  ;;  %4072 = vrot.lane.b32.xlu0 %v5837_v39, %s6526_s26 }
0x279e   :  { %v3972_v13 = vpop.f32.mrb[37].mxu1 }
0x279f   :  { %v7191_v46 = vpack.i.bf16 %v4295_v3, %v4290_v5  ;;  %v6026_v10 = vpack.c.bf16 %v4295_v3, %v4290_v5 }
0x27a1   :  { %6028 = vmatprep.subr.msk.bf16.mxu0 %vm6765_vm2, %v6026_v10 }
0x27a2   :  { %6031 = vmatpush3.bf16.xpose.msk.msra.mxu0 %vm6765_vm2, %v6026_v10 }
0x280b   :  { %v4071_v14 = vpop.permute.xlu0 %4070 }
0x280c   :  { %v4076_v11 = vsel %vm315_vm1, %v3972_v13, %v4071_v14 }
0x280d   :  { %5840 = vmatprep.mubr.msk.f32.mxu1 %vm223_vm0, %v4076_v11 }
0x280f   :  { %v4073_v16 = vpop.permute.xlu0 %4072 }
0x2810   :  { %v4077_v17 = vsel %vm315_vm1, %v5830_v12, %v4073_v16 }
0x2811   :  { %5841 = vmatmul.mubr.msk.f32.vlgmr.msra.gmra.mrb[38].mxu1 %vm223_vm0, %v4077_v17 }
0x28e4   :  { %v5842_v18 = vpop.f32.mrb[38].mxu1 }
0x28e5   :  { %v4162_v8 = vadd.f32 %v5842_v18, %v5376_v9  ;;  %v4156_v19 = vpop.f32.mrb[39].mxu1 }
0x28e6   :  { %v4157_v20 = vadd.f32 %v5376_v9, %v4156_v19 }
0x28e7   :  { %v4166_v21 = vadd.f32 %v4162_v8, %v7134_v50  ;;  %v5387_v50 = vld [vmem:[%s7323_s8 + $0x8] sm:$0xff] }
0x28e8   :  { %v4165_v25 = vadd.f32 %v4157_v20, %v7132_v63  ;;  %5848 = vmatprep.subr.mxu1 %v5387_v50 }
0x28e9   :  { %v4174_v28 = vsel %vm223_vm0, %v4166_v21, 0.0  ;;  %5849 = vmatpush3.msra.mxu1 %v5387_v50 }
0x28ea   :  { %4175 = vadd.xlane.f32.xlu0 %v4174_v28  ;;  %v4171_v29 = vsel %vm223_vm0, %v4165_v25, 0.0 }
0x28eb   :  { %4172 = vadd.xlane.f32.xlu1 %v4171_v29 }
0x2977   :  { %v4176_v51 = vpop.xlane.xlu0 %4175 }
0x2978   :  { %v4178_v31 = vmul.f32 0.125, %v4176_v51  ;;  %v4173_v32 = vpop.xlane.xlu1 %4172 }
0x2979   :  { %v4177_v33 = vmul.f32 0.125, %v4173_v32 }
0x297a   :  { %v4180_v38 = vsub.f32 %v4166_v21, %v4178_v31 }
0x297b   :  { %v4179_v62 = vsub.f32 %v4165_v25, %v4177_v33 }
0x297c   :  { %v4182_v40 = vmul.f32 %v4180_v38, %v4180_v38 }
0x297d   :  { %v4181_v41 = vmul.f32 %v4179_v62, %v4179_v62 }
0x297e   :  { %v4186_v42 = vsel %vm223_vm0, %v4182_v40, 0.0 }
0x297f   :  { %4187 = vadd.xlane.f32.xlu1 %v4186_v42  ;;  %v4183_v63 = vsel %vm223_vm0, %v4181_v41, 0.0 }
0x2980   :  { %4184 = vadd.xlane.f32.xlu0 %v4183_v63 }
0x2996   :  { %6195 = vrot.lane.b32.xlu0 %v7191_v46, %s6522_s6 }
0x2a0c   :  { %v4188_v34 = vpop.xlane.xlu1 %4187 }
0x2a0d   :  { %v4190_v43 = vmul.f32 0.125, %v4188_v34  ;;  %v4185_v35 = vpop.xlane.xlu0 %4184 }
0x2a0e   :  { %v4189_v36 = vmul.f32 0.125, %v4185_v35 }
0x2a0f   :  { %v4192_v7 = vadd.f32 1e-05, %v4190_v43 }
0x2a10   :  { %v4191_v56 = vadd.f32 1e-05, %v4189_v36 }
0x2a11   :  { %6317 = vrsqrt.f32 %v4192_v7  ;;  %v7211_v26 = vpop.permute.xlu0 %6195 }
0x2a12   :  { %6319 = vrsqrt.f32 %v4191_v56  ;;  %v6198_v37 = vunpack.i.h.bf16 %v7211_v26  ;;  %v6197_v44 = vunpack.i.l.bf16 %v7211_v26 }
0x2a14   :  { %v6032_v45 = vpack.c.bf16 %v6198_v37, %v6197_v44 }
0x2a16   :  { %6034 = vmatprep.subr.msk.bf16.mxu1 %vm6765_vm2, %v6032_v45 }
0x2a1b   :  { %v6318_v48 = vpop.eup %6317 }
0x2a1c   :  { %v6320_v30 = vpop.eup %6319  ;;  %v4196_v52 = vmul.f32 %v6318_v48, %v4180_v38 }
0x2a1d   :  { %v4195_v27 = vmul.f32 %v6320_v30, %v4179_v62 }
0x2a1e   :  { %v4204_v23 = vmul.f32 %v5381_v49, %v4196_v52 }
0x2a1f   :  { %v4203_v2 = vmul.f32 %v5381_v49, %v4195_v27 }
0x2a20   :  { %v7221_v22 = vadd.f32 %v5382_v53, %v4204_v23 }
0x2a21   :  { %v7219_v54 = vadd.f32 %v5382_v53, %v4203_v2  ;;  %v5388_v53 = vld [vmem:[%s7325_s19 + $0x8] sm:$0xff] }
0x2a23   :  { %5850 = vmatprep.mubr.msk.f32.mxu1 %vm223_vm0, %v7219_v54 }
0x2a24   :  { %5851 = vmatmul.mubr.msk.f32.vlgmr.msra.gmra.mrb[40].mxu1 %vm223_vm0, %v7221_v22 }
0x2a25   :  { %6037 = vmatpush3.bf16.xpose.msk.msra.mxu1 %vm6765_vm2, %v6032_v45 }
0x2af7   :  { %v5852_v1 = vpop.f32.mrb[40].mxu1 }
0x2af8   :  { %v4390_v55 = vpop.f32.mrb[41].mxu1  ;;  %v4396_v58 = vadd.f32 %v5852_v1, %v5389_v24 }
0x2af9   :  { %v4391_v57 = vadd.f32 %v5389_v24, %v4390_v55 }
0x2afb   :  { %4401 = vrot.lane.b32.xlu1 %v4391_v57, %s6522_s6  ;;  %5857 = vmatprep.mubr.msk.f32.mxu0 %vm315_vm1, %v4391_v57 }
0x2afc   :  { %5858 = vmatmul.mubr.msk.f32.vlgmr.msra.gmra.mrb[36].mxu0 %vm315_vm1, %v4396_v58 }
0x2aff   :  { %4403 = vrot.lane.b32.xlu1 %v4396_v58, %s6522_s6 }
0x2b6d   :  { %v4402_v59 = vpop.permute.xlu1 %4401 }
0x2b6e   :  { %5864 = vmatprep.mubr.msk.f32.mxu1 %vm315_vm1, %v4402_v59 }
0x2b71   :  { %v4404_v60 = vpop.permute.xlu1 %4403 }
0x2b72   :  { %5865 = vmatmul.mubr.msk.f32.vlgmr.msra.gmra.mrb[42].mxu1 %vm315_vm1, %v4404_v60  ;;  %v5404_v60 = vld [vmem:[#allocation7 + $0x1] ss:$0 sm:$0xff] }
0x2bcf   :  { %v5859_v15 = vpop.f32.mrb[36].mxu0 }
0x2bd0   :  { %v4479_v6 = vpop.f32.mrb[37].mxu0  ;;  %v4572_v12 = vmul.f32 0.5, %v5859_v15 }
0x2bd1   :  { %v4571_v4 = vmul.f32 0.5, %v4479_v6 }
0x2bd2   :  { %v4578_v10 = vsel %vm494_vm5, %v4572_v12, -inf }
0x2bd3   :  { %v4575_v13 = vsel %vm494_vm5, %v4571_v4, -inf }
0x2c45   :  { %v5866_v39 = vpop.f32.mrb[42].mxu1 }
0x2c46   :  { %v4574_v61 = vmul.f32 0.5, %v5866_v39  ;;  %v4562_v0 = vpop.f32.mrb[43].mxu1 }
0x2c47   :  { %v4573_v47 = vmul.f32 0.5, %v4562_v0 }
0x2c48   :  { %v4584_v3 = vsel %vm494_vm5, %v4574_v61, -inf }
0x2c49   :  { %4585 = vmax.xlane.f32.xlu1 %v4584_v3  ;;  %v4581_v5 = vsel %vm494_vm5, %v4573_v47, -inf }
0x2c4a   :  { %4582 = vmax.xlane.f32.xlu0 %v4581_v5 }
0x2c4e   :  { %4576 = vmax.xlane.f32.xlu0 %v4575_v13 }
0x2c52   :  { %4579 = vmax.xlane.f32.xlu0 %v4578_v10 }
0x2cd6   :  { %v4586_v14 = vpop.xlane.xlu1 %4585 }
0x2cd7   :  { %v4590_v11 = vsub.f32 %v4574_v61, %v4586_v14  ;;  %v4583_v16 = vpop.xlane.xlu0 %4582 }
0x2cd8   :  { %v4589_v17 = vsub.f32 %v4573_v47, %v4583_v16 }
0x2cd9   :  { %v4597_v9 = vmul.f32 1.442695, %v4590_v11 }
0x2cda   :  { %v4595_v18 = vmul.f32 1.442695, %v4589_v17 }
0x2cdb   :  { %6321 = vpow2.f32 %v4597_v9  ;;  %v4577_v8 = vpop.xlane.xlu0 %4576  ;;  %v5411_v9 = vld [vmem:[%s7326_s24 + $0x8] sm:$0xff] }
0x2cdc   :  { %6323 = vpow2.f32 %v4595_v18  ;;  %v4587_v19 = vsub.f32 %v4571_v4, %v4577_v8  ;;  %v5412_v18 = vld [vmem:[%s7327_s1 + $0x20] sm:$0xff]  ;;  %v5413_v8 = vld [vmem:[%s7327_s1 + $0x28] sm:$0xff] }
0x2cde   :  { %v4591_v20 = vmul.f32 1.442695, %v4587_v19  ;;  %v6046_v19 = vpack.c.bf16 %v5413_v8, %v5412_v18 }
0x2cdf   :  { %v4580_v21 = vpop.xlane.xlu0 %4579 }
0x2ce0   :  { %6325 = vpow2.f32 %v4591_v20  ;;  %v4588_v25 = vsub.f32 %v4572_v12, %v4580_v21 }
0x2ce2   :  { %v4593_v28 = vmul.f32 1.442695, %v4588_v25 }
0x2ce4   :  { %6327 = vpow2.f32 %v4593_v28 }
0x2ce5   :  { %v6322_v29 = vpop.eup %6321 }
0x2ce6   :  { %v6324_v51 = vpop.eup %6323  ;;  %v4608_v31 = vsel %vm494_vm5, %v6322_v29, 0.0 }
0x2ce7   :  { %4609 = vadd.xlane.f32.xlu0 %v4608_v31  ;;  %v4605_v32 = vsel %vm494_vm5, %v6324_v51, 0.0 }
0x2ce8   :  { %4606 = vadd.xlane.f32.xlu1 %v4605_v32  ;;  %v5409_v32 = vld [vmem:[%s7328_s2 + $0x2] ss:$0 sm:$0xff] }
0x2cea   :  { %v6326_v33 = vpop.eup %6325 }
0x2ceb   :  { %v4599_v38 = vsel %vm494_vm5, %v6326_v33, 0.0 }
0x2cec   :  { %4600 = vadd.xlane.f32.xlu0 %v4599_v38 }
0x2cee   :  { %v6328_v62 = vpop.eup %6327 }
0x2cef   :  { %v4602_v40 = vsel %vm494_vm5, %v6328_v62, 0.0 }
0x2cf0   :  { %4603 = vadd.xlane.f32.xlu0 %v4602_v40  ;;  %v5410_v40 = vld [vmem:[%s7328_s2 + $0x3] ss:$0 sm:$0xff] }
0x2cf9   :  { %6200 = vrot.lane.b32.xlu1 %v7211_v26, %s6523_s5 }
0x2d06   :  { %6205 = vrot.lane.b32.xlu0 %v7191_v46, %s6523_s5 }
0x2d74   :  { %v4610_v41 = vpop.xlane.xlu0 %4609 }
0x2d75   :  { %6329 = vrcp.f32 %v4610_v41  ;;  %v4607_v42 = vpop.xlane.xlu1 %4606 }
0x2d76   :  { %6331 = vrcp.f32 %v4607_v42 }
0x2d79   :  { %v6201_v63 = vpop.permute.xlu1 %6200  ;;  %v4601_v50 = vpop.xlane.xlu0 %4600 }
0x2d7a   :  { %v6203_v34 = vunpack.i.h.bf16 %v6201_v63  ;;  %v6202_v43 = vunpack.i.l.bf16 %v6201_v63  ;;  %6333 = vrcp.f32 %v4601_v50 }
0x2d7c   :  { %v6042_v35 = vpack.c.bf16 %v6203_v34, %v6202_v43  ;;  %v5414_v34 = vld [vmem:[%s7327_s1 + $0x30] sm:$0xff]  ;;  %v5415_v43 = vld [vmem:[%s7327_s1 + $0x38] sm:$0xff] }
0x2d7d   :  { %v4604_v36 = vpop.xlane.xlu0 %4603 }
0x2d7e   :  { %6335 = vrcp.f32 %v4604_v36  ;;  %6043 = vmatprep.subr.bf16.mxu1 %v6042_v35  ;;  %v5416_v36 = vld [vmem:[#allocation8 + $0x1] ss:$0 sm:$0xff] }
0x2d7f   :  { %v6330_v7 = vpop.eup %6329  ;;  %6045 = vmatpush3.bf16.msra.mxu1 %v6042_v35  ;;  %v6050_v35 = vpack.c.bf16 %v5415_v43, %v5414_v34 }
0x2d80   :  { %v6332_v56 = vpop.eup %6331  ;;  %v4618_v46 = vmul.f32 %v6330_v7, %v6322_v29  ;;  %5886 = vmatprep.subr.mxu1 %v5411_v9 }
0x2d81   :  { %v6206_v26 = vpop.permute.xlu0 %6205  ;;  %v4617_v37 = vmul.f32 %v6332_v56, %v6324_v51 }
0x2d82   :  { %v6208_v44 = vunpack.i.h.bf16 %v6206_v26  ;;  %v6207_v45 = vunpack.i.l.bf16 %v6206_v26 }
0x2d83   :  { %5878 = vmatprep.mubr.msk.f32.mxu1 %vm494_vm5, %v4617_v37 }
0x2d84   :  { %v6334_v48 = vpop.eup %6333  ;;  %v6038_v49 = vpack.c.bf16 %v6208_v44, %v6207_v45  ;;  %5879 = vmatmul.mubr.msk.f32.vlgmr.msra.gmra.mrb[44].mxu1 %vm494_vm5, %v4618_v46  ;;  %v5419_v45 = vld [vmem:[#allocation10 + $0x1] ss:$0 sm:$0xff] }
0x2d85   :  { %v4615_v30 = vmul.f32 %v6334_v48, %v6326_v33  ;;  %5887 = vmatpush3.msra.mxu1 %v5411_v9 }
0x2d86   :  { %6039 = vmatprep.subr.bf16.mxu0 %v6038_v49 }
0x2d87   :  { %6041 = vmatpush3.bf16.msra.mxu0 %v6038_v49  ;;  %5871 = vmatprep.mubr.msk.f32.mxu0 %vm494_vm5, %v4615_v30 }
0x2d88   :  { %v6336_v52 = vpop.eup %6335  ;;  %5881 = vmatprep.subr.mxu0 %v5388_v53 }
0x2d89   :  { %v4616_v27 = vmul.f32 %v6336_v52, %v6328_v62 }
0x2d8b   :  { %5872 = vmatmul.mubr.msk.f32.vlgmr.msra.gmra.mrb[38].mxu0 %vm494_vm5, %v4616_v27 }
0x2d8c   :  { %5882 = vmatpush3.msra.mxu0 %v5388_v53 }
0x2d8d   :  { %6047 = vmatprep.subr.bf16.mxu0 %v6046_v19 }
0x2e57   :  { %v5880_v23 = vpop.f32.mrb[44].mxu1 }
0x2e58   :  { %v4784_v2 = vpop.f32.mrb[45].mxu1 }
0x2e59   :  { %4795 = vrot.lane.b32.xlu1 %v4784_v2, %s6526_s26 }
0x2e5d   :  { %4797 = vrot.lane.b32.xlu1 %v5880_v23, %s6526_s26 }
0x2e5e   :  { %v5873_v24 = vpop.f32.mrb[38].mxu0 }
0x2e5f   :  { %v4697_v1 = vpop.f32.mrb[39].mxu0 }
0x2ecb   :  { %v4796_v55 = vpop.permute.xlu1 %4795 }
0x2ecc   :  { %v4801_v57 = vsel %vm315_vm1, %v4697_v1, %v4796_v55 }
0x2ecd   :  { %5883 = vmatprep.mubr.msk.f32.mxu0 %vm223_vm0, %v4801_v57 }
0x2ecf   :  { %v4798_v58 = vpop.permute.xlu1 %4797 }
0x2ed0   :  { %v4802_v59 = vsel %vm315_vm1, %v5873_v24, %v4798_v58 }
0x2ed1   :  { %5884 = vmatmul.mubr.msk.f32.vlgmr.msra.gmra.mrb[40].mxu0 %vm223_vm0, %v4802_v59 }
0x2ed2   :  { %6049 = vmatpush3.bf16.msra.mxu0 %v6046_v19 }
0x2ed3   :  { %6051 = vmatprep.subr.bf16.mxu0 %v6050_v35 }
0x2ed6   :  { %6053 = vmatpush3.bf16.msra.mxu0 %v6050_v35 }
0x2fa4   :  { %v5885_v15 = vpop.f32.mrb[40].mxu0 }
0x2fa5   :  { %v4887_v6 = vadd.f32 %v5885_v15, %v5404_v60  ;;  %v4881_v39 = vpop.f32.mrb[41].mxu0 }
0x2fa6   :  { %v4882_v61 = vadd.f32 %v5404_v60, %v4881_v39 }
0x2fa7   :  { %v4891_v0 = vadd.f32 %v4887_v6, %v7221_v22 }
0x2fa8   :  { %v4890_v47 = vadd.f32 %v4882_v61, %v7219_v54 }
0x2fa9   :  { %v4899_v3 = vsel %vm223_vm0, %v4891_v0, 0.0 }
0x2faa   :  { %4900 = vadd.xlane.f32.xlu0 %v4899_v3  ;;  %v4896_v4 = vsel %vm223_vm0, %v4890_v47, 0.0 }
0x2fab   :  { %4897 = vadd.xlane.f32.xlu1 %v4896_v4 }
0x3037   :  { %v4901_v5 = vpop.xlane.xlu0 %4900 }
0x3038   :  { %v4903_v12 = vmul.f32 0.125, %v4901_v5  ;;  %v4898_v13 = vpop.xlane.xlu1 %4897 }
0x3039   :  { %v4902_v10 = vmul.f32 0.125, %v4898_v13  ;;  %v5424_v13 = vld [vmem:[%s6678_s9 + $0x2] ss:$0 sm:$0xff] }
0x303a   :  { %v4905_v14 = vsub.f32 %v4891_v0, %v4903_v12 }
0x303b   :  { %v4904_v11 = vsub.f32 %v4890_v47, %v4902_v10 }
0x303c   :  { %v4907_v16 = vmul.f32 %v4905_v14, %v4905_v14 }
0x303d   :  { %v4906_v17 = vmul.f32 %v4904_v11, %v4904_v11 }
0x303e   :  { %v4911_v22 = vsel %vm223_vm0, %v4907_v16, 0.0  ;;  %v5425_v16 = vld [vmem:[%s6678_s9 + $0x3] ss:$0 sm:$0xff] }
0x303f   :  { %4912 = vadd.xlane.f32.xlu0 %v4911_v22  ;;  %v4908_v54 = vsel %vm223_vm0, %v4906_v17, 0.0 }
0x3040   :  { %4909 = vadd.xlane.f32.xlu1 %v4908_v54 }
0x30cc   :  { %v4913_v20 = vpop.xlane.xlu0 %4912 }
0x30cd   :  { %v4915_v21 = vmul.f32 0.125, %v4913_v20  ;;  %v4910_v25 = vpop.xlane.xlu1 %4909 }
0x30ce   :  { %v4914_v28 = vmul.f32 0.125, %v4910_v25 }
0x30cf   :  { %v4917_v29 = vadd.f32 1e-05, %v4915_v21 }
0x30d0   :  { %v4916_v51 = vadd.f32 1e-05, %v4914_v28 }
0x30d1   :  { %6337 = vrsqrt.f32 %v4917_v29 }
0x30d2   :  { %6339 = vrsqrt.f32 %v4916_v51 }
0x30db   :  { %v6338_v31 = vpop.eup %6337 }
0x30dc   :  { %v6340_v33 = vpop.eup %6339  ;;  %v4921_v38 = vmul.f32 %v6338_v31, %v4905_v14 }
0x30dd   :  { %v4920_v62 = vmul.f32 %v6340_v33, %v4904_v11 }
0x30de   :  { %v4929_v41 = vmul.f32 %v5409_v32, %v4921_v38 }
0x30df   :  { %v4928_v42 = vmul.f32 %v5409_v32, %v4920_v62 }
0x30e0   :  { %v4937_v50 = vadd.f32 %v5410_v40, %v4929_v41 }
0x30e1   :  { %v4936_v63 = vadd.f32 %v5410_v40, %v4928_v42 }
0x30e3   :  { %5888 = vmatprep.mubr.msk.f32.mxu1 %vm223_vm0, %v4936_v63 }
0x30e4   :  { %5889 = vmatmul.mubr.msk.f32.vlgmr.msra.gmra.mrb[46].mxu1 %vm223_vm0, %v4937_v50 }
0x31b7   :  { %v5890_v7 = vpop.f32.mrb[46].mxu1 }
0x31b8   :  { %v5033_v56 = vadd.f32 %v5890_v7, %v5416_v36  ;;  %v5027_v26 = vpop.f32.mrb[47].mxu1 }
0x31b9   :  { %v5028_v37 = vadd.f32 %v5416_v36, %v5027_v26 }
0x31ba   :  { %v5037_v44 = vmax.f32 %v5033_v56, 0.0 }
0x31bb   :  { %v5036_v46 = vmax.f32 %v5028_v37, 0.0 }
0x31bd   :  { %5899 = vmatprep.mubr.msk.f32.mxu0 %vm960_vm6, %v5036_v46 }
0x31be   :  { %5900 = vmatmul.mubr.msk.f32.vlgmr.msra.gmra.mrb[42].mxu0 %vm960_vm6, %v5037_v44 }
0x3291   :  { %v5901_v48 = vpop.f32.mrb[42].mxu0 }
0x3292   :  { %v5122_v49 = vadd.f32 %v5901_v48, %v5419_v45  ;;  %v5116_v30 = vpop.f32.mrb[43].mxu0 }
0x3293   :  { %v5117_v52 = vadd.f32 %v5419_v45, %v5116_v30 }
0x3294   :  { %v5126_v27 = vadd.f32 %v5122_v49, %v4937_v50 }
0x3295   :  { %v5125_v53 = vadd.f32 %v5117_v52, %v4936_v63 }
0x3296   :  { %v5134_v23 = vsel %vm223_vm0, %v5126_v27, 0.0 }
0x3297   :  { %5135 = vadd.xlane.f32.xlu0 %v5134_v23  ;;  %v5131_v2 = vsel %vm223_vm0, %v5125_v53, 0.0 }
0x3298   :  { %5132 = vadd.xlane.f32.xlu1 %v5131_v2 }
0x3324   :  { %v5136_v24 = vpop.xlane.xlu0 %5135 }
0x3325   :  { %v5138_v1 = vmul.f32 0.125, %v5136_v24  ;;  %v5133_v55 = vpop.xlane.xlu1 %5132 }
0x3326   :  { %v5137_v57 = vmul.f32 0.125, %v5133_v55 }
0x3327   :  { %v5140_v58 = vsub.f32 %v5126_v27, %v5138_v1 }
0x3328   :  { %v5139_v59 = vsub.f32 %v5125_v53, %v5137_v57 }
0x3329   :  { %v5142_v60 = vmul.f32 %v5140_v58, %v5140_v58 }
0x332a   :  { %v5141_v15 = vmul.f32 %v5139_v59, %v5139_v59 }
0x332b   :  { %v5146_v6 = vsel %vm223_vm0, %v5142_v60, 0.0 }
0x332c   :  { %5147 = vadd.xlane.f32.xlu0 %v5146_v6  ;;  %v5143_v39 = vsel %vm223_vm0, %v5141_v15, 0.0 }
0x332d   :  { %5144 = vadd.xlane.f32.xlu1 %v5143_v39 }
0x33b9   :  { %v5148_v61 = vpop.xlane.xlu0 %5147 }
0x33ba   :  { %v5150_v0 = vmul.f32 0.125, %v5148_v61  ;;  %v5145_v47 = vpop.xlane.xlu1 %5144 }
0x33bb   :  { %v5149_v3 = vmul.f32 0.125, %v5145_v47 }
0x33bc   :  { %v5152_v4 = vadd.f32 1e-05, %v5150_v0 }
0x33bd   :  { %v5151_v5 = vadd.f32 1e-05, %v5149_v3 }
0x33be   :  { %6341 = vrsqrt.f32 %v5152_v4 }
0x33bf   :  { %6343 = vrsqrt.f32 %v5151_v5 }
0x33c8   :  { %v6342_v12 = vpop.eup %6341 }
0x33c9   :  { %v6344_v10 = vpop.eup %6343  ;;  %v5156_v14 = vmul.f32 %v6342_v12, %v5140_v58 }
0x33ca   :  { %v5155_v11 = vmul.f32 %v6344_v10, %v5139_v59 }
0x33cb   :  { %v5164_v17 = vmul.f32 %v5424_v13, %v5156_v14 }
0x33cc   :  { %v5163_v22 = vmul.f32 %v5424_v13, %v5155_v11 }
0x33cd   :  { %v5172_v54 = vadd.f32 %v5425_v16, %v5164_v17 }
0x33ce   :  { %v5171_v9 = vadd.f32 %v5425_v16, %v5163_v22 }
0x33cf   :  { %5176 = vst.msk [vmem:[#allocation11 + $0x8] sm:$0xff] %vm223_vm0, %v5172_v54 }
0x33d0   :  { %5175 = vst.msk [vmem:[#allocation11] sm:$0xff] %vm223_vm0, %v5171_v9 }
0x33d1   :  { %6466 = shalt.err (!%p6463_p2)
}
0x33d2   :  { %s6467_s9 = scalar_lea.hbm %s6688_s30, 256 }
0x33d3   :  { %p6468_p3 = scmp.ne.s32.totalorder %s6688_s30, %s6467_s9  ;;  %p6471_p4 = scmp.lt.u32.totalorder %s6467_s9, %s6688_s30 }
0x33d5   :  { %p6473_p5 = pnand %p6471_p4, %p6468_p3 }
0x33d7   :  { %6476 = shalt.err (!%p6473_p5)
}
0x33d8   :  { %s6528_s11 = smov 128   ;;  %s6529_s15 = smov 8  }
0x33d9   :  { %5190 = dma.vmem_to_hbm [thread:$0]  %s5185_s7, 256, %s6688_s30, [#allocation4], %s6528_s11, %s6528_s11, %s6529_s15  }
0x33da   :  { %6483 = dma.done.wait [#allocation4], 256  }
0x33db   :  { %6484 = vsyncadd [#allocation4], 4294967040 }
0x33dc   :  { %5196 = vsyncpa [#allocation3], 1 }
0x33dd   :  { %5197 = vsyncpa [#allocation6], 1 }
0x33de   :  { %5198 = vsyncpa [#allocation9], 1 }
0x33df   :  { %5199 = vsyncpa [#allocation4], 1 }

</bundles_post_ra>
